<compile_context>
chip_gen: v5e
topology: v5e:2x2
jax: 0.10.0
libtpu: 0.0.40
codegen_flags: <defaults>
</compile_context>

<pallas_src>
import jax
import jax.numpy as jnp
from jax import lax
from jax.experimental import pallas as pl
from jax.experimental.pallas import tpu as pltpu

LATENT_SIZE = 32      # < 128  ->  fc2 / fc3 path taken, as in the PyTorch module
B_TILE = 1            # one sample per grid step (batch axis is "parallel")
SEQ_LEN = 96
IN_CH = 6
OUT_LEN = 100


# ---------------------------------------------------------------------------
# In-kernel helpers (operate on traced values / VMEM refs)
# ---------------------------------------------------------------------------
def _conv3_im2col(h, wcat_ref, b_ref, cat_ref, *, relu, pool):
    """k=3 / stride=1 / pad=1 conv on an NLC value via one im2col matmul.

    h        : (B, L, Cin) f32 value
    wcat_ref : (3*Cin, Cout) ref, rows tap-major [W_tap0; W_tap1; W_tap2]
               (taps already flipped for transposed convs by the wrapper)
    b_ref    : (1, Cout) ref
    cat_ref  : VMEM scratch holding at least (B, L, 3*Cin)
    Optionally fuses ReLU and MaxPool1d(kernel=2, stride=2).
    """
    B, L, Cin = h.shape
    wcat = wcat_ref[...]
    Cout = wcat.shape[1]
    zrow = jnp.zeros((B, 1, Cin), jnp.float32)

    # im2col row l = [x_pad[l], x_pad[l+1], x_pad[l+2]] = [h[l-1], h[l], h[l+1]]
    cat_ref[:, 0:1, 0:Cin] = zrow
    cat_ref[:, 1:L, 0:Cin] = h[:, 0:L - 1, :]
    cat_ref[:, 0:L, Cin:2 * Cin] = h
    cat_ref[:, 0:L - 1, 2 * Cin:3 * Cin] = h[:, 1:L, :]
    cat_ref[:, L - 1:L, 2 * Cin:3 * Cin] = zrow

    xc = cat_ref[:, 0:L, 0:3 * Cin].reshape(B * L, 3 * Cin)
    acc = jnp.dot(xc, wcat, preferred_element_type=jnp.float32) + b_ref[...]
    if relu:
        acc = jnp.maximum(acc, 0.0)
    if pool:
        acc = acc.reshape(B * (L // 2), 2, Cout)
        acc = jnp.maximum(acc[:, 0, :], acc[:, 1, :])
        return acc.reshape(B, L // 2, Cout)
    return acc.reshape(B, L, Cout)


def _fused_kernel(x_ref,
                  we1_ref, be1_ref, we2_ref, be2_ref, we3_ref, be3_ref,
                  w1_ref, b1_ref, w2_ref, b2_ref, w3_ref, b3_ref,
                  w4_ref, b4_ref,
                  wd10_ref, wd11_ref, wd12_ref, bd1_ref,
                  wd2_ref, bd2_ref, wd3_ref, bd3_ref,
                  o_ref,
                  cat_ref, r3p_ref, up_ref):
    f32 = jnp.float32
    B = x_ref.shape[0]

    # ------------------------------ encoder ------------------------------
    h = x_ref[...]                                                            # (B, 96, 6)
    h = _conv3_im2col(h, we1_ref, be1_ref, cat_ref, relu=True, pool=True)     # (B, 48, 16)
    h = _conv3_im2col(h, we2_ref, be2_ref, cat_ref, relu=True, pool=True)     # (B, 24, 32)
    h = _conv3_im2col(h, we3_ref, be3_ref, cat_ref, relu=True, pool=True)     # (B, 12, 64)

    # -------------------- fc chain (NCL flatten folded into weights) -----
    z = None
    for l in range(12):
        t = jnp.dot(h[:, l, :], w1_ref[l], preferred_element_type=f32)        # (B, 128)
        z = t if z is None else z + t
    z = z + b1_ref[...]
    z = jnp.dot(z, w2_ref[...], preferred_element_type=f32) + b2_ref[...]     # (B, latent)
    z = jnp.dot(z, w3_ref[...], preferred_element_type=f32) + b3_ref[...]     # (B, 128)
    r = jnp.dot(z, w4_ref[...], preferred_element_type=f32) + b4_ref[...]     # (B, 768), NLC order

    # ---- dec1: ConvTranspose1d(64->32, k3, s2, p0) via even/odd phase decomposition ----
    zr = jnp.zeros((B, 1, 64), f32)
    r3p_ref[:, 0:1, :] = zr                      # r_{-1} = 0
    r3p_ref[:, 13:14, :] = zr                    # r_{12} = 0
    for l in range(12):
        r3p_ref[:, l + 1:l + 2, :] = r[:, l * 64:(l + 1) * 64].reshape(B, 1, 64)

    x_cur = r3p_ref[:, 1:14, :].reshape(B * 13, 64)    # r_m,    m = 0..12 (r_12 = 0)
    x_prev = r3p_ref[:, 0:13, :].reshape(B * 13, 64)   # r_{m-1}, m = 0..12 (r_{-1} = 0)
    x_mid = r3p_ref[:, 1:13, :].reshape(B * 12, 64)    # r_m,    m = 0..11

    ye = (jnp.dot(x_cur, wd10_ref[...], preferred_element_type=f32)
          + jnp.dot(x_prev, wd12_ref[...], preferred_element_type=f32)
          + bd1_ref[...])
    ye = jnp.maximum(ye, 0.0).reshape(B, 13, 32)       # outputs 0, 2, ..., 24
    yo = jnp.maximum(jnp.dot(x_mid, wd11_ref[...], preferred_element_type=f32)
                     + bd1_ref[...], 0.0).reshape(B, 12, 32)  # outputs 1, 3, ..., 23

    # ---- interleave + nearest Upsample(2): u1[4m..4m+3] = [ye_m, ye_m, yo_m, yo_m] ----
    for m in range(13):
        blk = jnp.broadcast_to(ye[:, m:m + 1, :], (B, 2, 32))
        up_ref[:, 4 * m:4 * m + 2, 0:32] = blk
    for m in range(12):
        blk = jnp.broadcast_to(yo[:, m:m + 1, :], (B, 2, 32))
        up_ref[:, 4 * m + 2:4 * m + 4, 0:32] = blk
    u1 = up_ref[:, 0:50, 0:32]                                                # (B, 50, 32)

    # ------------------------------ dec2 (+ReLU) --------------------------
    y2 = _conv3_im2col(u1, wd2_ref, bd2_ref, cat_ref, relu=True, pool=False)  # (B, 50, 16)

    # ------------------------------ Upsample(2) ---------------------------
    for j in range(50):
        blk = jnp.broadcast_to(y2[:, j:j + 1, :], (B, 2, 16))
        up_ref[:, 2 * j:2 * j + 2, 0:16] = blk
    u2 = up_ref[:, 0:100, 0:16]                                               # (B, 100, 16)

    # ------------------------------ dec3 ----------------------------------
    y3 = _conv3_im2col(u2, wd3_ref, bd3_ref, cat_ref, relu=False, pool=False)  # (B, 100, 6)
    o_ref[...] = y3.astype(o_ref.dtype)


# ---------------------------------------------------------------------------
# Host-side weight re-layout (pure XLA, once per call, negligible)
# ---------------------------------------------------------------------------
def _prep_conv_w(w):
    """nn.Conv1d weight (Cout, Cin, 3) -> im2col weight (3*Cin, Cout), tap-major rows."""
    cout, cin, k = w.shape
    return jnp.transpose(w, (2, 1, 0)).reshape(k * cin, cout)


def _prep_convt_w(w):
    """nn.ConvTranspose1d weight (Cin, Cout, 3) -> conv-equivalent (3*Cin, Cout), taps flipped."""
    cin, cout, k = w.shape
    return jnp.transpose(jnp.flip(w, axis=2), (2, 0, 1)).reshape(k * cin, cout)


def cnn_autoencoder_forward(params, x):
    B, L, C = x.shape
    assert (L, C) == (SEQ_LEN, IN_CH), (L, C)
    f32 = jnp.float32

    we1 = _prep_conv_w(params["enc1_w"]); be1 = params["enc1_b"].reshape(1, -1)
    we2 = _prep_conv_w(params["enc2_w"]); be2 = params["enc2_b"].reshape(1, -1)
    we3 = _prep_conv_w(params["enc3_w"]); be3 = params["enc3_b"].reshape(1, -1)

    # fc1 consumes NLC slices h[:, l, :]; fold PyTorch's NCL flatten into the weight:
    # w1r[l, c, o] = W1[o, c*12 + l]
    w1r = jnp.transpose(params["fc1_w"].reshape(128, 64, 12), (2, 1, 0))      # (12, 64, 128)
    b1 = params["fc1_b"].reshape(1, -1)
    w2t = params["fc2_w"].T; b2 = params["fc2_b"].reshape(1, -1)
    w3t = params["fc3_w"].T; b3 = params["fc3_b"].reshape(1, -1)
    # fc4 emits an NLC-ordered flat vector: w4p[o, l*64 + c] = W4[c*12 + l, o]
    w4p = jnp.transpose(params["fc4_w"].reshape(64, 12, 128), (2, 1, 0)).reshape(128, 768)
    b4p = jnp.transpose(params["fc4_b"].reshape(64, 12), (1, 0)).reshape(1, 768)

    wd10 = params["dec1_w"][:, :, 0]          # (64, 32): tap k of ConvTranspose1d weight
    wd11 = params["dec1_w"][:, :, 1]
    wd12 = params["dec1_w"][:, :, 2]
    bd1 = params["dec1_b"].reshape(1, -1)
    wd2 = _prep_convt_w(params["dec2_w"]); bd2 = params["dec2_b"].reshape(1, -1)
    wd3 = _prep_convt_w(params["dec3_w"]); bd3 = params["dec3_b"].reshape(1, -1)

    consts = [we1, be1, we2, be2, we3, be3,
              w1r, b1, w2t, b2, w3t, b3, w4p, b4p,
              wd10, wd11, wd12, bd1, wd2, bd2, wd3, bd3]

    def _const_spec(a):
        nd = a.ndim
        return pl.BlockSpec(a.shape, lambda b, _nd=nd: (0,) * _nd)

    grid = (B // B_TILE,)
    in_specs = ([pl.BlockSpec((B_TILE, SEQ_LEN, IN_CH), lambda b: (b, 0, 0))]
                + [_const_spec(a) for a in consts])
    out_specs = pl.BlockSpec((B_TILE, OUT_LEN, IN_CH), lambda b: (b, 0, 0))

    return pl.pallas_call(
        _fused_kernel,
        out_shape=jax.ShapeDtypeStruct((B, OUT_LEN, IN_CH), f32),
        grid=grid,
        in_specs=in_specs,
        out_specs=out_specs,
        scratch_shapes=[
            pltpu.VMEM((B_TILE, 100, 96), f32),   # im2col assembly slab (all conv layers)
            pltpu.VMEM((B_TILE, 14, 64), f32),    # zero-padded fc4 rows for dec1 phases
            pltpu.VMEM((B_TILE, 100, 32), f32),   # upsample / interleave staging buffer
        ],
        compiler_params=pltpu.CompilerParams(
            dimension_semantics=("parallel",)),
    )(x, *consts)


# ---------------------------------------------------------------------------
# Deterministic parameter init (PyTorch-shaped tensors)
# ---------------------------------------------------------------------------
def init_params(key):
    def u(k, shape, fan_in):
        bound = 1.0 / jnp.sqrt(jnp.float32(fan_in))
        return jax.random.uniform(k, shape, jnp.float32, -bound, bound)

    ks = jax.random.split(key, 20)
    p = {}
    p["enc1_w"] = u(ks[0], (16, 6, 3), 6 * 3);    p["enc1_b"] = u(ks[1], (16,), 6 * 3)
    p["enc2_w"] = u(ks[2], (32, 16, 3), 16 * 3);  p["enc2_b"] = u(ks[3], (32,), 16 * 3)
    p["enc3_w"] = u(ks[4], (64, 32, 3), 32 * 3);  p["enc3_b"] = u(ks[5], (64,), 32 * 3)
    p["fc1_w"] = u(ks[6], (128, 768), 768);       p["fc1_b"] = u(ks[7], (128,), 768)
    p["fc2_w"] = u(ks[8], (LATENT_SIZE, 128), 128)
    p["fc2_b"] = u(ks[9], (LATENT_SIZE,), 128)
    p["fc3_w"] = u(ks[10], (128, LATENT_SIZE), LATENT_SIZE)
    p["fc3_b"] = u(ks[11], (128,), LATENT_SIZE)
    p["fc4_w"] = u(ks[12], (768, 128), 128);      p["fc4_b"] = u(ks[13], (768,), 128)
    p["dec1_w"] = u(ks[14], (64, 32, 3), 32 * 3); p["dec1_b"] = u(ks[15], (32,), 32 * 3)
    p["dec2_w"] = u(ks[16], (32, 16, 3), 16 * 3); p["dec2_b"] = u(ks[17], (16,), 16 * 3)
    p["dec3_w"] = u(ks[18], (16, 6, 3), 6 * 3);   p["dec3_b"] = u(ks[19], (6,), 6 * 3)
    return p


# ---------------------------------------------------------------------------
# Pure-JAX reference (for correctness check)
# ---------------------------------------------------------------------------
def _reference_forward(params, x):
    dn = ("NCH", "OIH", "NCH")

    def conv(x_ncl, w, b, pad, lhs_dil=1):
        y = lax.conv_general_dilated(x_ncl, w, window_strides=(1,),
                                     padding=[(pad, pad)],
                                     lhs_dilation=(lhs_dil,),
                                     dimension_numbers=dn)
        return y + b[None, :, None]

    h = jnp.transpose(x, (0, 2, 1))
    for name in ("enc1", "enc2", "enc3"):
        h = jax.nn.relu(conv(h, params[name + "_w"], params[name + "_b"], 1))
        B, C, L = h.shape
        h = jnp.max(h.reshape(B, C, L // 2, 2), axis=-1)
    B = h.shape[0]
    z = h.reshape(B, -1) @ params["fc1_w"].T + params["fc1_b"]
    if LATENT_SIZE < 128:
        z = z @ params["fc2_w"].T + params["fc2_b"]
        z = z @ params["fc3_w"].T + params["fc3_b"]
    r = z @ params["fc4_w"].T + params["fc4_b"]
    r = r.reshape(B, 64, 12)

    def convT(x_ncl, w, b, stride, padding):
        w_eq = jnp.flip(jnp.transpose(w, (1, 0, 2)), axis=-1)   # (Cout, Cin, 3)
        return conv(x_ncl, w_eq, b, 3 - 1 - padding, lhs_dil=stride)

    r = jax.nn.relu(convT(r, params["dec1_w"], params["dec1_b"], 2, 0))
    r = jnp.repeat(r, 2, axis=2)
    r = jax.nn.relu(convT(r, params["dec2_w"], params["dec2_b"], 1, 1))
    r = jnp.repeat(r, 2, axis=2)
    r = convT(r, params["dec3_w"], params["dec3_b"], 1, 1)
    return jnp.transpose(r, (0, 2, 1))


if __name__ == "__main__":
    key = jax.random.PRNGKey(0)
    pkey, xkey = jax.random.split(key)
    params = init_params(pkey)
    # batch=2, seq=96 (fc1 requires 64*12 => seq/8 == 12), channels=6
    x = jax.random.normal(xkey, (2, 96, 6), jnp.float32)

    out = jax.jit(cnn_autoencoder_forward)(params, x)
    out = jax.block_until_ready(out)

    assert out.shape == (2, 100, 6), out.shape
    ref = _reference_forward(params, x)
    assert jnp.allclose(out, ref, atol=1e-3, rtol=1e-3), \
        float(jnp.max(jnp.abs(out - ref)))
    print("KERNEL_OK")
</pallas_src>

<mosaic_0001>
module attributes {stable_mosaic.version = 11 : i64} {
  func.func @_fused_kernel(%arg0: i32, %arg1: memref<1x96x6xf32, #tpu.memory_space<vmem>>, %arg2: memref<18x16xf32, #tpu.memory_space<vmem>>, %arg3: memref<1x16xf32, #tpu.memory_space<vmem>>, %arg4: memref<48x32xf32, #tpu.memory_space<vmem>>, %arg5: memref<1x32xf32, #tpu.memory_space<vmem>>, %arg6: memref<96x64xf32, #tpu.memory_space<vmem>>, %arg7: memref<1x64xf32, #tpu.memory_space<vmem>>, %arg8: memref<12x64x128xf32, #tpu.memory_space<vmem>>, %arg9: memref<1x128xf32, #tpu.memory_space<vmem>>, %arg10: memref<128x32xf32, #tpu.memory_space<vmem>>, %arg11: memref<1x32xf32, #tpu.memory_space<vmem>>, %arg12: memref<32x128xf32, #tpu.memory_space<vmem>>, %arg13: memref<1x128xf32, #tpu.memory_space<vmem>>, %arg14: memref<128x768xf32, #tpu.memory_space<vmem>>, %arg15: memref<1x768xf32, #tpu.memory_space<vmem>>, %arg16: memref<64x32xf32, #tpu.memory_space<vmem>>, %arg17: memref<64x32xf32, #tpu.memory_space<vmem>>, %arg18: memref<64x32xf32, #tpu.memory_space<vmem>>, %arg19: memref<1x32xf32, #tpu.memory_space<vmem>>, %arg20: memref<96x16xf32, #tpu.memory_space<vmem>>, %arg21: memref<1x16xf32, #tpu.memory_space<vmem>>, %arg22: memref<48x6xf32, #tpu.memory_space<vmem>>, %arg23: memref<1x6xf32, #tpu.memory_space<vmem>>, %arg24: memref<1x100x6xf32, #tpu.memory_space<vmem>>, %arg25: memref<1x100x96xf32, #tpu.memory_space<vmem>>, %arg26: memref<1x14x64xf32, #tpu.memory_space<vmem>>, %arg27: memref<1x100x32xf32, #tpu.memory_space<vmem>>) attributes {dimension_semantics = [#tpu.dimension_semantics<parallel>], iteration_bounds = array<i64: 2>, scalar_prefetch = 0 : i64, scratch_operands = 3 : i64, tpu.core_type = #tpu.core_type<tc>, window_params = [{transform_indices = @transform_0, window_bounds = array<i64: 1, 96, 6>}, {pipeline_mode = #tpu.pipeline_mode<synchronous>, transform_indices = @transform_1, window_bounds = array<i64: 18, 16>}, {pipeline_mode = #tpu.pipeline_mode<synchronous>, transform_indices = @transform_2, window_bounds = array<i64: 1, 16>}, {pipeline_mode = #tpu.pipeline_mode<synchronous>, transform_indices = @transform_3, window_bounds = array<i64: 48, 32>}, {pipeline_mode = #tpu.pipeline_mode<synchronous>, transform_indices = @transform_4, window_bounds = array<i64: 1, 32>}, {pipeline_mode = #tpu.pipeline_mode<synchronous>, transform_indices = @transform_5, window_bounds = array<i64: 96, 64>}, {pipeline_mode = #tpu.pipeline_mode<synchronous>, transform_indices = @transform_6, window_bounds = array<i64: 1, 64>}, {pipeline_mode = #tpu.pipeline_mode<synchronous>, transform_indices = @transform_7, window_bounds = array<i64: 12, 64, 128>}, {pipeline_mode = #tpu.pipeline_mode<synchronous>, transform_indices = @transform_8, window_bounds = array<i64: 1, 128>}, {pipeline_mode = #tpu.pipeline_mode<synchronous>, transform_indices = @transform_9, window_bounds = array<i64: 128, 32>}, {pipeline_mode = #tpu.pipeline_mode<synchronous>, transform_indices = @transform_10, window_bounds = array<i64: 1, 32>}, {pipeline_mode = #tpu.pipeline_mode<synchronous>, transform_indices = @transform_11, window_bounds = array<i64: 32, 128>}, {pipeline_mode = #tpu.pipeline_mode<synchronous>, transform_indices = @transform_12, window_bounds = array<i64: 1, 128>}, {pipeline_mode = #tpu.pipeline_mode<synchronous>, transform_indices = @transform_13, window_bounds = array<i64: 128, 768>}, {pipeline_mode = #tpu.pipeline_mode<synchronous>, transform_indices = @transform_14, window_bounds = array<i64: 1, 768>}, {pipeline_mode = #tpu.pipeline_mode<synchronous>, transform_indices = @transform_15, window_bounds = array<i64: 64, 32>}, {pipeline_mode = #tpu.pipeline_mode<synchronous>, transform_indices = @transform_16, window_bounds = array<i64: 64, 32>}, {pipeline_mode = #tpu.pipeline_mode<synchronous>, transform_indices = @transform_17, window_bounds = array<i64: 64, 32>}, {pipeline_mode = #tpu.pipeline_mode<synchronous>, transform_indices = @transform_18, window_bounds = array<i64: 1, 32>}, {pipeline_mode = #tpu.pipeline_mode<synchronous>, transform_indices = @transform_19, window_bounds = array<i64: 96, 16>}, {pipeline_mode = #tpu.pipeline_mode<synchronous>, transform_indices = @transform_20, window_bounds = array<i64: 1, 16>}, {pipeline_mode = #tpu.pipeline_mode<synchronous>, transform_indices = @transform_21, window_bounds = array<i64: 48, 6>}, {pipeline_mode = #tpu.pipeline_mode<synchronous>, transform_indices = @transform_22, window_bounds = array<i64: 1, 6>}, {transform_indices = @transform_23, window_bounds = array<i64: 1, 100, 6>}]} {
    %c0 = arith.constant 0 : index
    %c0_0 = arith.constant 0 : index
    %c0_1 = arith.constant 0 : index
    %0 = vector.load %arg1[%c0, %c0_0, %c0_1] : memref<1x96x6xf32, #tpu.memory_space<vmem>>, vector<1x96x6xf32>
    %c0_2 = arith.constant 0 : index
    %c0_3 = arith.constant 0 : index
    %1 = vector.load %arg2[%c0_2, %c0_3] : memref<18x16xf32, #tpu.memory_space<vmem>>, vector<18x16xf32>
    %cst = arith.constant 0.000000e+00 : f32
    %2 = vector.broadcast %cst : f32 to vector<1x1x6xf32>
    %c0_4 = arith.constant 0 : index
    %c0_5 = arith.constant 0 : index
    %c0_6 = arith.constant 0 : index
    %3 = vector.load %arg25[%c0_4, %c0_5, %c0_6] : memref<1x100x96xf32, #tpu.memory_space<vmem>>, vector<1x1x6xf32>
    tpu.vector_store %arg25[%c0_4, %c0_5, %c0_6], %2 {strides = array<i32>} : memref<1x100x96xf32, #tpu.memory_space<vmem>>, vector<1x1x6xf32>,
    %4 = vector.extract_strided_slice %0 {offsets = [0, 0, 0], sizes = [1, 95, 6], strides = [1, 1, 1]} : vector<1x96x6xf32> to vector<1x95x6xf32>
    %c0_7 = arith.constant 0 : index
    %c1 = arith.constant 1 : index
    %c0_8 = arith.constant 0 : index
    %5 = vector.load %arg25[%c0_7, %c1, %c0_8] : memref<1x100x96xf32, #tpu.memory_space<vmem>>, vector<1x95x6xf32>
    tpu.vector_store %arg25[%c0_7, %c1, %c0_8], %4 {strides = array<i32>} : memref<1x100x96xf32, #tpu.memory_space<vmem>>, vector<1x95x6xf32>,
    %c0_9 = arith.constant 0 : index
    %c0_10 = arith.constant 0 : index
    %c6 = arith.constant 6 : index
    %6 = vector.load %arg25[%c0_9, %c0_10, %c6] : memref<1x100x96xf32, #tpu.memory_space<vmem>>, vector<1x96x6xf32>
    tpu.vector_store %arg25[%c0_9, %c0_10, %c6], %0 {strides = array<i32>} : memref<1x100x96xf32, #tpu.memory_space<vmem>>, vector<1x96x6xf32>,
    %7 = vector.extract_strided_slice %0 {offsets = [0, 1, 0], sizes = [1, 95, 6], strides = [1, 1, 1]} : vector<1x96x6xf32> to vector<1x95x6xf32>
    %c0_11 = arith.constant 0 : index
    %c0_12 = arith.constant 0 : index
    %c12 = arith.constant 12 : index
    %8 = vector.load %arg25[%c0_11, %c0_12, %c12] : memref<1x100x96xf32, #tpu.memory_space<vmem>>, vector<1x95x6xf32>
    tpu.vector_store %arg25[%c0_11, %c0_12, %c12], %7 {strides = array<i32>} : memref<1x100x96xf32, #tpu.memory_space<vmem>>, vector<1x95x6xf32>,
    %c0_13 = arith.constant 0 : index
    %c95 = arith.constant 95 : index
    %c12_14 = arith.constant 12 : index
    %9 = vector.load %arg25[%c0_13, %c95, %c12_14] : memref<1x100x96xf32, #tpu.memory_space<vmem>>, vector<1x1x6xf32>
    tpu.vector_store %arg25[%c0_13, %c95, %c12_14], %2 {strides = array<i32>} : memref<1x100x96xf32, #tpu.memory_space<vmem>>, vector<1x1x6xf32>,
    %c0_15 = arith.constant 0 : index
    %c0_16 = arith.constant 0 : index
    %c0_17 = arith.constant 0 : index
    %10 = vector.load %arg25[%c0_15, %c0_16, %c0_17] : memref<1x100x96xf32, #tpu.memory_space<vmem>>, vector<1x96x18xf32>
    %11 = vector.shape_cast %10 : vector<1x96x18xf32> to vector<96x18xf32>
    %cst_18 = arith.constant dense<0.000000e+00> : vector<96x16xf32>
    %12 = tpu.matmul %11, %1, %cst_18 {dimension_numbers = #tpu.dot_dimension_numbers<[1], [0], [0], [1], [0, 0, 1, 1], [], []>} : vector<96x18xf32>, vector<18x16xf32>, vector<96x16xf32> -> vector<96x16xf32>
    %c0_19 = arith.constant 0 : index
    %c0_20 = arith.constant 0 : index
    %13 = vector.load %arg3[%c0_19, %c0_20] : memref<1x16xf32, #tpu.memory_space<vmem>>, vector<1x16xf32>
    %14 = vector.broadcast %13 : vector<1x16xf32> to vector<96x16xf32>
    %15 = arith.addf %12, %14 : vector<96x16xf32>
    %cst_21 = arith.constant 0.000000e+00 : f32
    %16 = vector.broadcast %cst_21 : f32 to vector<96x16xf32>
    %17 = arith.maximumf %15, %16 : vector<96x16xf32>
    %18 = vector.shape_cast %17 : vector<96x16xf32> to vector<48x2x16xf32>
    %19 = vector.extract_strided_slice %18 {offsets = [0, 0, 0], sizes = [48, 1, 16], strides = [1, 1, 1]} : vector<48x2x16xf32> to vector<48x1x16xf32>
    %20 = vector.shape_cast %19 : vector<48x1x16xf32> to vector<48x16xf32>
    %21 = vector.extract_strided_slice %18 {offsets = [0, 1, 0], sizes = [48, 1, 16], strides = [1, 1, 1]} : vector<48x2x16xf32> to vector<48x1x16xf32>
    %22 = vector.shape_cast %21 : vector<48x1x16xf32> to vector<48x16xf32>
    %23 = arith.maximumf %20, %22 : vector<48x16xf32>
    %24 = vector.shape_cast %23 : vector<48x16xf32> to vector<1x48x16xf32>
    %c0_22 = arith.constant 0 : index
    %c0_23 = arith.constant 0 : index
    %25 = vector.load %arg4[%c0_22, %c0_23] : memref<48x32xf32, #tpu.memory_space<vmem>>, vector<48x32xf32>
    %cst_24 = arith.constant 0.000000e+00 : f32
    %26 = vector.broadcast %cst_24 : f32 to vector<1x1x16xf32>
    %c0_25 = arith.constant 0 : index
    %c0_26 = arith.constant 0 : index
    %c0_27 = arith.constant 0 : index
    %27 = vector.load %arg25[%c0_25, %c0_26, %c0_27] : memref<1x100x96xf32, #tpu.memory_space<vmem>>, vector<1x1x16xf32>
    tpu.vector_store %arg25[%c0_25, %c0_26, %c0_27], %26 {strides = array<i32>} : memref<1x100x96xf32, #tpu.memory_space<vmem>>, vector<1x1x16xf32>,
    %28 = vector.extract_strided_slice %24 {offsets = [0, 0, 0], sizes = [1, 47, 16], strides = [1, 1, 1]} : vector<1x48x16xf32> to vector<1x47x16xf32>
    %c0_28 = arith.constant 0 : index
    %c1_29 = arith.constant 1 : index
    %c0_30 = arith.constant 0 : index
    %29 = vector.load %arg25[%c0_28, %c1_29, %c0_30] : memref<1x100x96xf32, #tpu.memory_space<vmem>>, vector<1x47x16xf32>
    tpu.vector_store %arg25[%c0_28, %c1_29, %c0_30], %28 {strides = array<i32>} : memref<1x100x96xf32, #tpu.memory_space<vmem>>, vector<1x47x16xf32>,
    %c0_31 = arith.constant 0 : index
    %c0_32 = arith.constant 0 : index
    %c16 = arith.constant 16 : index
    %30 = vector.load %arg25[%c0_31, %c0_32, %c16] : memref<1x100x96xf32, #tpu.memory_space<vmem>>, vector<1x48x16xf32>
    tpu.vector_store %arg25[%c0_31, %c0_32, %c16], %24 {strides = array<i32>} : memref<1x100x96xf32, #tpu.memory_space<vmem>>, vector<1x48x16xf32>,
    %31 = vector.extract_strided_slice %24 {offsets = [0, 1, 0], sizes = [1, 47, 16], strides = [1, 1, 1]} : vector<1x48x16xf32> to vector<1x47x16xf32>
    %c0_33 = arith.constant 0 : index
    %c0_34 = arith.constant 0 : index
    %c32 = arith.constant 32 : index
    %32 = vector.load %arg25[%c0_33, %c0_34, %c32] : memref<1x100x96xf32, #tpu.memory_space<vmem>>, vector<1x47x16xf32>
    tpu.vector_store %arg25[%c0_33, %c0_34, %c32], %31 {strides = array<i32>} : memref<1x100x96xf32, #tpu.memory_space<vmem>>, vector<1x47x16xf32>,
    %c0_35 = arith.constant 0 : index
    %c47 = arith.constant 47 : index
    %c32_36 = arith.constant 32 : index
    %33 = vector.load %arg25[%c0_35, %c47, %c32_36] : memref<1x100x96xf32, #tpu.memory_space<vmem>>, vector<1x1x16xf32>
    tpu.vector_store %arg25[%c0_35, %c47, %c32_36], %26 {strides = array<i32>} : memref<1x100x96xf32, #tpu.memory_space<vmem>>, vector<1x1x16xf32>,
    %c0_37 = arith.constant 0 : index
    %c0_38 = arith.constant 0 : index
    %c0_39 = arith.constant 0 : index
    %34 = vector.load %arg25[%c0_37, %c0_38, %c0_39] : memref<1x100x96xf32, #tpu.memory_space<vmem>>, vector<1x48x48xf32>
    %35 = vector.shape_cast %34 : vector<1x48x48xf32> to vector<48x48xf32>
    %cst_40 = arith.constant dense<0.000000e+00> : vector<48x32xf32>
    %36 = tpu.matmul %35, %25, %cst_40 {dimension_numbers = #tpu.dot_dimension_numbers<[1], [0], [0], [1], [0, 0, 1, 1], [], []>} : vector<48x48xf32>, vector<48x32xf32>, vector<48x32xf32> -> vector<48x32xf32>
    %c0_41 = arith.constant 0 : index
    %c0_42 = arith.constant 0 : index
    %37 = vector.load %arg5[%c0_41, %c0_42] : memref<1x32xf32, #tpu.memory_space<vmem>>, vector<1x32xf32>
    %38 = vector.broadcast %37 : vector<1x32xf32> to vector<48x32xf32>
    %39 = arith.addf %36, %38 : vector<48x32xf32>
    %cst_43 = arith.constant 0.000000e+00 : f32
    %40 = vector.broadcast %cst_43 : f32 to vector<48x32xf32>
    %41 = arith.maximumf %39, %40 : vector<48x32xf32>
    %42 = vector.shape_cast %41 : vector<48x32xf32> to vector<24x2x32xf32>
    %43 = vector.extract_strided_slice %42 {offsets = [0, 0, 0], sizes = [24, 1, 32], strides = [1, 1, 1]} : vector<24x2x32xf32> to vector<24x1x32xf32>
    %44 = vector.shape_cast %43 : vector<24x1x32xf32> to vector<24x32xf32>
    %45 = vector.extract_strided_slice %42 {offsets = [0, 1, 0], sizes = [24, 1, 32], strides = [1, 1, 1]} : vector<24x2x32xf32> to vector<24x1x32xf32>
    %46 = vector.shape_cast %45 : vector<24x1x32xf32> to vector<24x32xf32>
    %47 = arith.maximumf %44, %46 : vector<24x32xf32>
    %48 = vector.shape_cast %47 : vector<24x32xf32> to vector<1x24x32xf32>
    %c0_44 = arith.constant 0 : index
    %c0_45 = arith.constant 0 : index
    %49 = vector.load %arg6[%c0_44, %c0_45] : memref<96x64xf32, #tpu.memory_space<vmem>>, vector<96x64xf32>
    %cst_46 = arith.constant 0.000000e+00 : f32
    %50 = vector.broadcast %cst_46 : f32 to vector<1x1x32xf32>
    %c0_47 = arith.constant 0 : index
    %c0_48 = arith.constant 0 : index
    %c0_49 = arith.constant 0 : index
    %51 = vector.load %arg25[%c0_47, %c0_48, %c0_49] : memref<1x100x96xf32, #tpu.memory_space<vmem>>, vector<1x1x32xf32>
    tpu.vector_store %arg25[%c0_47, %c0_48, %c0_49], %50 {strides = array<i32>} : memref<1x100x96xf32, #tpu.memory_space<vmem>>, vector<1x1x32xf32>,
    %52 = vector.extract_strided_slice %48 {offsets = [0, 0, 0], sizes = [1, 23, 32], strides = [1, 1, 1]} : vector<1x24x32xf32> to vector<1x23x32xf32>
    %c0_50 = arith.constant 0 : index
    %c1_51 = arith.constant 1 : index
    %c0_52 = arith.constant 0 : index
    %53 = vector.load %arg25[%c0_50, %c1_51, %c0_52] : memref<1x100x96xf32, #tpu.memory_space<vmem>>, vector<1x23x32xf32>
    tpu.vector_store %arg25[%c0_50, %c1_51, %c0_52], %52 {strides = array<i32>} : memref<1x100x96xf32, #tpu.memory_space<vmem>>, vector<1x23x32xf32>,
    %c0_53 = arith.constant 0 : index
    %c0_54 = arith.constant 0 : index
    %c32_55 = arith.constant 32 : index
    %54 = vector.load %arg25[%c0_53, %c0_54, %c32_55] : memref<1x100x96xf32, #tpu.memory_space<vmem>>, vector<1x24x32xf32>
    tpu.vector_store %arg25[%c0_53, %c0_54, %c32_55], %48 {strides = array<i32>} : memref<1x100x96xf32, #tpu.memory_space<vmem>>, vector<1x24x32xf32>,
    %55 = vector.extract_strided_slice %48 {offsets = [0, 1, 0], sizes = [1, 23, 32], strides = [1, 1, 1]} : vector<1x24x32xf32> to vector<1x23x32xf32>
    %c0_56 = arith.constant 0 : index
    %c0_57 = arith.constant 0 : index
    %c64 = arith.constant 64 : index
    %56 = vector.load %arg25[%c0_56, %c0_57, %c64] : memref<1x100x96xf32, #tpu.memory_space<vmem>>, vector<1x23x32xf32>
    tpu.vector_store %arg25[%c0_56, %c0_57, %c64], %55 {strides = array<i32>} : memref<1x100x96xf32, #tpu.memory_space<vmem>>, vector<1x23x32xf32>,
    %c0_58 = arith.constant 0 : index
    %c23 = arith.constant 23 : index
    %c64_59 = arith.constant 64 : index
    %57 = vector.load %arg25[%c0_58, %c23, %c64_59] : memref<1x100x96xf32, #tpu.memory_space<vmem>>, vector<1x1x32xf32>
    tpu.vector_store %arg25[%c0_58, %c23, %c64_59], %50 {strides = array<i32>} : memref<1x100x96xf32, #tpu.memory_space<vmem>>, vector<1x1x32xf32>,
    %c0_60 = arith.constant 0 : index
    %c0_61 = arith.constant 0 : index
    %c0_62 = arith.constant 0 : index
    %58 = vector.load %arg25[%c0_60, %c0_61, %c0_62] : memref<1x100x96xf32, #tpu.memory_space<vmem>>, vector<1x24x96xf32>
    %59 = vector.shape_cast %58 : vector<1x24x96xf32> to vector<24x96xf32>
    %cst_63 = arith.constant dense<0.000000e+00> : vector<24x64xf32>
    %60 = tpu.matmul %59, %49, %cst_63 {dimension_numbers = #tpu.dot_dimension_numbers<[1], [0], [0], [1], [0, 0, 1, 1], [], []>} : vector<24x96xf32>, vector<96x64xf32>, vector<24x64xf32> -> vector<24x64xf32>
    %c0_64 = arith.constant 0 : index
    %c0_65 = arith.constant 0 : index
    %61 = vector.load %arg7[%c0_64, %c0_65] : memref<1x64xf32, #tpu.memory_space<vmem>>, vector<1x64xf32>
    %62 = vector.broadcast %61 : vector<1x64xf32> to vector<24x64xf32>
    %63 = arith.addf %60, %62 : vector<24x64xf32>
    %cst_66 = arith.constant 0.000000e+00 : f32
    %64 = vector.broadcast %cst_66 : f32 to vector<24x64xf32>
    %65 = arith.maximumf %63, %64 : vector<24x64xf32>
    %66 = vector.shape_cast %65 : vector<24x64xf32> to vector<12x2x64xf32>
    %67 = vector.extract_strided_slice %66 {offsets = [0, 0, 0], sizes = [12, 1, 64], strides = [1, 1, 1]} : vector<12x2x64xf32> to vector<12x1x64xf32>
    %68 = vector.shape_cast %67 : vector<12x1x64xf32> to vector<12x64xf32>
    %69 = vector.extract_strided_slice %66 {offsets = [0, 1, 0], sizes = [12, 1, 64], strides = [1, 1, 1]} : vector<12x2x64xf32> to vector<12x1x64xf32>
    %70 = vector.shape_cast %69 : vector<12x1x64xf32> to vector<12x64xf32>
    %71 = arith.maximumf %68, %70 : vector<12x64xf32>
    %72 = vector.shape_cast %71 : vector<12x64xf32> to vector<1x12x64xf32>
    %73 = vector.extract_strided_slice %72 {offsets = [0, 0, 0], sizes = [1, 1, 64], strides = [1, 1, 1]} : vector<1x12x64xf32> to vector<1x1x64xf32>
    %74 = vector.shape_cast %73 : vector<1x1x64xf32> to vector<1x64xf32>
    %c0_67 = arith.constant 0 : index
    %c0_68 = arith.constant 0 : index
    %c0_69 = arith.constant 0 : index
    %75 = vector.load %arg8[%c0_67, %c0_68, %c0_69] : memref<12x64x128xf32, #tpu.memory_space<vmem>>, vector<1x64x128xf32>
    %76 = vector.shape_cast %75 : vector<1x64x128xf32> to vector<64x128xf32>
    %cst_70 = arith.constant dense<0.000000e+00> : vector<1x128xf32>
    %77 = tpu.matmul %74, %76, %cst_70 {dimension_numbers = #tpu.dot_dimension_numbers<[1], [0], [0], [1], [0, 0, 1, 1], [], []>} : vector<1x64xf32>, vector<64x128xf32>, vector<1x128xf32> -> vector<1x128xf32>
    %78 = vector.extract_strided_slice %72 {offsets = [0, 1, 0], sizes = [1, 1, 64], strides = [1, 1, 1]} : vector<1x12x64xf32> to vector<1x1x64xf32>
    %79 = vector.shape_cast %78 : vector<1x1x64xf32> to vector<1x64xf32>
    %c1_71 = arith.constant 1 : index
    %c0_72 = arith.constant 0 : index
    %c0_73 = arith.constant 0 : index
    %80 = vector.load %arg8[%c1_71, %c0_72, %c0_73] : memref<12x64x128xf32, #tpu.memory_space<vmem>>, vector<1x64x128xf32>
    %81 = vector.shape_cast %80 : vector<1x64x128xf32> to vector<64x128xf32>
    %cst_74 = arith.constant dense<0.000000e+00> : vector<1x128xf32>
    %82 = tpu.matmul %79, %81, %cst_74 {dimension_numbers = #tpu.dot_dimension_numbers<[1], [0], [0], [1], [0, 0, 1, 1], [], []>} : vector<1x64xf32>, vector<64x128xf32>, vector<1x128xf32> -> vector<1x128xf32>
    %83 = arith.addf %77, %82 : vector<1x128xf32>
    %84 = vector.extract_strided_slice %72 {offsets = [0, 2, 0], sizes = [1, 1, 64], strides = [1, 1, 1]} : vector<1x12x64xf32> to vector<1x1x64xf32>
    %85 = vector.shape_cast %84 : vector<1x1x64xf32> to vector<1x64xf32>
    %c2 = arith.constant 2 : index
    %c0_75 = arith.constant 0 : index
    %c0_76 = arith.constant 0 : index
    %86 = vector.load %arg8[%c2, %c0_75, %c0_76] : memref<12x64x128xf32, #tpu.memory_space<vmem>>, vector<1x64x128xf32>
    %87 = vector.shape_cast %86 : vector<1x64x128xf32> to vector<64x128xf32>
    %cst_77 = arith.constant dense<0.000000e+00> : vector<1x128xf32>
    %88 = tpu.matmul %85, %87, %cst_77 {dimension_numbers = #tpu.dot_dimension_numbers<[1], [0], [0], [1], [0, 0, 1, 1], [], []>} : vector<1x64xf32>, vector<64x128xf32>, vector<1x128xf32> -> vector<1x128xf32>
    %89 = arith.addf %83, %88 : vector<1x128xf32>
    %90 = vector.extract_strided_slice %72 {offsets = [0, 3, 0], sizes = [1, 1, 64], strides = [1, 1, 1]} : vector<1x12x64xf32> to vector<1x1x64xf32>
    %91 = vector.shape_cast %90 : vector<1x1x64xf32> to vector<1x64xf32>
    %c3 = arith.constant 3 : index
    %c0_78 = arith.constant 0 : index
    %c0_79 = arith.constant 0 : index
    %92 = vector.load %arg8[%c3, %c0_78, %c0_79] : memref<12x64x128xf32, #tpu.memory_space<vmem>>, vector<1x64x128xf32>
    %93 = vector.shape_cast %92 : vector<1x64x128xf32> to vector<64x128xf32>
    %cst_80 = arith.constant dense<0.000000e+00> : vector<1x128xf32>
    %94 = tpu.matmul %91, %93, %cst_80 {dimension_numbers = #tpu.dot_dimension_numbers<[1], [0], [0], [1], [0, 0, 1, 1], [], []>} : vector<1x64xf32>, vector<64x128xf32>, vector<1x128xf32> -> vector<1x128xf32>
    %95 = arith.addf %89, %94 : vector<1x128xf32>
    %96 = vector.extract_strided_slice %72 {offsets = [0, 4, 0], sizes = [1, 1, 64], strides = [1, 1, 1]} : vector<1x12x64xf32> to vector<1x1x64xf32>
    %97 = vector.shape_cast %96 : vector<1x1x64xf32> to vector<1x64xf32>
    %c4 = arith.constant 4 : index
    %c0_81 = arith.constant 0 : index
    %c0_82 = arith.constant 0 : index
    %98 = vector.load %arg8[%c4, %c0_81, %c0_82] : memref<12x64x128xf32, #tpu.memory_space<vmem>>, vector<1x64x128xf32>
    %99 = vector.shape_cast %98 : vector<1x64x128xf32> to vector<64x128xf32>
    %cst_83 = arith.constant dense<0.000000e+00> : vector<1x128xf32>
    %100 = tpu.matmul %97, %99, %cst_83 {dimension_numbers = #tpu.dot_dimension_numbers<[1], [0], [0], [1], [0, 0, 1, 1], [], []>} : vector<1x64xf32>, vector<64x128xf32>, vector<1x128xf32> -> vector<1x128xf32>
    %101 = arith.addf %95, %100 : vector<1x128xf32>
    %102 = vector.extract_strided_slice %72 {offsets = [0, 5, 0], sizes = [1, 1, 64], strides = [1, 1, 1]} : vector<1x12x64xf32> to vector<1x1x64xf32>
    %103 = vector.shape_cast %102 : vector<1x1x64xf32> to vector<1x64xf32>
    %c5 = arith.constant 5 : index
    %c0_84 = arith.constant 0 : index
    %c0_85 = arith.constant 0 : index
    %104 = vector.load %arg8[%c5, %c0_84, %c0_85] : memref<12x64x128xf32, #tpu.memory_space<vmem>>, vector<1x64x128xf32>
    %105 = vector.shape_cast %104 : vector<1x64x128xf32> to vector<64x128xf32>
    %cst_86 = arith.constant dense<0.000000e+00> : vector<1x128xf32>
    %106 = tpu.matmul %103, %105, %cst_86 {dimension_numbers = #tpu.dot_dimension_numbers<[1], [0], [0], [1], [0, 0, 1, 1], [], []>} : vector<1x64xf32>, vector<64x128xf32>, vector<1x128xf32> -> vector<1x128xf32>
    %107 = arith.addf %101, %106 : vector<1x128xf32>
    %108 = vector.extract_strided_slice %72 {offsets = [0, 6, 0], sizes = [1, 1, 64], strides = [1, 1, 1]} : vector<1x12x64xf32> to vector<1x1x64xf32>
    %109 = vector.shape_cast %108 : vector<1x1x64xf32> to vector<1x64xf32>
    %c6_87 = arith.constant 6 : index
    %c0_88 = arith.constant 0 : index
    %c0_89 = arith.constant 0 : index
    %110 = vector.load %arg8[%c6_87, %c0_88, %c0_89] : memref<12x64x128xf32, #tpu.memory_space<vmem>>, vector<1x64x128xf32>
    %111 = vector.shape_cast %110 : vector<1x64x128xf32> to vector<64x128xf32>
    %cst_90 = arith.constant dense<0.000000e+00> : vector<1x128xf32>
    %112 = tpu.matmul %109, %111, %cst_90 {dimension_numbers = #tpu.dot_dimension_numbers<[1], [0], [0], [1], [0, 0, 1, 1], [], []>} : vector<1x64xf32>, vector<64x128xf32>, vector<1x128xf32> -> vector<1x128xf32>
    %113 = arith.addf %107, %112 : vector<1x128xf32>
    %114 = vector.extract_strided_slice %72 {offsets = [0, 7, 0], sizes = [1, 1, 64], strides = [1, 1, 1]} : vector<1x12x64xf32> to vector<1x1x64xf32>
    %115 = vector.shape_cast %114 : vector<1x1x64xf32> to vector<1x64xf32>
    %c7 = arith.constant 7 : index
    %c0_91 = arith.constant 0 : index
    %c0_92 = arith.constant 0 : index
    %116 = vector.load %arg8[%c7, %c0_91, %c0_92] : memref<12x64x128xf32, #tpu.memory_space<vmem>>, vector<1x64x128xf32>
    %117 = vector.shape_cast %116 : vector<1x64x128xf32> to vector<64x128xf32>
    %cst_93 = arith.constant dense<0.000000e+00> : vector<1x128xf32>
    %118 = tpu.matmul %115, %117, %cst_93 {dimension_numbers = #tpu.dot_dimension_numbers<[1], [0], [0], [1], [0, 0, 1, 1], [], []>} : vector<1x64xf32>, vector<64x128xf32>, vector<1x128xf32> -> vector<1x128xf32>
    %119 = arith.addf %113, %118 : vector<1x128xf32>
    %120 = vector.extract_strided_slice %72 {offsets = [0, 8, 0], sizes = [1, 1, 64], strides = [1, 1, 1]} : vector<1x12x64xf32> to vector<1x1x64xf32>
    %121 = vector.shape_cast %120 : vector<1x1x64xf32> to vector<1x64xf32>
    %c8 = arith.constant 8 : index
    %c0_94 = arith.constant 0 : index
    %c0_95 = arith.constant 0 : index
    %122 = vector.load %arg8[%c8, %c0_94, %c0_95] : memref<12x64x128xf32, #tpu.memory_space<vmem>>, vector<1x64x128xf32>
    %123 = vector.shape_cast %122 : vector<1x64x128xf32> to vector<64x128xf32>
    %cst_96 = arith.constant dense<0.000000e+00> : vector<1x128xf32>
    %124 = tpu.matmul %121, %123, %cst_96 {dimension_numbers = #tpu.dot_dimension_numbers<[1], [0], [0], [1], [0, 0, 1, 1], [], []>} : vector<1x64xf32>, vector<64x128xf32>, vector<1x128xf32> -> vector<1x128xf32>
    %125 = arith.addf %119, %124 : vector<1x128xf32>
    %126 = vector.extract_strided_slice %72 {offsets = [0, 9, 0], sizes = [1, 1, 64], strides = [1, 1, 1]} : vector<1x12x64xf32> to vector<1x1x64xf32>
    %127 = vector.shape_cast %126 : vector<1x1x64xf32> to vector<1x64xf32>
    %c9 = arith.constant 9 : index
    %c0_97 = arith.constant 0 : index
    %c0_98 = arith.constant 0 : index
    %128 = vector.load %arg8[%c9, %c0_97, %c0_98] : memref<12x64x128xf32, #tpu.memory_space<vmem>>, vector<1x64x128xf32>
    %129 = vector.shape_cast %128 : vector<1x64x128xf32> to vector<64x128xf32>
    %cst_99 = arith.constant dense<0.000000e+00> : vector<1x128xf32>
    %130 = tpu.matmul %127, %129, %cst_99 {dimension_numbers = #tpu.dot_dimension_numbers<[1], [0], [0], [1], [0, 0, 1, 1], [], []>} : vector<1x64xf32>, vector<64x128xf32>, vector<1x128xf32> -> vector<1x128xf32>
    %131 = arith.addf %125, %130 : vector<1x128xf32>
    %132 = vector.extract_strided_slice %72 {offsets = [0, 10, 0], sizes = [1, 1, 64], strides = [1, 1, 1]} : vector<1x12x64xf32> to vector<1x1x64xf32>
    %133 = vector.shape_cast %132 : vector<1x1x64xf32> to vector<1x64xf32>
    %c10 = arith.constant 10 : index
    %c0_100 = arith.constant 0 : index
    %c0_101 = arith.constant 0 : index
    %134 = vector.load %arg8[%c10, %c0_100, %c0_101] : memref<12x64x128xf32, #tpu.memory_space<vmem>>, vector<1x64x128xf32>
    %135 = vector.shape_cast %134 : vector<1x64x128xf32> to vector<64x128xf32>
    %cst_102 = arith.constant dense<0.000000e+00> : vector<1x128xf32>
    %136 = tpu.matmul %133, %135, %cst_102 {dimension_numbers = #tpu.dot_dimension_numbers<[1], [0], [0], [1], [0, 0, 1, 1], [], []>} : vector<1x64xf32>, vector<64x128xf32>, vector<1x128xf32> -> vector<1x128xf32>
    %137 = arith.addf %131, %136 : vector<1x128xf32>
    %138 = vector.extract_strided_slice %72 {offsets = [0, 11, 0], sizes = [1, 1, 64], strides = [1, 1, 1]} : vector<1x12x64xf32> to vector<1x1x64xf32>
    %139 = vector.shape_cast %138 : vector<1x1x64xf32> to vector<1x64xf32>
    %c11 = arith.constant 11 : index
    %c0_103 = arith.constant 0 : index
    %c0_104 = arith.constant 0 : index
    %140 = vector.load %arg8[%c11, %c0_103, %c0_104] : memref<12x64x128xf32, #tpu.memory_space<vmem>>, vector<1x64x128xf32>
    %141 = vector.shape_cast %140 : vector<1x64x128xf32> to vector<64x128xf32>
    %cst_105 = arith.constant dense<0.000000e+00> : vector<1x128xf32>
    %142 = tpu.matmul %139, %141, %cst_105 {dimension_numbers = #tpu.dot_dimension_numbers<[1], [0], [0], [1], [0, 0, 1, 1], [], []>} : vector<1x64xf32>, vector<64x128xf32>, vector<1x128xf32> -> vector<1x128xf32>
    %143 = arith.addf %137, %142 : vector<1x128xf32>
    %c0_106 = arith.constant 0 : index
    %c0_107 = arith.constant 0 : index
    %144 = vector.load %arg9[%c0_106, %c0_107] : memref<1x128xf32, #tpu.memory_space<vmem>>, vector<1x128xf32>
    %145 = arith.addf %143, %144 : vector<1x128xf32>
    %c0_108 = arith.constant 0 : index
    %c0_109 = arith.constant 0 : index
    %146 = vector.load %arg10[%c0_108, %c0_109] : memref<128x32xf32, #tpu.memory_space<vmem>>, vector<128x32xf32>
    %cst_110 = arith.constant dense<0.000000e+00> : vector<1x32xf32>
    %147 = tpu.matmul %145, %146, %cst_110 {dimension_numbers = #tpu.dot_dimension_numbers<[1], [0], [0], [1], [0, 0, 1, 1], [], []>} : vector<1x128xf32>, vector<128x32xf32>, vector<1x32xf32> -> vector<1x32xf32>
    %c0_111 = arith.constant 0 : index
    %c0_112 = arith.constant 0 : index
    %148 = vector.load %arg11[%c0_111, %c0_112] : memref<1x32xf32, #tpu.memory_space<vmem>>, vector<1x32xf32>
    %149 = arith.addf %147, %148 : vector<1x32xf32>
    %c0_113 = arith.constant 0 : index
    %c0_114 = arith.constant 0 : index
    %150 = vector.load %arg12[%c0_113, %c0_114] : memref<32x128xf32, #tpu.memory_space<vmem>>, vector<32x128xf32>
    %cst_115 = arith.constant dense<0.000000e+00> : vector<1x128xf32>
    %151 = tpu.matmul %149, %150, %cst_115 {dimension_numbers = #tpu.dot_dimension_numbers<[1], [0], [0], [1], [0, 0, 1, 1], [], []>} : vector<1x32xf32>, vector<32x128xf32>, vector<1x128xf32> -> vector<1x128xf32>
    %c0_116 = arith.constant 0 : index
    %c0_117 = arith.constant 0 : index
    %152 = vector.load %arg13[%c0_116, %c0_117] : memref<1x128xf32, #tpu.memory_space<vmem>>, vector<1x128xf32>
    %153 = arith.addf %151, %152 : vector<1x128xf32>
    %c0_118 = arith.constant 0 : index
    %c0_119 = arith.constant 0 : index
    %154 = vector.load %arg14[%c0_118, %c0_119] : memref<128x768xf32, #tpu.memory_space<vmem>>, vector<128x768xf32>
    %cst_120 = arith.constant dense<0.000000e+00> : vector<1x768xf32>
    %155 = tpu.matmul %153, %154, %cst_120 {dimension_numbers = #tpu.dot_dimension_numbers<[1], [0], [0], [1], [0, 0, 1, 1], [], []>} : vector<1x128xf32>, vector<128x768xf32>, vector<1x768xf32> -> vector<1x768xf32>
    %c0_121 = arith.constant 0 : index
    %c0_122 = arith.constant 0 : index
    %156 = vector.load %arg15[%c0_121, %c0_122] : memref<1x768xf32, #tpu.memory_space<vmem>>, vector<1x768xf32>
    %157 = arith.addf %155, %156 : vector<1x768xf32>
    %cst_123 = arith.constant 0.000000e+00 : f32
    %158 = vector.broadcast %cst_123 : f32 to vector<1x1x64xf32>
    %c0_124 = arith.constant 0 : index
    %c0_125 = arith.constant 0 : index
    %c0_126 = arith.constant 0 : index
    %159 = vector.load %arg26[%c0_124, %c0_125, %c0_126] : memref<1x14x64xf32, #tpu.memory_space<vmem>>, vector<1x1x64xf32>
    tpu.vector_store %arg26[%c0_124, %c0_125, %c0_126], %158 {strides = array<i32>} : memref<1x14x64xf32, #tpu.memory_space<vmem>>, vector<1x1x64xf32>,
    %c0_127 = arith.constant 0 : index
    %c13 = arith.constant 13 : index
    %c0_128 = arith.constant 0 : index
    %160 = vector.load %arg26[%c0_127, %c13, %c0_128] : memref<1x14x64xf32, #tpu.memory_space<vmem>>, vector<1x1x64xf32>
    tpu.vector_store %arg26[%c0_127, %c13, %c0_128], %158 {strides = array<i32>} : memref<1x14x64xf32, #tpu.memory_space<vmem>>, vector<1x1x64xf32>,
    %161 = vector.extract_strided_slice %157 {offsets = [0, 0], sizes = [1, 64], strides = [1, 1]} : vector<1x768xf32> to vector<1x64xf32>
    %162 = vector.shape_cast %161 : vector<1x64xf32> to vector<1x1x64xf32>
    %c0_129 = arith.constant 0 : index
    %c1_130 = arith.constant 1 : index
    %c0_131 = arith.constant 0 : index
    %163 = vector.load %arg26[%c0_129, %c1_130, %c0_131] : memref<1x14x64xf32, #tpu.memory_space<vmem>>, vector<1x1x64xf32>
    tpu.vector_store %arg26[%c0_129, %c1_130, %c0_131], %162 {strides = array<i32>} : memref<1x14x64xf32, #tpu.memory_space<vmem>>, vector<1x1x64xf32>,
    %164 = vector.extract_strided_slice %157 {offsets = [0, 64], sizes = [1, 64], strides = [1, 1]} : vector<1x768xf32> to vector<1x64xf32>
    %165 = vector.shape_cast %164 : vector<1x64xf32> to vector<1x1x64xf32>
    %c0_132 = arith.constant 0 : index
    %c2_133 = arith.constant 2 : index
    %c0_134 = arith.constant 0 : index
    %166 = vector.load %arg26[%c0_132, %c2_133, %c0_134] : memref<1x14x64xf32, #tpu.memory_space<vmem>>, vector<1x1x64xf32>
    tpu.vector_store %arg26[%c0_132, %c2_133, %c0_134], %165 {strides = array<i32>} : memref<1x14x64xf32, #tpu.memory_space<vmem>>, vector<1x1x64xf32>,
    %167 = vector.extract_strided_slice %157 {offsets = [0, 128], sizes = [1, 64], strides = [1, 1]} : vector<1x768xf32> to vector<1x64xf32>
    %168 = vector.shape_cast %167 : vector<1x64xf32> to vector<1x1x64xf32>
    %c0_135 = arith.constant 0 : index
    %c3_136 = arith.constant 3 : index
    %c0_137 = arith.constant 0 : index
    %169 = vector.load %arg26[%c0_135, %c3_136, %c0_137] : memref<1x14x64xf32, #tpu.memory_space<vmem>>, vector<1x1x64xf32>
    tpu.vector_store %arg26[%c0_135, %c3_136, %c0_137], %168 {strides = array<i32>} : memref<1x14x64xf32, #tpu.memory_space<vmem>>, vector<1x1x64xf32>,
    %170 = vector.extract_strided_slice %157 {offsets = [0, 192], sizes = [1, 64], strides = [1, 1]} : vector<1x768xf32> to vector<1x64xf32>
    %171 = vector.shape_cast %170 : vector<1x64xf32> to vector<1x1x64xf32>
    %c0_138 = arith.constant 0 : index
    %c4_139 = arith.constant 4 : index
    %c0_140 = arith.constant 0 : index
    %172 = vector.load %arg26[%c0_138, %c4_139, %c0_140] : memref<1x14x64xf32, #tpu.memory_space<vmem>>, vector<1x1x64xf32>
    tpu.vector_store %arg26[%c0_138, %c4_139, %c0_140], %171 {strides = array<i32>} : memref<1x14x64xf32, #tpu.memory_space<vmem>>, vector<1x1x64xf32>,
    %173 = vector.extract_strided_slice %157 {offsets = [0, 256], sizes = [1, 64], strides = [1, 1]} : vector<1x768xf32> to vector<1x64xf32>
    %174 = vector.shape_cast %173 : vector<1x64xf32> to vector<1x1x64xf32>
    %c0_141 = arith.constant 0 : index
    %c5_142 = arith.constant 5 : index
    %c0_143 = arith.constant 0 : index
    %175 = vector.load %arg26[%c0_141, %c5_142, %c0_143] : memref<1x14x64xf32, #tpu.memory_space<vmem>>, vector<1x1x64xf32>
    tpu.vector_store %arg26[%c0_141, %c5_142, %c0_143], %174 {strides = array<i32>} : memref<1x14x64xf32, #tpu.memory_space<vmem>>, vector<1x1x64xf32>,
    %176 = vector.extract_strided_slice %157 {offsets = [0, 320], sizes = [1, 64], strides = [1, 1]} : vector<1x768xf32> to vector<1x64xf32>
    %177 = vector.shape_cast %176 : vector<1x64xf32> to vector<1x1x64xf32>
    %c0_144 = arith.constant 0 : index
    %c6_145 = arith.constant 6 : index
    %c0_146 = arith.constant 0 : index
    %178 = vector.load %arg26[%c0_144, %c6_145, %c0_146] : memref<1x14x64xf32, #tpu.memory_space<vmem>>, vector<1x1x64xf32>
    tpu.vector_store %arg26[%c0_144, %c6_145, %c0_146], %177 {strides = array<i32>} : memref<1x14x64xf32, #tpu.memory_space<vmem>>, vector<1x1x64xf32>,
    %179 = vector.extract_strided_slice %157 {offsets = [0, 384], sizes = [1, 64], strides = [1, 1]} : vector<1x768xf32> to vector<1x64xf32>
    %180 = vector.shape_cast %179 : vector<1x64xf32> to vector<1x1x64xf32>
    %c0_147 = arith.constant 0 : index
    %c7_148 = arith.constant 7 : index
    %c0_149 = arith.constant 0 : index
    %181 = vector.load %arg26[%c0_147, %c7_148, %c0_149] : memref<1x14x64xf32, #tpu.memory_space<vmem>>, vector<1x1x64xf32>
    tpu.vector_store %arg26[%c0_147, %c7_148, %c0_149], %180 {strides = array<i32>} : memref<1x14x64xf32, #tpu.memory_space<vmem>>, vector<1x1x64xf32>,
    %182 = vector.extract_strided_slice %157 {offsets = [0, 448], sizes = [1, 64], strides = [1, 1]} : vector<1x768xf32> to vector<1x64xf32>
    %183 = vector.shape_cast %182 : vector<1x64xf32> to vector<1x1x64xf32>
    %c0_150 = arith.constant 0 : index
    %c8_151 = arith.constant 8 : index
    %c0_152 = arith.constant 0 : index
    %184 = vector.load %arg26[%c0_150, %c8_151, %c0_152] : memref<1x14x64xf32, #tpu.memory_space<vmem>>, vector<1x1x64xf32>
    tpu.vector_store %arg26[%c0_150, %c8_151, %c0_152], %183 {strides = array<i32>} : memref<1x14x64xf32, #tpu.memory_space<vmem>>, vector<1x1x64xf32>,
    %185 = vector.extract_strided_slice %157 {offsets = [0, 512], sizes = [1, 64], strides = [1, 1]} : vector<1x768xf32> to vector<1x64xf32>
    %186 = vector.shape_cast %185 : vector<1x64xf32> to vector<1x1x64xf32>
    %c0_153 = arith.constant 0 : index
    %c9_154 = arith.constant 9 : index
    %c0_155 = arith.constant 0 : index
    %187 = vector.load %arg26[%c0_153, %c9_154, %c0_155] : memref<1x14x64xf32, #tpu.memory_space<vmem>>, vector<1x1x64xf32>
    tpu.vector_store %arg26[%c0_153, %c9_154, %c0_155], %186 {strides = array<i32>} : memref<1x14x64xf32, #tpu.memory_space<vmem>>, vector<1x1x64xf32>,
    %188 = vector.extract_strided_slice %157 {offsets = [0, 576], sizes = [1, 64], strides = [1, 1]} : vector<1x768xf32> to vector<1x64xf32>
    %189 = vector.shape_cast %188 : vector<1x64xf32> to vector<1x1x64xf32>
    %c0_156 = arith.constant 0 : index
    %c10_157 = arith.constant 10 : index
    %c0_158 = arith.constant 0 : index
    %190 = vector.load %arg26[%c0_156, %c10_157, %c0_158] : memref<1x14x64xf32, #tpu.memory_space<vmem>>, vector<1x1x64xf32>
    tpu.vector_store %arg26[%c0_156, %c10_157, %c0_158], %189 {strides = array<i32>} : memref<1x14x64xf32, #tpu.memory_space<vmem>>, vector<1x1x64xf32>,
    %191 = vector.extract_strided_slice %157 {offsets = [0, 640], sizes = [1, 64], strides = [1, 1]} : vector<1x768xf32> to vector<1x64xf32>
    %192 = vector.shape_cast %191 : vector<1x64xf32> to vector<1x1x64xf32>
    %c0_159 = arith.constant 0 : index
    %c11_160 = arith.constant 11 : index
    %c0_161 = arith.constant 0 : index
    %193 = vector.load %arg26[%c0_159, %c11_160, %c0_161] : memref<1x14x64xf32, #tpu.memory_space<vmem>>, vector<1x1x64xf32>
    tpu.vector_store %arg26[%c0_159, %c11_160, %c0_161], %192 {strides = array<i32>} : memref<1x14x64xf32, #tpu.memory_space<vmem>>, vector<1x1x64xf32>,
    %194 = vector.extract_strided_slice %157 {offsets = [0, 704], sizes = [1, 64], strides = [1, 1]} : vector<1x768xf32> to vector<1x64xf32>
    %195 = vector.shape_cast %194 : vector<1x64xf32> to vector<1x1x64xf32>
    %c0_162 = arith.constant 0 : index
    %c12_163 = arith.constant 12 : index
    %c0_164 = arith.constant 0 : index
    %196 = vector.load %arg26[%c0_162, %c12_163, %c0_164] : memref<1x14x64xf32, #tpu.memory_space<vmem>>, vector<1x1x64xf32>
    tpu.vector_store %arg26[%c0_162, %c12_163, %c0_164], %195 {strides = array<i32>} : memref<1x14x64xf32, #tpu.memory_space<vmem>>, vector<1x1x64xf32>,
    %c0_165 = arith.constant 0 : index
    %c1_166 = arith.constant 1 : index
    %c0_167 = arith.constant 0 : index
    %197 = vector.load %arg26[%c0_165, %c1_166, %c0_167] : memref<1x14x64xf32, #tpu.memory_space<vmem>>, vector<1x13x64xf32>
    %198 = vector.shape_cast %197 : vector<1x13x64xf32> to vector<13x64xf32>
    %c0_168 = arith.constant 0 : index
    %c0_169 = arith.constant 0 : index
    %c0_170 = arith.constant 0 : index
    %199 = vector.load %arg26[%c0_168, %c0_169, %c0_170] : memref<1x14x64xf32, #tpu.memory_space<vmem>>, vector<1x13x64xf32>
    %200 = vector.shape_cast %199 : vector<1x13x64xf32> to vector<13x64xf32>
    %c0_171 = arith.constant 0 : index
    %c1_172 = arith.constant 1 : index
    %c0_173 = arith.constant 0 : index
    %201 = vector.load %arg26[%c0_171, %c1_172, %c0_173] : memref<1x14x64xf32, #tpu.memory_space<vmem>>, vector<1x12x64xf32>
    %202 = vector.shape_cast %201 : vector<1x12x64xf32> to vector<12x64xf32>
    %c0_174 = arith.constant 0 : index
    %c0_175 = arith.constant 0 : index
    %203 = vector.load %arg16[%c0_174, %c0_175] : memref<64x32xf32, #tpu.memory_space<vmem>>, vector<64x32xf32>
    %cst_176 = arith.constant dense<0.000000e+00> : vector<13x32xf32>
    %204 = tpu.matmul %198, %203, %cst_176 {dimension_numbers = #tpu.dot_dimension_numbers<[1], [0], [0], [1], [0, 0, 1, 1], [], []>} : vector<13x64xf32>, vector<64x32xf32>, vector<13x32xf32> -> vector<13x32xf32>
    %c0_177 = arith.constant 0 : index
    %c0_178 = arith.constant 0 : index
    %205 = vector.load %arg18[%c0_177, %c0_178] : memref<64x32xf32, #tpu.memory_space<vmem>>, vector<64x32xf32>
    %cst_179 = arith.constant dense<0.000000e+00> : vector<13x32xf32>
    %206 = tpu.matmul %200, %205, %cst_179 {dimension_numbers = #tpu.dot_dimension_numbers<[1], [0], [0], [1], [0, 0, 1, 1], [], []>} : vector<13x64xf32>, vector<64x32xf32>, vector<13x32xf32> -> vector<13x32xf32>
    %207 = arith.addf %204, %206 : vector<13x32xf32>
    %c0_180 = arith.constant 0 : index
    %c0_181 = arith.constant 0 : index
    %208 = vector.load %arg19[%c0_180, %c0_181] : memref<1x32xf32, #tpu.memory_space<vmem>>, vector<1x32xf32>
    %209 = vector.broadcast %208 : vector<1x32xf32> to vector<13x32xf32>
    %210 = arith.addf %207, %209 : vector<13x32xf32>
    %cst_182 = arith.constant 0.000000e+00 : f32
    %211 = vector.broadcast %cst_182 : f32 to vector<13x32xf32>
    %212 = arith.maximumf %210, %211 : vector<13x32xf32>
    %213 = vector.shape_cast %212 : vector<13x32xf32> to vector<1x13x32xf32>
    %c0_183 = arith.constant 0 : index
    %c0_184 = arith.constant 0 : index
    %214 = vector.load %arg17[%c0_183, %c0_184] : memref<64x32xf32, #tpu.memory_space<vmem>>, vector<64x32xf32>
    %cst_185 = arith.constant dense<0.000000e+00> : vector<12x32xf32>
    %215 = tpu.matmul %202, %214, %cst_185 {dimension_numbers = #tpu.dot_dimension_numbers<[1], [0], [0], [1], [0, 0, 1, 1], [], []>} : vector<12x64xf32>, vector<64x32xf32>, vector<12x32xf32> -> vector<12x32xf32>
    %c0_186 = arith.constant 0 : index
    %c0_187 = arith.constant 0 : index
    %216 = vector.load %arg19[%c0_186, %c0_187] : memref<1x32xf32, #tpu.memory_space<vmem>>, vector<1x32xf32>
    %217 = vector.broadcast %216 : vector<1x32xf32> to vector<12x32xf32>
    %218 = arith.addf %215, %217 : vector<12x32xf32>
    %cst_188 = arith.constant 0.000000e+00 : f32
    %219 = vector.broadcast %cst_188 : f32 to vector<12x32xf32>
    %220 = arith.maximumf %218, %219 : vector<12x32xf32>
    %221 = vector.shape_cast %220 : vector<12x32xf32> to vector<1x12x32xf32>
    %222 = vector.extract_strided_slice %213 {offsets = [0, 0, 0], sizes = [1, 1, 32], strides = [1, 1, 1]} : vector<1x13x32xf32> to vector<1x1x32xf32>
    %223 = vector.shape_cast %222 : vector<1x1x32xf32> to vector<1x1x32xf32>
    %224 = vector.broadcast %223 : vector<1x1x32xf32> to vector<1x2x32xf32>
    %c0_189 = arith.constant 0 : index
    %c0_190 = arith.constant 0 : index
    %c0_191 = arith.constant 0 : index
    %225 = vector.load %arg27[%c0_189, %c0_190, %c0_191] : memref<1x100x32xf32, #tpu.memory_space<vmem>>, vector<1x2x32xf32>
    tpu.vector_store %arg27[%c0_189, %c0_190, %c0_191], %224 {strides = array<i32>} : memref<1x100x32xf32, #tpu.memory_space<vmem>>, vector<1x2x32xf32>,
    %226 = vector.extract_strided_slice %213 {offsets = [0, 1, 0], sizes = [1, 1, 32], strides = [1, 1, 1]} : vector<1x13x32xf32> to vector<1x1x32xf32>
    %227 = vector.shape_cast %226 : vector<1x1x32xf32> to vector<1x1x32xf32>
    %228 = vector.broadcast %227 : vector<1x1x32xf32> to vector<1x2x32xf32>
    %c0_192 = arith.constant 0 : index
    %c4_193 = arith.constant 4 : index
    %c0_194 = arith.constant 0 : index
    %229 = vector.load %arg27[%c0_192, %c4_193, %c0_194] : memref<1x100x32xf32, #tpu.memory_space<vmem>>, vector<1x2x32xf32>
    tpu.vector_store %arg27[%c0_192, %c4_193, %c0_194], %228 {strides = array<i32>} : memref<1x100x32xf32, #tpu.memory_space<vmem>>, vector<1x2x32xf32>,
    %230 = vector.extract_strided_slice %213 {offsets = [0, 2, 0], sizes = [1, 1, 32], strides = [1, 1, 1]} : vector<1x13x32xf32> to vector<1x1x32xf32>
    %231 = vector.shape_cast %230 : vector<1x1x32xf32> to vector<1x1x32xf32>
    %232 = vector.broadcast %231 : vector<1x1x32xf32> to vector<1x2x32xf32>
    %c0_195 = arith.constant 0 : index
    %c8_196 = arith.constant 8 : index
    %c0_197 = arith.constant 0 : index
    %233 = vector.load %arg27[%c0_195, %c8_196, %c0_197] : memref<1x100x32xf32, #tpu.memory_space<vmem>>, vector<1x2x32xf32>
    tpu.vector_store %arg27[%c0_195, %c8_196, %c0_197], %232 {strides = array<i32>} : memref<1x100x32xf32, #tpu.memory_space<vmem>>, vector<1x2x32xf32>,
    %234 = vector.extract_strided_slice %213 {offsets = [0, 3, 0], sizes = [1, 1, 32], strides = [1, 1, 1]} : vector<1x13x32xf32> to vector<1x1x32xf32>
    %235 = vector.shape_cast %234 : vector<1x1x32xf32> to vector<1x1x32xf32>
    %236 = vector.broadcast %235 : vector<1x1x32xf32> to vector<1x2x32xf32>
    %c0_198 = arith.constant 0 : index
    %c12_199 = arith.constant 12 : index
    %c0_200 = arith.constant 0 : index
    %237 = vector.load %arg27[%c0_198, %c12_199, %c0_200] : memref<1x100x32xf32, #tpu.memory_space<vmem>>, vector<1x2x32xf32>
    tpu.vector_store %arg27[%c0_198, %c12_199, %c0_200], %236 {strides = array<i32>} : memref<1x100x32xf32, #tpu.memory_space<vmem>>, vector<1x2x32xf32>,
    %238 = vector.extract_strided_slice %213 {offsets = [0, 4, 0], sizes = [1, 1, 32], strides = [1, 1, 1]} : vector<1x13x32xf32> to vector<1x1x32xf32>
    %239 = vector.shape_cast %238 : vector<1x1x32xf32> to vector<1x1x32xf32>
    %240 = vector.broadcast %239 : vector<1x1x32xf32> to vector<1x2x32xf32>
    %c0_201 = arith.constant 0 : index
    %c16_202 = arith.constant 16 : index
    %c0_203 = arith.constant 0 : index
    %241 = vector.load %arg27[%c0_201, %c16_202, %c0_203] : memref<1x100x32xf32, #tpu.memory_space<vmem>>, vector<1x2x32xf32>
    tpu.vector_store %arg27[%c0_201, %c16_202, %c0_203], %240 {strides = array<i32>} : memref<1x100x32xf32, #tpu.memory_space<vmem>>, vector<1x2x32xf32>,
    %242 = vector.extract_strided_slice %213 {offsets = [0, 5, 0], sizes = [1, 1, 32], strides = [1, 1, 1]} : vector<1x13x32xf32> to vector<1x1x32xf32>
    %243 = vector.shape_cast %242 : vector<1x1x32xf32> to vector<1x1x32xf32>
    %244 = vector.broadcast %243 : vector<1x1x32xf32> to vector<1x2x32xf32>
    %c0_204 = arith.constant 0 : index
    %c20 = arith.constant 20 : index
    %c0_205 = arith.constant 0 : index
    %245 = vector.load %arg27[%c0_204, %c20, %c0_205] : memref<1x100x32xf32, #tpu.memory_space<vmem>>, vector<1x2x32xf32>
    tpu.vector_store %arg27[%c0_204, %c20, %c0_205], %244 {strides = array<i32>} : memref<1x100x32xf32, #tpu.memory_space<vmem>>, vector<1x2x32xf32>,
    %246 = vector.extract_strided_slice %213 {offsets = [0, 6, 0], sizes = [1, 1, 32], strides = [1, 1, 1]} : vector<1x13x32xf32> to vector<1x1x32xf32>
    %247 = vector.shape_cast %246 : vector<1x1x32xf32> to vector<1x1x32xf32>
    %248 = vector.broadcast %247 : vector<1x1x32xf32> to vector<1x2x32xf32>
    %c0_206 = arith.constant 0 : index
    %c24 = arith.constant 24 : index
    %c0_207 = arith.constant 0 : index
    %249 = vector.load %arg27[%c0_206, %c24, %c0_207] : memref<1x100x32xf32, #tpu.memory_space<vmem>>, vector<1x2x32xf32>
    tpu.vector_store %arg27[%c0_206, %c24, %c0_207], %248 {strides = array<i32>} : memref<1x100x32xf32, #tpu.memory_space<vmem>>, vector<1x2x32xf32>,
    %250 = vector.extract_strided_slice %213 {offsets = [0, 7, 0], sizes = [1, 1, 32], strides = [1, 1, 1]} : vector<1x13x32xf32> to vector<1x1x32xf32>
    %251 = vector.shape_cast %250 : vector<1x1x32xf32> to vector<1x1x32xf32>
    %252 = vector.broadcast %251 : vector<1x1x32xf32> to vector<1x2x32xf32>
    %c0_208 = arith.constant 0 : index
    %c28 = arith.constant 28 : index
    %c0_209 = arith.constant 0 : index
    %253 = vector.load %arg27[%c0_208, %c28, %c0_209] : memref<1x100x32xf32, #tpu.memory_space<vmem>>, vector<1x2x32xf32>
    tpu.vector_store %arg27[%c0_208, %c28, %c0_209], %252 {strides = array<i32>} : memref<1x100x32xf32, #tpu.memory_space<vmem>>, vector<1x2x32xf32>,
    %254 = vector.extract_strided_slice %213 {offsets = [0, 8, 0], sizes = [1, 1, 32], strides = [1, 1, 1]} : vector<1x13x32xf32> to vector<1x1x32xf32>
    %255 = vector.shape_cast %254 : vector<1x1x32xf32> to vector<1x1x32xf32>
    %256 = vector.broadcast %255 : vector<1x1x32xf32> to vector<1x2x32xf32>
    %c0_210 = arith.constant 0 : index
    %c32_211 = arith.constant 32 : index
    %c0_212 = arith.constant 0 : index
    %257 = vector.load %arg27[%c0_210, %c32_211, %c0_212] : memref<1x100x32xf32, #tpu.memory_space<vmem>>, vector<1x2x32xf32>
    tpu.vector_store %arg27[%c0_210, %c32_211, %c0_212], %256 {strides = array<i32>} : memref<1x100x32xf32, #tpu.memory_space<vmem>>, vector<1x2x32xf32>,
    %258 = vector.extract_strided_slice %213 {offsets = [0, 9, 0], sizes = [1, 1, 32], strides = [1, 1, 1]} : vector<1x13x32xf32> to vector<1x1x32xf32>
    %259 = vector.shape_cast %258 : vector<1x1x32xf32> to vector<1x1x32xf32>
    %260 = vector.broadcast %259 : vector<1x1x32xf32> to vector<1x2x32xf32>
    %c0_213 = arith.constant 0 : index
    %c36 = arith.constant 36 : index
    %c0_214 = arith.constant 0 : index
    %261 = vector.load %arg27[%c0_213, %c36, %c0_214] : memref<1x100x32xf32, #tpu.memory_space<vmem>>, vector<1x2x32xf32>
    tpu.vector_store %arg27[%c0_213, %c36, %c0_214], %260 {strides = array<i32>} : memref<1x100x32xf32, #tpu.memory_space<vmem>>, vector<1x2x32xf32>,
    %262 = vector.extract_strided_slice %213 {offsets = [0, 10, 0], sizes = [1, 1, 32], strides = [1, 1, 1]} : vector<1x13x32xf32> to vector<1x1x32xf32>
    %263 = vector.shape_cast %262 : vector<1x1x32xf32> to vector<1x1x32xf32>
    %264 = vector.broadcast %263 : vector<1x1x32xf32> to vector<1x2x32xf32>
    %c0_215 = arith.constant 0 : index
    %c40 = arith.constant 40 : index
    %c0_216 = arith.constant 0 : index
    %265 = vector.load %arg27[%c0_215, %c40, %c0_216] : memref<1x100x32xf32, #tpu.memory_space<vmem>>, vector<1x2x32xf32>
    tpu.vector_store %arg27[%c0_215, %c40, %c0_216], %264 {strides = array<i32>} : memref<1x100x32xf32, #tpu.memory_space<vmem>>, vector<1x2x32xf32>,
    %266 = vector.extract_strided_slice %213 {offsets = [0, 11, 0], sizes = [1, 1, 32], strides = [1, 1, 1]} : vector<1x13x32xf32> to vector<1x1x32xf32>
    %267 = vector.shape_cast %266 : vector<1x1x32xf32> to vector<1x1x32xf32>
    %268 = vector.broadcast %267 : vector<1x1x32xf32> to vector<1x2x32xf32>
    %c0_217 = arith.constant 0 : index
    %c44 = arith.constant 44 : index
    %c0_218 = arith.constant 0 : index
    %269 = vector.load %arg27[%c0_217, %c44, %c0_218] : memref<1x100x32xf32, #tpu.memory_space<vmem>>, vector<1x2x32xf32>
    tpu.vector_store %arg27[%c0_217, %c44, %c0_218], %268 {strides = array<i32>} : memref<1x100x32xf32, #tpu.memory_space<vmem>>, vector<1x2x32xf32>,
    %270 = vector.extract_strided_slice %213 {offsets = [0, 12, 0], sizes = [1, 1, 32], strides = [1, 1, 1]} : vector<1x13x32xf32> to vector<1x1x32xf32>
    %271 = vector.shape_cast %270 : vector<1x1x32xf32> to vector<1x1x32xf32>
    %272 = vector.broadcast %271 : vector<1x1x32xf32> to vector<1x2x32xf32>
    %c0_219 = arith.constant 0 : index
    %c48 = arith.constant 48 : index
    %c0_220 = arith.constant 0 : index
    %273 = vector.load %arg27[%c0_219, %c48, %c0_220] : memref<1x100x32xf32, #tpu.memory_space<vmem>>, vector<1x2x32xf32>
    tpu.vector_store %arg27[%c0_219, %c48, %c0_220], %272 {strides = array<i32>} : memref<1x100x32xf32, #tpu.memory_space<vmem>>, vector<1x2x32xf32>,
    %274 = vector.extract_strided_slice %221 {offsets = [0, 0, 0], sizes = [1, 1, 32], strides = [1, 1, 1]} : vector<1x12x32xf32> to vector<1x1x32xf32>
    %275 = vector.shape_cast %274 : vector<1x1x32xf32> to vector<1x1x32xf32>
    %276 = vector.broadcast %275 : vector<1x1x32xf32> to vector<1x2x32xf32>
    %c0_221 = arith.constant 0 : index
    %c2_222 = arith.constant 2 : index
    %c0_223 = arith.constant 0 : index
    %277 = vector.load %arg27[%c0_221, %c2_222, %c0_223] : memref<1x100x32xf32, #tpu.memory_space<vmem>>, vector<1x2x32xf32>
    tpu.vector_store %arg27[%c0_221, %c2_222, %c0_223], %276 {strides = array<i32>} : memref<1x100x32xf32, #tpu.memory_space<vmem>>, vector<1x2x32xf32>,
    %278 = vector.extract_strided_slice %221 {offsets = [0, 1, 0], sizes = [1, 1, 32], strides = [1, 1, 1]} : vector<1x12x32xf32> to vector<1x1x32xf32>
    %279 = vector.shape_cast %278 : vector<1x1x32xf32> to vector<1x1x32xf32>
    %280 = vector.broadcast %279 : vector<1x1x32xf32> to vector<1x2x32xf32>
    %c0_224 = arith.constant 0 : index
    %c6_225 = arith.constant 6 : index
    %c0_226 = arith.constant 0 : index
    %281 = vector.load %arg27[%c0_224, %c6_225, %c0_226] : memref<1x100x32xf32, #tpu.memory_space<vmem>>, vector<1x2x32xf32>
    tpu.vector_store %arg27[%c0_224, %c6_225, %c0_226], %280 {strides = array<i32>} : memref<1x100x32xf32, #tpu.memory_space<vmem>>, vector<1x2x32xf32>,
    %282 = vector.extract_strided_slice %221 {offsets = [0, 2, 0], sizes = [1, 1, 32], strides = [1, 1, 1]} : vector<1x12x32xf32> to vector<1x1x32xf32>
    %283 = vector.shape_cast %282 : vector<1x1x32xf32> to vector<1x1x32xf32>
    %284 = vector.broadcast %283 : vector<1x1x32xf32> to vector<1x2x32xf32>
    %c0_227 = arith.constant 0 : index
    %c10_228 = arith.constant 10 : index
    %c0_229 = arith.constant 0 : index
    %285 = vector.load %arg27[%c0_227, %c10_228, %c0_229] : memref<1x100x32xf32, #tpu.memory_space<vmem>>, vector<1x2x32xf32>
    tpu.vector_store %arg27[%c0_227, %c10_228, %c0_229], %284 {strides = array<i32>} : memref<1x100x32xf32, #tpu.memory_space<vmem>>, vector<1x2x32xf32>,
    %286 = vector.extract_strided_slice %221 {offsets = [0, 3, 0], sizes = [1, 1, 32], strides = [1, 1, 1]} : vector<1x12x32xf32> to vector<1x1x32xf32>
    %287 = vector.shape_cast %286 : vector<1x1x32xf32> to vector<1x1x32xf32>
    %288 = vector.broadcast %287 : vector<1x1x32xf32> to vector<1x2x32xf32>
    %c0_230 = arith.constant 0 : index
    %c14 = arith.constant 14 : index
    %c0_231 = arith.constant 0 : index
    %289 = vector.load %arg27[%c0_230, %c14, %c0_231] : memref<1x100x32xf32, #tpu.memory_space<vmem>>, vector<1x2x32xf32>
    tpu.vector_store %arg27[%c0_230, %c14, %c0_231], %288 {strides = array<i32>} : memref<1x100x32xf32, #tpu.memory_space<vmem>>, vector<1x2x32xf32>,
    %290 = vector.extract_strided_slice %221 {offsets = [0, 4, 0], sizes = [1, 1, 32], strides = [1, 1, 1]} : vector<1x12x32xf32> to vector<1x1x32xf32>
    %291 = vector.shape_cast %290 : vector<1x1x32xf32> to vector<1x1x32xf32>
    %292 = vector.broadcast %291 : vector<1x1x32xf32> to vector<1x2x32xf32>
    %c0_232 = arith.constant 0 : index
    %c18 = arith.constant 18 : index
    %c0_233 = arith.constant 0 : index
    %293 = vector.load %arg27[%c0_232, %c18, %c0_233] : memref<1x100x32xf32, #tpu.memory_space<vmem>>, vector<1x2x32xf32>
    tpu.vector_store %arg27[%c0_232, %c18, %c0_233], %292 {strides = array<i32>} : memref<1x100x32xf32, #tpu.memory_space<vmem>>, vector<1x2x32xf32>,
    %294 = vector.extract_strided_slice %221 {offsets = [0, 5, 0], sizes = [1, 1, 32], strides = [1, 1, 1]} : vector<1x12x32xf32> to vector<1x1x32xf32>
    %295 = vector.shape_cast %294 : vector<1x1x32xf32> to vector<1x1x32xf32>
    %296 = vector.broadcast %295 : vector<1x1x32xf32> to vector<1x2x32xf32>
    %c0_234 = arith.constant 0 : index
    %c22 = arith.constant 22 : index
    %c0_235 = arith.constant 0 : index
    %297 = vector.load %arg27[%c0_234, %c22, %c0_235] : memref<1x100x32xf32, #tpu.memory_space<vmem>>, vector<1x2x32xf32>
    tpu.vector_store %arg27[%c0_234, %c22, %c0_235], %296 {strides = array<i32>} : memref<1x100x32xf32, #tpu.memory_space<vmem>>, vector<1x2x32xf32>,
    %298 = vector.extract_strided_slice %221 {offsets = [0, 6, 0], sizes = [1, 1, 32], strides = [1, 1, 1]} : vector<1x12x32xf32> to vector<1x1x32xf32>
    %299 = vector.shape_cast %298 : vector<1x1x32xf32> to vector<1x1x32xf32>
    %300 = vector.broadcast %299 : vector<1x1x32xf32> to vector<1x2x32xf32>
    %c0_236 = arith.constant 0 : index
    %c26 = arith.constant 26 : index
    %c0_237 = arith.constant 0 : index
    %301 = vector.load %arg27[%c0_236, %c26, %c0_237] : memref<1x100x32xf32, #tpu.memory_space<vmem>>, vector<1x2x32xf32>
    tpu.vector_store %arg27[%c0_236, %c26, %c0_237], %300 {strides = array<i32>} : memref<1x100x32xf32, #tpu.memory_space<vmem>>, vector<1x2x32xf32>,
    %302 = vector.extract_strided_slice %221 {offsets = [0, 7, 0], sizes = [1, 1, 32], strides = [1, 1, 1]} : vector<1x12x32xf32> to vector<1x1x32xf32>
    %303 = vector.shape_cast %302 : vector<1x1x32xf32> to vector<1x1x32xf32>
    %304 = vector.broadcast %303 : vector<1x1x32xf32> to vector<1x2x32xf32>
    %c0_238 = arith.constant 0 : index
    %c30 = arith.constant 30 : index
    %c0_239 = arith.constant 0 : index
    %305 = vector.load %arg27[%c0_238, %c30, %c0_239] : memref<1x100x32xf32, #tpu.memory_space<vmem>>, vector<1x2x32xf32>
    tpu.vector_store %arg27[%c0_238, %c30, %c0_239], %304 {strides = array<i32>} : memref<1x100x32xf32, #tpu.memory_space<vmem>>, vector<1x2x32xf32>,
    %306 = vector.extract_strided_slice %221 {offsets = [0, 8, 0], sizes = [1, 1, 32], strides = [1, 1, 1]} : vector<1x12x32xf32> to vector<1x1x32xf32>
    %307 = vector.shape_cast %306 : vector<1x1x32xf32> to vector<1x1x32xf32>
    %308 = vector.broadcast %307 : vector<1x1x32xf32> to vector<1x2x32xf32>
    %c0_240 = arith.constant 0 : index
    %c34 = arith.constant 34 : index
    %c0_241 = arith.constant 0 : index
    %309 = vector.load %arg27[%c0_240, %c34, %c0_241] : memref<1x100x32xf32, #tpu.memory_space<vmem>>, vector<1x2x32xf32>
    tpu.vector_store %arg27[%c0_240, %c34, %c0_241], %308 {strides = array<i32>} : memref<1x100x32xf32, #tpu.memory_space<vmem>>, vector<1x2x32xf32>,
    %310 = vector.extract_strided_slice %221 {offsets = [0, 9, 0], sizes = [1, 1, 32], strides = [1, 1, 1]} : vector<1x12x32xf32> to vector<1x1x32xf32>
    %311 = vector.shape_cast %310 : vector<1x1x32xf32> to vector<1x1x32xf32>
    %312 = vector.broadcast %311 : vector<1x1x32xf32> to vector<1x2x32xf32>
    %c0_242 = arith.constant 0 : index
    %c38 = arith.constant 38 : index
    %c0_243 = arith.constant 0 : index
    %313 = vector.load %arg27[%c0_242, %c38, %c0_243] : memref<1x100x32xf32, #tpu.memory_space<vmem>>, vector<1x2x32xf32>
    tpu.vector_store %arg27[%c0_242, %c38, %c0_243], %312 {strides = array<i32>} : memref<1x100x32xf32, #tpu.memory_space<vmem>>, vector<1x2x32xf32>,
    %314 = vector.extract_strided_slice %221 {offsets = [0, 10, 0], sizes = [1, 1, 32], strides = [1, 1, 1]} : vector<1x12x32xf32> to vector<1x1x32xf32>
    %315 = vector.shape_cast %314 : vector<1x1x32xf32> to vector<1x1x32xf32>
    %316 = vector.broadcast %315 : vector<1x1x32xf32> to vector<1x2x32xf32>
    %c0_244 = arith.constant 0 : index
    %c42 = arith.constant 42 : index
    %c0_245 = arith.constant 0 : index
    %317 = vector.load %arg27[%c0_244, %c42, %c0_245] : memref<1x100x32xf32, #tpu.memory_space<vmem>>, vector<1x2x32xf32>
    tpu.vector_store %arg27[%c0_244, %c42, %c0_245], %316 {strides = array<i32>} : memref<1x100x32xf32, #tpu.memory_space<vmem>>, vector<1x2x32xf32>,
    %318 = vector.extract_strided_slice %221 {offsets = [0, 11, 0], sizes = [1, 1, 32], strides = [1, 1, 1]} : vector<1x12x32xf32> to vector<1x1x32xf32>
    %319 = vector.shape_cast %318 : vector<1x1x32xf32> to vector<1x1x32xf32>
    %320 = vector.broadcast %319 : vector<1x1x32xf32> to vector<1x2x32xf32>
    %c0_246 = arith.constant 0 : index
    %c46 = arith.constant 46 : index
    %c0_247 = arith.constant 0 : index
    %321 = vector.load %arg27[%c0_246, %c46, %c0_247] : memref<1x100x32xf32, #tpu.memory_space<vmem>>, vector<1x2x32xf32>
    tpu.vector_store %arg27[%c0_246, %c46, %c0_247], %320 {strides = array<i32>} : memref<1x100x32xf32, #tpu.memory_space<vmem>>, vector<1x2x32xf32>,
    %c0_248 = arith.constant 0 : index
    %c0_249 = arith.constant 0 : index
    %c0_250 = arith.constant 0 : index
    %322 = vector.load %arg27[%c0_248, %c0_249, %c0_250] : memref<1x100x32xf32, #tpu.memory_space<vmem>>, vector<1x50x32xf32>
    %c0_251 = arith.constant 0 : index
    %c0_252 = arith.constant 0 : index
    %323 = vector.load %arg20[%c0_251, %c0_252] : memref<96x16xf32, #tpu.memory_space<vmem>>, vector<96x16xf32>
    %cst_253 = arith.constant 0.000000e+00 : f32
    %324 = vector.broadcast %cst_253 : f32 to vector<1x1x32xf32>
    %c0_254 = arith.constant 0 : index
    %c0_255 = arith.constant 0 : index
    %c0_256 = arith.constant 0 : index
    %325 = vector.load %arg25[%c0_254, %c0_255, %c0_256] : memref<1x100x96xf32, #tpu.memory_space<vmem>>, vector<1x1x32xf32>
    tpu.vector_store %arg25[%c0_254, %c0_255, %c0_256], %324 {strides = array<i32>} : memref<1x100x96xf32, #tpu.memory_space<vmem>>, vector<1x1x32xf32>,
    %326 = vector.extract_strided_slice %322 {offsets = [0, 0, 0], sizes = [1, 49, 32], strides = [1, 1, 1]} : vector<1x50x32xf32> to vector<1x49x32xf32>
    %c0_257 = arith.constant 0 : index
    %c1_258 = arith.constant 1 : index
    %c0_259 = arith.constant 0 : index
    %327 = vector.load %arg25[%c0_257, %c1_258, %c0_259] : memref<1x100x96xf32, #tpu.memory_space<vmem>>, vector<1x49x32xf32>
    tpu.vector_store %arg25[%c0_257, %c1_258, %c0_259], %326 {strides = array<i32>} : memref<1x100x96xf32, #tpu.memory_space<vmem>>, vector<1x49x32xf32>,
    %c0_260 = arith.constant 0 : index
    %c0_261 = arith.constant 0 : index
    %c32_262 = arith.constant 32 : index
    %328 = vector.load %arg25[%c0_260, %c0_261, %c32_262] : memref<1x100x96xf32, #tpu.memory_space<vmem>>, vector<1x50x32xf32>
    tpu.vector_store %arg25[%c0_260, %c0_261, %c32_262], %322 {strides = array<i32>} : memref<1x100x96xf32, #tpu.memory_space<vmem>>, vector<1x50x32xf32>,
    %329 = vector.extract_strided_slice %322 {offsets = [0, 1, 0], sizes = [1, 49, 32], strides = [1, 1, 1]} : vector<1x50x32xf32> to vector<1x49x32xf32>
    %c0_263 = arith.constant 0 : index
    %c0_264 = arith.constant 0 : index
    %c64_265 = arith.constant 64 : index
    %330 = vector.load %arg25[%c0_263, %c0_264, %c64_265] : memref<1x100x96xf32, #tpu.memory_space<vmem>>, vector<1x49x32xf32>
    tpu.vector_store %arg25[%c0_263, %c0_264, %c64_265], %329 {strides = array<i32>} : memref<1x100x96xf32, #tpu.memory_space<vmem>>, vector<1x49x32xf32>,
    %c0_266 = arith.constant 0 : index
    %c49 = arith.constant 49 : index
    %c64_267 = arith.constant 64 : index
    %331 = vector.load %arg25[%c0_266, %c49, %c64_267] : memref<1x100x96xf32, #tpu.memory_space<vmem>>, vector<1x1x32xf32>
    tpu.vector_store %arg25[%c0_266, %c49, %c64_267], %324 {strides = array<i32>} : memref<1x100x96xf32, #tpu.memory_space<vmem>>, vector<1x1x32xf32>,
    %c0_268 = arith.constant 0 : index
    %c0_269 = arith.constant 0 : index
    %c0_270 = arith.constant 0 : index
    %332 = vector.load %arg25[%c0_268, %c0_269, %c0_270] : memref<1x100x96xf32, #tpu.memory_space<vmem>>, vector<1x50x96xf32>
    %333 = vector.shape_cast %332 : vector<1x50x96xf32> to vector<50x96xf32>
    %cst_271 = arith.constant dense<0.000000e+00> : vector<50x16xf32>
    %334 = tpu.matmul %333, %323, %cst_271 {dimension_numbers = #tpu.dot_dimension_numbers<[1], [0], [0], [1], [0, 0, 1, 1], [], []>} : vector<50x96xf32>, vector<96x16xf32>, vector<50x16xf32> -> vector<50x16xf32>
    %c0_272 = arith.constant 0 : index
    %c0_273 = arith.constant 0 : index
    %335 = vector.load %arg21[%c0_272, %c0_273] : memref<1x16xf32, #tpu.memory_space<vmem>>, vector<1x16xf32>
    %336 = vector.broadcast %335 : vector<1x16xf32> to vector<50x16xf32>
    %337 = arith.addf %334, %336 : vector<50x16xf32>
    %cst_274 = arith.constant 0.000000e+00 : f32
    %338 = vector.broadcast %cst_274 : f32 to vector<50x16xf32>
    %339 = arith.maximumf %337, %338 : vector<50x16xf32>
    %340 = vector.shape_cast %339 : vector<50x16xf32> to vector<1x50x16xf32>
    %341 = vector.extract_strided_slice %340 {offsets = [0, 0, 0], sizes = [1, 1, 16], strides = [1, 1, 1]} : vector<1x50x16xf32> to vector<1x1x16xf32>
    %342 = vector.shape_cast %341 : vector<1x1x16xf32> to vector<1x1x16xf32>
    %343 = vector.broadcast %342 : vector<1x1x16xf32> to vector<1x2x16xf32>
    %c0_275 = arith.constant 0 : index
    %c0_276 = arith.constant 0 : index
    %c0_277 = arith.constant 0 : index
    %344 = vector.load %arg27[%c0_275, %c0_276, %c0_277] : memref<1x100x32xf32, #tpu.memory_space<vmem>>, vector<1x2x16xf32>
    tpu.vector_store %arg27[%c0_275, %c0_276, %c0_277], %343 {strides = array<i32>} : memref<1x100x32xf32, #tpu.memory_space<vmem>>, vector<1x2x16xf32>,
    %345 = vector.extract_strided_slice %340 {offsets = [0, 1, 0], sizes = [1, 1, 16], strides = [1, 1, 1]} : vector<1x50x16xf32> to vector<1x1x16xf32>
    %346 = vector.shape_cast %345 : vector<1x1x16xf32> to vector<1x1x16xf32>
    %347 = vector.broadcast %346 : vector<1x1x16xf32> to vector<1x2x16xf32>
    %c0_278 = arith.constant 0 : index
    %c2_279 = arith.constant 2 : index
    %c0_280 = arith.constant 0 : index
    %348 = vector.load %arg27[%c0_278, %c2_279, %c0_280] : memref<1x100x32xf32, #tpu.memory_space<vmem>>, vector<1x2x16xf32>
    tpu.vector_store %arg27[%c0_278, %c2_279, %c0_280], %347 {strides = array<i32>} : memref<1x100x32xf32, #tpu.memory_space<vmem>>, vector<1x2x16xf32>,
    %349 = vector.extract_strided_slice %340 {offsets = [0, 2, 0], sizes = [1, 1, 16], strides = [1, 1, 1]} : vector<1x50x16xf32> to vector<1x1x16xf32>
    %350 = vector.shape_cast %349 : vector<1x1x16xf32> to vector<1x1x16xf32>
    %351 = vector.broadcast %350 : vector<1x1x16xf32> to vector<1x2x16xf32>
    %c0_281 = arith.constant 0 : index
    %c4_282 = arith.constant 4 : index
    %c0_283 = arith.constant 0 : index
    %352 = vector.load %arg27[%c0_281, %c4_282, %c0_283] : memref<1x100x32xf32, #tpu.memory_space<vmem>>, vector<1x2x16xf32>
    tpu.vector_store %arg27[%c0_281, %c4_282, %c0_283], %351 {strides = array<i32>} : memref<1x100x32xf32, #tpu.memory_space<vmem>>, vector<1x2x16xf32>,
    %353 = vector.extract_strided_slice %340 {offsets = [0, 3, 0], sizes = [1, 1, 16], strides = [1, 1, 1]} : vector<1x50x16xf32> to vector<1x1x16xf32>
    %354 = vector.shape_cast %353 : vector<1x1x16xf32> to vector<1x1x16xf32>
    %355 = vector.broadcast %354 : vector<1x1x16xf32> to vector<1x2x16xf32>
    %c0_284 = arith.constant 0 : index
    %c6_285 = arith.constant 6 : index
    %c0_286 = arith.constant 0 : index
    %356 = vector.load %arg27[%c0_284, %c6_285, %c0_286] : memref<1x100x32xf32, #tpu.memory_space<vmem>>, vector<1x2x16xf32>
    tpu.vector_store %arg27[%c0_284, %c6_285, %c0_286], %355 {strides = array<i32>} : memref<1x100x32xf32, #tpu.memory_space<vmem>>, vector<1x2x16xf32>,
    %357 = vector.extract_strided_slice %340 {offsets = [0, 4, 0], sizes = [1, 1, 16], strides = [1, 1, 1]} : vector<1x50x16xf32> to vector<1x1x16xf32>
    %358 = vector.shape_cast %357 : vector<1x1x16xf32> to vector<1x1x16xf32>
    %359 = vector.broadcast %358 : vector<1x1x16xf32> to vector<1x2x16xf32>
    %c0_287 = arith.constant 0 : index
    %c8_288 = arith.constant 8 : index
    %c0_289 = arith.constant 0 : index
    %360 = vector.load %arg27[%c0_287, %c8_288, %c0_289] : memref<1x100x32xf32, #tpu.memory_space<vmem>>, vector<1x2x16xf32>
    tpu.vector_store %arg27[%c0_287, %c8_288, %c0_289], %359 {strides = array<i32>} : memref<1x100x32xf32, #tpu.memory_space<vmem>>, vector<1x2x16xf32>,
    %361 = vector.extract_strided_slice %340 {offsets = [0, 5, 0], sizes = [1, 1, 16], strides = [1, 1, 1]} : vector<1x50x16xf32> to vector<1x1x16xf32>
    %362 = vector.shape_cast %361 : vector<1x1x16xf32> to vector<1x1x16xf32>
    %363 = vector.broadcast %362 : vector<1x1x16xf32> to vector<1x2x16xf32>
    %c0_290 = arith.constant 0 : index
    %c10_291 = arith.constant 10 : index
    %c0_292 = arith.constant 0 : index
    %364 = vector.load %arg27[%c0_290, %c10_291, %c0_292] : memref<1x100x32xf32, #tpu.memory_space<vmem>>, vector<1x2x16xf32>
    tpu.vector_store %arg27[%c0_290, %c10_291, %c0_292], %363 {strides = array<i32>} : memref<1x100x32xf32, #tpu.memory_space<vmem>>, vector<1x2x16xf32>,
    %365 = vector.extract_strided_slice %340 {offsets = [0, 6, 0], sizes = [1, 1, 16], strides = [1, 1, 1]} : vector<1x50x16xf32> to vector<1x1x16xf32>
    %366 = vector.shape_cast %365 : vector<1x1x16xf32> to vector<1x1x16xf32>
    %367 = vector.broadcast %366 : vector<1x1x16xf32> to vector<1x2x16xf32>
    %c0_293 = arith.constant 0 : index
    %c12_294 = arith.constant 12 : index
    %c0_295 = arith.constant 0 : index
    %368 = vector.load %arg27[%c0_293, %c12_294, %c0_295] : memref<1x100x32xf32, #tpu.memory_space<vmem>>, vector<1x2x16xf32>
    tpu.vector_store %arg27[%c0_293, %c12_294, %c0_295], %367 {strides = array<i32>} : memref<1x100x32xf32, #tpu.memory_space<vmem>>, vector<1x2x16xf32>,
    %369 = vector.extract_strided_slice %340 {offsets = [0, 7, 0], sizes = [1, 1, 16], strides = [1, 1, 1]} : vector<1x50x16xf32> to vector<1x1x16xf32>
    %370 = vector.shape_cast %369 : vector<1x1x16xf32> to vector<1x1x16xf32>
    %371 = vector.broadcast %370 : vector<1x1x16xf32> to vector<1x2x16xf32>
    %c0_296 = arith.constant 0 : index
    %c14_297 = arith.constant 14 : index
    %c0_298 = arith.constant 0 : index
    %372 = vector.load %arg27[%c0_296, %c14_297, %c0_298] : memref<1x100x32xf32, #tpu.memory_space<vmem>>, vector<1x2x16xf32>
    tpu.vector_store %arg27[%c0_296, %c14_297, %c0_298], %371 {strides = array<i32>} : memref<1x100x32xf32, #tpu.memory_space<vmem>>, vector<1x2x16xf32>,
    %373 = vector.extract_strided_slice %340 {offsets = [0, 8, 0], sizes = [1, 1, 16], strides = [1, 1, 1]} : vector<1x50x16xf32> to vector<1x1x16xf32>
    %374 = vector.shape_cast %373 : vector<1x1x16xf32> to vector<1x1x16xf32>
    %375 = vector.broadcast %374 : vector<1x1x16xf32> to vector<1x2x16xf32>
    %c0_299 = arith.constant 0 : index
    %c16_300 = arith.constant 16 : index
    %c0_301 = arith.constant 0 : index
    %376 = vector.load %arg27[%c0_299, %c16_300, %c0_301] : memref<1x100x32xf32, #tpu.memory_space<vmem>>, vector<1x2x16xf32>
    tpu.vector_store %arg27[%c0_299, %c16_300, %c0_301], %375 {strides = array<i32>} : memref<1x100x32xf32, #tpu.memory_space<vmem>>, vector<1x2x16xf32>,
    %377 = vector.extract_strided_slice %340 {offsets = [0, 9, 0], sizes = [1, 1, 16], strides = [1, 1, 1]} : vector<1x50x16xf32> to vector<1x1x16xf32>
    %378 = vector.shape_cast %377 : vector<1x1x16xf32> to vector<1x1x16xf32>
    %379 = vector.broadcast %378 : vector<1x1x16xf32> to vector<1x2x16xf32>
    %c0_302 = arith.constant 0 : index
    %c18_303 = arith.constant 18 : index
    %c0_304 = arith.constant 0 : index
    %380 = vector.load %arg27[%c0_302, %c18_303, %c0_304] : memref<1x100x32xf32, #tpu.memory_space<vmem>>, vector<1x2x16xf32>
    tpu.vector_store %arg27[%c0_302, %c18_303, %c0_304], %379 {strides = array<i32>} : memref<1x100x32xf32, #tpu.memory_space<vmem>>, vector<1x2x16xf32>,
    %381 = vector.extract_strided_slice %340 {offsets = [0, 10, 0], sizes = [1, 1, 16], strides = [1, 1, 1]} : vector<1x50x16xf32> to vector<1x1x16xf32>
    %382 = vector.shape_cast %381 : vector<1x1x16xf32> to vector<1x1x16xf32>
    %383 = vector.broadcast %382 : vector<1x1x16xf32> to vector<1x2x16xf32>
    %c0_305 = arith.constant 0 : index
    %c20_306 = arith.constant 20 : index
    %c0_307 = arith.constant 0 : index
    %384 = vector.load %arg27[%c0_305, %c20_306, %c0_307] : memref<1x100x32xf32, #tpu.memory_space<vmem>>, vector<1x2x16xf32>
    tpu.vector_store %arg27[%c0_305, %c20_306, %c0_307], %383 {strides = array<i32>} : memref<1x100x32xf32, #tpu.memory_space<vmem>>, vector<1x2x16xf32>,
    %385 = vector.extract_strided_slice %340 {offsets = [0, 11, 0], sizes = [1, 1, 16], strides = [1, 1, 1]} : vector<1x50x16xf32> to vector<1x1x16xf32>
    %386 = vector.shape_cast %385 : vector<1x1x16xf32> to vector<1x1x16xf32>
    %387 = vector.broadcast %386 : vector<1x1x16xf32> to vector<1x2x16xf32>
    %c0_308 = arith.constant 0 : index
    %c22_309 = arith.constant 22 : index
    %c0_310 = arith.constant 0 : index
    %388 = vector.load %arg27[%c0_308, %c22_309, %c0_310] : memref<1x100x32xf32, #tpu.memory_space<vmem>>, vector<1x2x16xf32>
    tpu.vector_store %arg27[%c0_308, %c22_309, %c0_310], %387 {strides = array<i32>} : memref<1x100x32xf32, #tpu.memory_space<vmem>>, vector<1x2x16xf32>,
    %389 = vector.extract_strided_slice %340 {offsets = [0, 12, 0], sizes = [1, 1, 16], strides = [1, 1, 1]} : vector<1x50x16xf32> to vector<1x1x16xf32>
    %390 = vector.shape_cast %389 : vector<1x1x16xf32> to vector<1x1x16xf32>
    %391 = vector.broadcast %390 : vector<1x1x16xf32> to vector<1x2x16xf32>
    %c0_311 = arith.constant 0 : index
    %c24_312 = arith.constant 24 : index
    %c0_313 = arith.constant 0 : index
    %392 = vector.load %arg27[%c0_311, %c24_312, %c0_313] : memref<1x100x32xf32, #tpu.memory_space<vmem>>, vector<1x2x16xf32>
    tpu.vector_store %arg27[%c0_311, %c24_312, %c0_313], %391 {strides = array<i32>} : memref<1x100x32xf32, #tpu.memory_space<vmem>>, vector<1x2x16xf32>,
    %393 = vector.extract_strided_slice %340 {offsets = [0, 13, 0], sizes = [1, 1, 16], strides = [1, 1, 1]} : vector<1x50x16xf32> to vector<1x1x16xf32>
    %394 = vector.shape_cast %393 : vector<1x1x16xf32> to vector<1x1x16xf32>
    %395 = vector.broadcast %394 : vector<1x1x16xf32> to vector<1x2x16xf32>
    %c0_314 = arith.constant 0 : index
    %c26_315 = arith.constant 26 : index
    %c0_316 = arith.constant 0 : index
    %396 = vector.load %arg27[%c0_314, %c26_315, %c0_316] : memref<1x100x32xf32, #tpu.memory_space<vmem>>, vector<1x2x16xf32>
    tpu.vector_store %arg27[%c0_314, %c26_315, %c0_316], %395 {strides = array<i32>} : memref<1x100x32xf32, #tpu.memory_space<vmem>>, vector<1x2x16xf32>,
    %397 = vector.extract_strided_slice %340 {offsets = [0, 14, 0], sizes = [1, 1, 16], strides = [1, 1, 1]} : vector<1x50x16xf32> to vector<1x1x16xf32>
    %398 = vector.shape_cast %397 : vector<1x1x16xf32> to vector<1x1x16xf32>
    %399 = vector.broadcast %398 : vector<1x1x16xf32> to vector<1x2x16xf32>
    %c0_317 = arith.constant 0 : index
    %c28_318 = arith.constant 28 : index
    %c0_319 = arith.constant 0 : index
    %400 = vector.load %arg27[%c0_317, %c28_318, %c0_319] : memref<1x100x32xf32, #tpu.memory_space<vmem>>, vector<1x2x16xf32>
    tpu.vector_store %arg27[%c0_317, %c28_318, %c0_319], %399 {strides = array<i32>} : memref<1x100x32xf32, #tpu.memory_space<vmem>>, vector<1x2x16xf32>,
    %401 = vector.extract_strided_slice %340 {offsets = [0, 15, 0], sizes = [1, 1, 16], strides = [1, 1, 1]} : vector<1x50x16xf32> to vector<1x1x16xf32>
    %402 = vector.shape_cast %401 : vector<1x1x16xf32> to vector<1x1x16xf32>
    %403 = vector.broadcast %402 : vector<1x1x16xf32> to vector<1x2x16xf32>
    %c0_320 = arith.constant 0 : index
    %c30_321 = arith.constant 30 : index
    %c0_322 = arith.constant 0 : index
    %404 = vector.load %arg27[%c0_320, %c30_321, %c0_322] : memref<1x100x32xf32, #tpu.memory_space<vmem>>, vector<1x2x16xf32>
    tpu.vector_store %arg27[%c0_320, %c30_321, %c0_322], %403 {strides = array<i32>} : memref<1x100x32xf32, #tpu.memory_space<vmem>>, vector<1x2x16xf32>,
    %405 = vector.extract_strided_slice %340 {offsets = [0, 16, 0], sizes = [1, 1, 16], strides = [1, 1, 1]} : vector<1x50x16xf32> to vector<1x1x16xf32>
    %406 = vector.shape_cast %405 : vector<1x1x16xf32> to vector<1x1x16xf32>
    %407 = vector.broadcast %406 : vector<1x1x16xf32> to vector<1x2x16xf32>
    %c0_323 = arith.constant 0 : index
    %c32_324 = arith.constant 32 : index
    %c0_325 = arith.constant 0 : index
    %408 = vector.load %arg27[%c0_323, %c32_324, %c0_325] : memref<1x100x32xf32, #tpu.memory_space<vmem>>, vector<1x2x16xf32>
    tpu.vector_store %arg27[%c0_323, %c32_324, %c0_325], %407 {strides = array<i32>} : memref<1x100x32xf32, #tpu.memory_space<vmem>>, vector<1x2x16xf32>,
    %409 = vector.extract_strided_slice %340 {offsets = [0, 17, 0], sizes = [1, 1, 16], strides = [1, 1, 1]} : vector<1x50x16xf32> to vector<1x1x16xf32>
    %410 = vector.shape_cast %409 : vector<1x1x16xf32> to vector<1x1x16xf32>
    %411 = vector.broadcast %410 : vector<1x1x16xf32> to vector<1x2x16xf32>
    %c0_326 = arith.constant 0 : index
    %c34_327 = arith.constant 34 : index
    %c0_328 = arith.constant 0 : index
    %412 = vector.load %arg27[%c0_326, %c34_327, %c0_328] : memref<1x100x32xf32, #tpu.memory_space<vmem>>, vector<1x2x16xf32>
    tpu.vector_store %arg27[%c0_326, %c34_327, %c0_328], %411 {strides = array<i32>} : memref<1x100x32xf32, #tpu.memory_space<vmem>>, vector<1x2x16xf32>,
    %413 = vector.extract_strided_slice %340 {offsets = [0, 18, 0], sizes = [1, 1, 16], strides = [1, 1, 1]} : vector<1x50x16xf32> to vector<1x1x16xf32>
    %414 = vector.shape_cast %413 : vector<1x1x16xf32> to vector<1x1x16xf32>
    %415 = vector.broadcast %414 : vector<1x1x16xf32> to vector<1x2x16xf32>
    %c0_329 = arith.constant 0 : index
    %c36_330 = arith.constant 36 : index
    %c0_331 = arith.constant 0 : index
    %416 = vector.load %arg27[%c0_329, %c36_330, %c0_331] : memref<1x100x32xf32, #tpu.memory_space<vmem>>, vector<1x2x16xf32>
    tpu.vector_store %arg27[%c0_329, %c36_330, %c0_331], %415 {strides = array<i32>} : memref<1x100x32xf32, #tpu.memory_space<vmem>>, vector<1x2x16xf32>,
    %417 = vector.extract_strided_slice %340 {offsets = [0, 19, 0], sizes = [1, 1, 16], strides = [1, 1, 1]} : vector<1x50x16xf32> to vector<1x1x16xf32>
    %418 = vector.shape_cast %417 : vector<1x1x16xf32> to vector<1x1x16xf32>
    %419 = vector.broadcast %418 : vector<1x1x16xf32> to vector<1x2x16xf32>
    %c0_332 = arith.constant 0 : index
    %c38_333 = arith.constant 38 : index
    %c0_334 = arith.constant 0 : index
    %420 = vector.load %arg27[%c0_332, %c38_333, %c0_334] : memref<1x100x32xf32, #tpu.memory_space<vmem>>, vector<1x2x16xf32>
    tpu.vector_store %arg27[%c0_332, %c38_333, %c0_334], %419 {strides = array<i32>} : memref<1x100x32xf32, #tpu.memory_space<vmem>>, vector<1x2x16xf32>,
    %421 = vector.extract_strided_slice %340 {offsets = [0, 20, 0], sizes = [1, 1, 16], strides = [1, 1, 1]} : vector<1x50x16xf32> to vector<1x1x16xf32>
    %422 = vector.shape_cast %421 : vector<1x1x16xf32> to vector<1x1x16xf32>
    %423 = vector.broadcast %422 : vector<1x1x16xf32> to vector<1x2x16xf32>
    %c0_335 = arith.constant 0 : index
    %c40_336 = arith.constant 40 : index
    %c0_337 = arith.constant 0 : index
    %424 = vector.load %arg27[%c0_335, %c40_336, %c0_337] : memref<1x100x32xf32, #tpu.memory_space<vmem>>, vector<1x2x16xf32>
    tpu.vector_store %arg27[%c0_335, %c40_336, %c0_337], %423 {strides = array<i32>} : memref<1x100x32xf32, #tpu.memory_space<vmem>>, vector<1x2x16xf32>,
    %425 = vector.extract_strided_slice %340 {offsets = [0, 21, 0], sizes = [1, 1, 16], strides = [1, 1, 1]} : vector<1x50x16xf32> to vector<1x1x16xf32>
    %426 = vector.shape_cast %425 : vector<1x1x16xf32> to vector<1x1x16xf32>
    %427 = vector.broadcast %426 : vector<1x1x16xf32> to vector<1x2x16xf32>
    %c0_338 = arith.constant 0 : index
    %c42_339 = arith.constant 42 : index
    %c0_340 = arith.constant 0 : index
    %428 = vector.load %arg27[%c0_338, %c42_339, %c0_340] : memref<1x100x32xf32, #tpu.memory_space<vmem>>, vector<1x2x16xf32>
    tpu.vector_store %arg27[%c0_338, %c42_339, %c0_340], %427 {strides = array<i32>} : memref<1x100x32xf32, #tpu.memory_space<vmem>>, vector<1x2x16xf32>,
    %429 = vector.extract_strided_slice %340 {offsets = [0, 22, 0], sizes = [1, 1, 16], strides = [1, 1, 1]} : vector<1x50x16xf32> to vector<1x1x16xf32>
    %430 = vector.shape_cast %429 : vector<1x1x16xf32> to vector<1x1x16xf32>
    %431 = vector.broadcast %430 : vector<1x1x16xf32> to vector<1x2x16xf32>
    %c0_341 = arith.constant 0 : index
    %c44_342 = arith.constant 44 : index
    %c0_343 = arith.constant 0 : index
    %432 = vector.load %arg27[%c0_341, %c44_342, %c0_343] : memref<1x100x32xf32, #tpu.memory_space<vmem>>, vector<1x2x16xf32>
    tpu.vector_store %arg27[%c0_341, %c44_342, %c0_343], %431 {strides = array<i32>} : memref<1x100x32xf32, #tpu.memory_space<vmem>>, vector<1x2x16xf32>,
    %433 = vector.extract_strided_slice %340 {offsets = [0, 23, 0], sizes = [1, 1, 16], strides = [1, 1, 1]} : vector<1x50x16xf32> to vector<1x1x16xf32>
    %434 = vector.shape_cast %433 : vector<1x1x16xf32> to vector<1x1x16xf32>
    %435 = vector.broadcast %434 : vector<1x1x16xf32> to vector<1x2x16xf32>
    %c0_344 = arith.constant 0 : index
    %c46_345 = arith.constant 46 : index
    %c0_346 = arith.constant 0 : index
    %436 = vector.load %arg27[%c0_344, %c46_345, %c0_346] : memref<1x100x32xf32, #tpu.memory_space<vmem>>, vector<1x2x16xf32>
    tpu.vector_store %arg27[%c0_344, %c46_345, %c0_346], %435 {strides = array<i32>} : memref<1x100x32xf32, #tpu.memory_space<vmem>>, vector<1x2x16xf32>,
    %437 = vector.extract_strided_slice %340 {offsets = [0, 24, 0], sizes = [1, 1, 16], strides = [1, 1, 1]} : vector<1x50x16xf32> to vector<1x1x16xf32>
    %438 = vector.shape_cast %437 : vector<1x1x16xf32> to vector<1x1x16xf32>
    %439 = vector.broadcast %438 : vector<1x1x16xf32> to vector<1x2x16xf32>
    %c0_347 = arith.constant 0 : index
    %c48_348 = arith.constant 48 : index
    %c0_349 = arith.constant 0 : index
    %440 = vector.load %arg27[%c0_347, %c48_348, %c0_349] : memref<1x100x32xf32, #tpu.memory_space<vmem>>, vector<1x2x16xf32>
    tpu.vector_store %arg27[%c0_347, %c48_348, %c0_349], %439 {strides = array<i32>} : memref<1x100x32xf32, #tpu.memory_space<vmem>>, vector<1x2x16xf32>,
    %441 = vector.extract_strided_slice %340 {offsets = [0, 25, 0], sizes = [1, 1, 16], strides = [1, 1, 1]} : vector<1x50x16xf32> to vector<1x1x16xf32>
    %442 = vector.shape_cast %441 : vector<1x1x16xf32> to vector<1x1x16xf32>
    %443 = vector.broadcast %442 : vector<1x1x16xf32> to vector<1x2x16xf32>
    %c0_350 = arith.constant 0 : index
    %c50 = arith.constant 50 : index
    %c0_351 = arith.constant 0 : index
    %444 = vector.load %arg27[%c0_350, %c50, %c0_351] : memref<1x100x32xf32, #tpu.memory_space<vmem>>, vector<1x2x16xf32>
    tpu.vector_store %arg27[%c0_350, %c50, %c0_351], %443 {strides = array<i32>} : memref<1x100x32xf32, #tpu.memory_space<vmem>>, vector<1x2x16xf32>,
    %445 = vector.extract_strided_slice %340 {offsets = [0, 26, 0], sizes = [1, 1, 16], strides = [1, 1, 1]} : vector<1x50x16xf32> to vector<1x1x16xf32>
    %446 = vector.shape_cast %445 : vector<1x1x16xf32> to vector<1x1x16xf32>
    %447 = vector.broadcast %446 : vector<1x1x16xf32> to vector<1x2x16xf32>
    %c0_352 = arith.constant 0 : index
    %c52 = arith.constant 52 : index
    %c0_353 = arith.constant 0 : index
    %448 = vector.load %arg27[%c0_352, %c52, %c0_353] : memref<1x100x32xf32, #tpu.memory_space<vmem>>, vector<1x2x16xf32>
    tpu.vector_store %arg27[%c0_352, %c52, %c0_353], %447 {strides = array<i32>} : memref<1x100x32xf32, #tpu.memory_space<vmem>>, vector<1x2x16xf32>,
    %449 = vector.extract_strided_slice %340 {offsets = [0, 27, 0], sizes = [1, 1, 16], strides = [1, 1, 1]} : vector<1x50x16xf32> to vector<1x1x16xf32>
    %450 = vector.shape_cast %449 : vector<1x1x16xf32> to vector<1x1x16xf32>
    %451 = vector.broadcast %450 : vector<1x1x16xf32> to vector<1x2x16xf32>
    %c0_354 = arith.constant 0 : index
    %c54 = arith.constant 54 : index
    %c0_355 = arith.constant 0 : index
    %452 = vector.load %arg27[%c0_354, %c54, %c0_355] : memref<1x100x32xf32, #tpu.memory_space<vmem>>, vector<1x2x16xf32>
    tpu.vector_store %arg27[%c0_354, %c54, %c0_355], %451 {strides = array<i32>} : memref<1x100x32xf32, #tpu.memory_space<vmem>>, vector<1x2x16xf32>,
    %453 = vector.extract_strided_slice %340 {offsets = [0, 28, 0], sizes = [1, 1, 16], strides = [1, 1, 1]} : vector<1x50x16xf32> to vector<1x1x16xf32>
    %454 = vector.shape_cast %453 : vector<1x1x16xf32> to vector<1x1x16xf32>
    %455 = vector.broadcast %454 : vector<1x1x16xf32> to vector<1x2x16xf32>
    %c0_356 = arith.constant 0 : index
    %c56 = arith.constant 56 : index
    %c0_357 = arith.constant 0 : index
    %456 = vector.load %arg27[%c0_356, %c56, %c0_357] : memref<1x100x32xf32, #tpu.memory_space<vmem>>, vector<1x2x16xf32>
    tpu.vector_store %arg27[%c0_356, %c56, %c0_357], %455 {strides = array<i32>} : memref<1x100x32xf32, #tpu.memory_space<vmem>>, vector<1x2x16xf32>,
    %457 = vector.extract_strided_slice %340 {offsets = [0, 29, 0], sizes = [1, 1, 16], strides = [1, 1, 1]} : vector<1x50x16xf32> to vector<1x1x16xf32>
    %458 = vector.shape_cast %457 : vector<1x1x16xf32> to vector<1x1x16xf32>
    %459 = vector.broadcast %458 : vector<1x1x16xf32> to vector<1x2x16xf32>
    %c0_358 = arith.constant 0 : index
    %c58 = arith.constant 58 : index
    %c0_359 = arith.constant 0 : index
    %460 = vector.load %arg27[%c0_358, %c58, %c0_359] : memref<1x100x32xf32, #tpu.memory_space<vmem>>, vector<1x2x16xf32>
    tpu.vector_store %arg27[%c0_358, %c58, %c0_359], %459 {strides = array<i32>} : memref<1x100x32xf32, #tpu.memory_space<vmem>>, vector<1x2x16xf32>,
    %461 = vector.extract_strided_slice %340 {offsets = [0, 30, 0], sizes = [1, 1, 16], strides = [1, 1, 1]} : vector<1x50x16xf32> to vector<1x1x16xf32>
    %462 = vector.shape_cast %461 : vector<1x1x16xf32> to vector<1x1x16xf32>
    %463 = vector.broadcast %462 : vector<1x1x16xf32> to vector<1x2x16xf32>
    %c0_360 = arith.constant 0 : index
    %c60 = arith.constant 60 : index
    %c0_361 = arith.constant 0 : index
    %464 = vector.load %arg27[%c0_360, %c60, %c0_361] : memref<1x100x32xf32, #tpu.memory_space<vmem>>, vector<1x2x16xf32>
    tpu.vector_store %arg27[%c0_360, %c60, %c0_361], %463 {strides = array<i32>} : memref<1x100x32xf32, #tpu.memory_space<vmem>>, vector<1x2x16xf32>,
    %465 = vector.extract_strided_slice %340 {offsets = [0, 31, 0], sizes = [1, 1, 16], strides = [1, 1, 1]} : vector<1x50x16xf32> to vector<1x1x16xf32>
    %466 = vector.shape_cast %465 : vector<1x1x16xf32> to vector<1x1x16xf32>
    %467 = vector.broadcast %466 : vector<1x1x16xf32> to vector<1x2x16xf32>
    %c0_362 = arith.constant 0 : index
    %c62 = arith.constant 62 : index
    %c0_363 = arith.constant 0 : index
    %468 = vector.load %arg27[%c0_362, %c62, %c0_363] : memref<1x100x32xf32, #tpu.memory_space<vmem>>, vector<1x2x16xf32>
    tpu.vector_store %arg27[%c0_362, %c62, %c0_363], %467 {strides = array<i32>} : memref<1x100x32xf32, #tpu.memory_space<vmem>>, vector<1x2x16xf32>,
    %469 = vector.extract_strided_slice %340 {offsets = [0, 32, 0], sizes = [1, 1, 16], strides = [1, 1, 1]} : vector<1x50x16xf32> to vector<1x1x16xf32>
    %470 = vector.shape_cast %469 : vector<1x1x16xf32> to vector<1x1x16xf32>
    %471 = vector.broadcast %470 : vector<1x1x16xf32> to vector<1x2x16xf32>
    %c0_364 = arith.constant 0 : index
    %c64_365 = arith.constant 64 : index
    %c0_366 = arith.constant 0 : index
    %472 = vector.load %arg27[%c0_364, %c64_365, %c0_366] : memref<1x100x32xf32, #tpu.memory_space<vmem>>, vector<1x2x16xf32>
    tpu.vector_store %arg27[%c0_364, %c64_365, %c0_366], %471 {strides = array<i32>} : memref<1x100x32xf32, #tpu.memory_space<vmem>>, vector<1x2x16xf32>,
    %473 = vector.extract_strided_slice %340 {offsets = [0, 33, 0], sizes = [1, 1, 16], strides = [1, 1, 1]} : vector<1x50x16xf32> to vector<1x1x16xf32>
    %474 = vector.shape_cast %473 : vector<1x1x16xf32> to vector<1x1x16xf32>
    %475 = vector.broadcast %474 : vector<1x1x16xf32> to vector<1x2x16xf32>
    %c0_367 = arith.constant 0 : index
    %c66 = arith.constant 66 : index
    %c0_368 = arith.constant 0 : index
    %476 = vector.load %arg27[%c0_367, %c66, %c0_368] : memref<1x100x32xf32, #tpu.memory_space<vmem>>, vector<1x2x16xf32>
    tpu.vector_store %arg27[%c0_367, %c66, %c0_368], %475 {strides = array<i32>} : memref<1x100x32xf32, #tpu.memory_space<vmem>>, vector<1x2x16xf32>,
    %477 = vector.extract_strided_slice %340 {offsets = [0, 34, 0], sizes = [1, 1, 16], strides = [1, 1, 1]} : vector<1x50x16xf32> to vector<1x1x16xf32>
    %478 = vector.shape_cast %477 : vector<1x1x16xf32> to vector<1x1x16xf32>
    %479 = vector.broadcast %478 : vector<1x1x16xf32> to vector<1x2x16xf32>
    %c0_369 = arith.constant 0 : index
    %c68 = arith.constant 68 : index
    %c0_370 = arith.constant 0 : index
    %480 = vector.load %arg27[%c0_369, %c68, %c0_370] : memref<1x100x32xf32, #tpu.memory_space<vmem>>, vector<1x2x16xf32>
    tpu.vector_store %arg27[%c0_369, %c68, %c0_370], %479 {strides = array<i32>} : memref<1x100x32xf32, #tpu.memory_space<vmem>>, vector<1x2x16xf32>,
    %481 = vector.extract_strided_slice %340 {offsets = [0, 35, 0], sizes = [1, 1, 16], strides = [1, 1, 1]} : vector<1x50x16xf32> to vector<1x1x16xf32>
    %482 = vector.shape_cast %481 : vector<1x1x16xf32> to vector<1x1x16xf32>
    %483 = vector.broadcast %482 : vector<1x1x16xf32> to vector<1x2x16xf32>
    %c0_371 = arith.constant 0 : index
    %c70 = arith.constant 70 : index
    %c0_372 = arith.constant 0 : index
    %484 = vector.load %arg27[%c0_371, %c70, %c0_372] : memref<1x100x32xf32, #tpu.memory_space<vmem>>, vector<1x2x16xf32>
    tpu.vector_store %arg27[%c0_371, %c70, %c0_372], %483 {strides = array<i32>} : memref<1x100x32xf32, #tpu.memory_space<vmem>>, vector<1x2x16xf32>,
    %485 = vector.extract_strided_slice %340 {offsets = [0, 36, 0], sizes = [1, 1, 16], strides = [1, 1, 1]} : vector<1x50x16xf32> to vector<1x1x16xf32>
    %486 = vector.shape_cast %485 : vector<1x1x16xf32> to vector<1x1x16xf32>
    %487 = vector.broadcast %486 : vector<1x1x16xf32> to vector<1x2x16xf32>
    %c0_373 = arith.constant 0 : index
    %c72 = arith.constant 72 : index
    %c0_374 = arith.constant 0 : index
    %488 = vector.load %arg27[%c0_373, %c72, %c0_374] : memref<1x100x32xf32, #tpu.memory_space<vmem>>, vector<1x2x16xf32>
    tpu.vector_store %arg27[%c0_373, %c72, %c0_374], %487 {strides = array<i32>} : memref<1x100x32xf32, #tpu.memory_space<vmem>>, vector<1x2x16xf32>,
    %489 = vector.extract_strided_slice %340 {offsets = [0, 37, 0], sizes = [1, 1, 16], strides = [1, 1, 1]} : vector<1x50x16xf32> to vector<1x1x16xf32>
    %490 = vector.shape_cast %489 : vector<1x1x16xf32> to vector<1x1x16xf32>
    %491 = vector.broadcast %490 : vector<1x1x16xf32> to vector<1x2x16xf32>
    %c0_375 = arith.constant 0 : index
    %c74 = arith.constant 74 : index
    %c0_376 = arith.constant 0 : index
    %492 = vector.load %arg27[%c0_375, %c74, %c0_376] : memref<1x100x32xf32, #tpu.memory_space<vmem>>, vector<1x2x16xf32>
    tpu.vector_store %arg27[%c0_375, %c74, %c0_376], %491 {strides = array<i32>} : memref<1x100x32xf32, #tpu.memory_space<vmem>>, vector<1x2x16xf32>,
    %493 = vector.extract_strided_slice %340 {offsets = [0, 38, 0], sizes = [1, 1, 16], strides = [1, 1, 1]} : vector<1x50x16xf32> to vector<1x1x16xf32>
    %494 = vector.shape_cast %493 : vector<1x1x16xf32> to vector<1x1x16xf32>
    %495 = vector.broadcast %494 : vector<1x1x16xf32> to vector<1x2x16xf32>
    %c0_377 = arith.constant 0 : index
    %c76 = arith.constant 76 : index
    %c0_378 = arith.constant 0 : index
    %496 = vector.load %arg27[%c0_377, %c76, %c0_378] : memref<1x100x32xf32, #tpu.memory_space<vmem>>, vector<1x2x16xf32>
    tpu.vector_store %arg27[%c0_377, %c76, %c0_378], %495 {strides = array<i32>} : memref<1x100x32xf32, #tpu.memory_space<vmem>>, vector<1x2x16xf32>,
    %497 = vector.extract_strided_slice %340 {offsets = [0, 39, 0], sizes = [1, 1, 16], strides = [1, 1, 1]} : vector<1x50x16xf32> to vector<1x1x16xf32>
    %498 = vector.shape_cast %497 : vector<1x1x16xf32> to vector<1x1x16xf32>
    %499 = vector.broadcast %498 : vector<1x1x16xf32> to vector<1x2x16xf32>
    %c0_379 = arith.constant 0 : index
    %c78 = arith.constant 78 : index
    %c0_380 = arith.constant 0 : index
    %500 = vector.load %arg27[%c0_379, %c78, %c0_380] : memref<1x100x32xf32, #tpu.memory_space<vmem>>, vector<1x2x16xf32>
    tpu.vector_store %arg27[%c0_379, %c78, %c0_380], %499 {strides = array<i32>} : memref<1x100x32xf32, #tpu.memory_space<vmem>>, vector<1x2x16xf32>,
    %501 = vector.extract_strided_slice %340 {offsets = [0, 40, 0], sizes = [1, 1, 16], strides = [1, 1, 1]} : vector<1x50x16xf32> to vector<1x1x16xf32>
    %502 = vector.shape_cast %501 : vector<1x1x16xf32> to vector<1x1x16xf32>
    %503 = vector.broadcast %502 : vector<1x1x16xf32> to vector<1x2x16xf32>
    %c0_381 = arith.constant 0 : index
    %c80 = arith.constant 80 : index
    %c0_382 = arith.constant 0 : index
    %504 = vector.load %arg27[%c0_381, %c80, %c0_382] : memref<1x100x32xf32, #tpu.memory_space<vmem>>, vector<1x2x16xf32>
    tpu.vector_store %arg27[%c0_381, %c80, %c0_382], %503 {strides = array<i32>} : memref<1x100x32xf32, #tpu.memory_space<vmem>>, vector<1x2x16xf32>,
    %505 = vector.extract_strided_slice %340 {offsets = [0, 41, 0], sizes = [1, 1, 16], strides = [1, 1, 1]} : vector<1x50x16xf32> to vector<1x1x16xf32>
    %506 = vector.shape_cast %505 : vector<1x1x16xf32> to vector<1x1x16xf32>
    %507 = vector.broadcast %506 : vector<1x1x16xf32> to vector<1x2x16xf32>
    %c0_383 = arith.constant 0 : index
    %c82 = arith.constant 82 : index
    %c0_384 = arith.constant 0 : index
    %508 = vector.load %arg27[%c0_383, %c82, %c0_384] : memref<1x100x32xf32, #tpu.memory_space<vmem>>, vector<1x2x16xf32>
    tpu.vector_store %arg27[%c0_383, %c82, %c0_384], %507 {strides = array<i32>} : memref<1x100x32xf32, #tpu.memory_space<vmem>>, vector<1x2x16xf32>,
    %509 = vector.extract_strided_slice %340 {offsets = [0, 42, 0], sizes = [1, 1, 16], strides = [1, 1, 1]} : vector<1x50x16xf32> to vector<1x1x16xf32>
    %510 = vector.shape_cast %509 : vector<1x1x16xf32> to vector<1x1x16xf32>
    %511 = vector.broadcast %510 : vector<1x1x16xf32> to vector<1x2x16xf32>
    %c0_385 = arith.constant 0 : index
    %c84 = arith.constant 84 : index
    %c0_386 = arith.constant 0 : index
    %512 = vector.load %arg27[%c0_385, %c84, %c0_386] : memref<1x100x32xf32, #tpu.memory_space<vmem>>, vector<1x2x16xf32>
    tpu.vector_store %arg27[%c0_385, %c84, %c0_386], %511 {strides = array<i32>} : memref<1x100x32xf32, #tpu.memory_space<vmem>>, vector<1x2x16xf32>,
    %513 = vector.extract_strided_slice %340 {offsets = [0, 43, 0], sizes = [1, 1, 16], strides = [1, 1, 1]} : vector<1x50x16xf32> to vector<1x1x16xf32>
    %514 = vector.shape_cast %513 : vector<1x1x16xf32> to vector<1x1x16xf32>
    %515 = vector.broadcast %514 : vector<1x1x16xf32> to vector<1x2x16xf32>
    %c0_387 = arith.constant 0 : index
    %c86 = arith.constant 86 : index
    %c0_388 = arith.constant 0 : index
    %516 = vector.load %arg27[%c0_387, %c86, %c0_388] : memref<1x100x32xf32, #tpu.memory_space<vmem>>, vector<1x2x16xf32>
    tpu.vector_store %arg27[%c0_387, %c86, %c0_388], %515 {strides = array<i32>} : memref<1x100x32xf32, #tpu.memory_space<vmem>>, vector<1x2x16xf32>,
    %517 = vector.extract_strided_slice %340 {offsets = [0, 44, 0], sizes = [1, 1, 16], strides = [1, 1, 1]} : vector<1x50x16xf32> to vector<1x1x16xf32>
    %518 = vector.shape_cast %517 : vector<1x1x16xf32> to vector<1x1x16xf32>
    %519 = vector.broadcast %518 : vector<1x1x16xf32> to vector<1x2x16xf32>
    %c0_389 = arith.constant 0 : index
    %c88 = arith.constant 88 : index
    %c0_390 = arith.constant 0 : index
    %520 = vector.load %arg27[%c0_389, %c88, %c0_390] : memref<1x100x32xf32, #tpu.memory_space<vmem>>, vector<1x2x16xf32>
    tpu.vector_store %arg27[%c0_389, %c88, %c0_390], %519 {strides = array<i32>} : memref<1x100x32xf32, #tpu.memory_space<vmem>>, vector<1x2x16xf32>,
    %521 = vector.extract_strided_slice %340 {offsets = [0, 45, 0], sizes = [1, 1, 16], strides = [1, 1, 1]} : vector<1x50x16xf32> to vector<1x1x16xf32>
    %522 = vector.shape_cast %521 : vector<1x1x16xf32> to vector<1x1x16xf32>
    %523 = vector.broadcast %522 : vector<1x1x16xf32> to vector<1x2x16xf32>
    %c0_391 = arith.constant 0 : index
    %c90 = arith.constant 90 : index
    %c0_392 = arith.constant 0 : index
    %524 = vector.load %arg27[%c0_391, %c90, %c0_392] : memref<1x100x32xf32, #tpu.memory_space<vmem>>, vector<1x2x16xf32>
    tpu.vector_store %arg27[%c0_391, %c90, %c0_392], %523 {strides = array<i32>} : memref<1x100x32xf32, #tpu.memory_space<vmem>>, vector<1x2x16xf32>,
    %525 = vector.extract_strided_slice %340 {offsets = [0, 46, 0], sizes = [1, 1, 16], strides = [1, 1, 1]} : vector<1x50x16xf32> to vector<1x1x16xf32>
    %526 = vector.shape_cast %525 : vector<1x1x16xf32> to vector<1x1x16xf32>
    %527 = vector.broadcast %526 : vector<1x1x16xf32> to vector<1x2x16xf32>
    %c0_393 = arith.constant 0 : index
    %c92 = arith.constant 92 : index
    %c0_394 = arith.constant 0 : index
    %528 = vector.load %arg27[%c0_393, %c92, %c0_394] : memref<1x100x32xf32, #tpu.memory_space<vmem>>, vector<1x2x16xf32>
    tpu.vector_store %arg27[%c0_393, %c92, %c0_394], %527 {strides = array<i32>} : memref<1x100x32xf32, #tpu.memory_space<vmem>>, vector<1x2x16xf32>,
    %529 = vector.extract_strided_slice %340 {offsets = [0, 47, 0], sizes = [1, 1, 16], strides = [1, 1, 1]} : vector<1x50x16xf32> to vector<1x1x16xf32>
    %530 = vector.shape_cast %529 : vector<1x1x16xf32> to vector<1x1x16xf32>
    %531 = vector.broadcast %530 : vector<1x1x16xf32> to vector<1x2x16xf32>
    %c0_395 = arith.constant 0 : index
    %c94 = arith.constant 94 : index
    %c0_396 = arith.constant 0 : index
    %532 = vector.load %arg27[%c0_395, %c94, %c0_396] : memref<1x100x32xf32, #tpu.memory_space<vmem>>, vector<1x2x16xf32>
    tpu.vector_store %arg27[%c0_395, %c94, %c0_396], %531 {strides = array<i32>} : memref<1x100x32xf32, #tpu.memory_space<vmem>>, vector<1x2x16xf32>,
    %533 = vector.extract_strided_slice %340 {offsets = [0, 48, 0], sizes = [1, 1, 16], strides = [1, 1, 1]} : vector<1x50x16xf32> to vector<1x1x16xf32>
    %534 = vector.shape_cast %533 : vector<1x1x16xf32> to vector<1x1x16xf32>
    %535 = vector.broadcast %534 : vector<1x1x16xf32> to vector<1x2x16xf32>
    %c0_397 = arith.constant 0 : index
    %c96 = arith.constant 96 : index
    %c0_398 = arith.constant 0 : index
    %536 = vector.load %arg27[%c0_397, %c96, %c0_398] : memref<1x100x32xf32, #tpu.memory_space<vmem>>, vector<1x2x16xf32>
    tpu.vector_store %arg27[%c0_397, %c96, %c0_398], %535 {strides = array<i32>} : memref<1x100x32xf32, #tpu.memory_space<vmem>>, vector<1x2x16xf32>,
    %537 = vector.extract_strided_slice %340 {offsets = [0, 49, 0], sizes = [1, 1, 16], strides = [1, 1, 1]} : vector<1x50x16xf32> to vector<1x1x16xf32>
    %538 = vector.shape_cast %537 : vector<1x1x16xf32> to vector<1x1x16xf32>
    %539 = vector.broadcast %538 : vector<1x1x16xf32> to vector<1x2x16xf32>
    %c0_399 = arith.constant 0 : index
    %c98 = arith.constant 98 : index
    %c0_400 = arith.constant 0 : index
    %540 = vector.load %arg27[%c0_399, %c98, %c0_400] : memref<1x100x32xf32, #tpu.memory_space<vmem>>, vector<1x2x16xf32>
    tpu.vector_store %arg27[%c0_399, %c98, %c0_400], %539 {strides = array<i32>} : memref<1x100x32xf32, #tpu.memory_space<vmem>>, vector<1x2x16xf32>,
    %c0_401 = arith.constant 0 : index
    %c0_402 = arith.constant 0 : index
    %c0_403 = arith.constant 0 : index
    %541 = vector.load %arg27[%c0_401, %c0_402, %c0_403] : memref<1x100x32xf32, #tpu.memory_space<vmem>>, vector<1x100x16xf32>
    %c0_404 = arith.constant 0 : index
    %c0_405 = arith.constant 0 : index
    %542 = vector.load %arg22[%c0_404, %c0_405] : memref<48x6xf32, #tpu.memory_space<vmem>>, vector<48x6xf32>
    %cst_406 = arith.constant 0.000000e+00 : f32
    %543 = vector.broadcast %cst_406 : f32 to vector<1x1x16xf32>
    %c0_407 = arith.constant 0 : index
    %c0_408 = arith.constant 0 : index
    %c0_409 = arith.constant 0 : index
    %544 = vector.load %arg25[%c0_407, %c0_408, %c0_409] : memref<1x100x96xf32, #tpu.memory_space<vmem>>, vector<1x1x16xf32>
    tpu.vector_store %arg25[%c0_407, %c0_408, %c0_409], %543 {strides = array<i32>} : memref<1x100x96xf32, #tpu.memory_space<vmem>>, vector<1x1x16xf32>,
    %545 = vector.extract_strided_slice %541 {offsets = [0, 0, 0], sizes = [1, 99, 16], strides = [1, 1, 1]} : vector<1x100x16xf32> to vector<1x99x16xf32>
    %c0_410 = arith.constant 0 : index
    %c1_411 = arith.constant 1 : index
    %c0_412 = arith.constant 0 : index
    %546 = vector.load %arg25[%c0_410, %c1_411, %c0_412] : memref<1x100x96xf32, #tpu.memory_space<vmem>>, vector<1x99x16xf32>
    tpu.vector_store %arg25[%c0_410, %c1_411, %c0_412], %545 {strides = array<i32>} : memref<1x100x96xf32, #tpu.memory_space<vmem>>, vector<1x99x16xf32>,
    %c0_413 = arith.constant 0 : index
    %c0_414 = arith.constant 0 : index
    %c16_415 = arith.constant 16 : index
    %547 = vector.load %arg25[%c0_413, %c0_414, %c16_415] : memref<1x100x96xf32, #tpu.memory_space<vmem>>, vector<1x100x16xf32>
    tpu.vector_store %arg25[%c0_413, %c0_414, %c16_415], %541 {strides = array<i32>} : memref<1x100x96xf32, #tpu.memory_space<vmem>>, vector<1x100x16xf32>,
    %548 = vector.extract_strided_slice %541 {offsets = [0, 1, 0], sizes = [1, 99, 16], strides = [1, 1, 1]} : vector<1x100x16xf32> to vector<1x99x16xf32>
    %c0_416 = arith.constant 0 : index
    %c0_417 = arith.constant 0 : index
    %c32_418 = arith.constant 32 : index
    %549 = vector.load %arg25[%c0_416, %c0_417, %c32_418] : memref<1x100x96xf32, #tpu.memory_space<vmem>>, vector<1x99x16xf32>
    tpu.vector_store %arg25[%c0_416, %c0_417, %c32_418], %548 {strides = array<i32>} : memref<1x100x96xf32, #tpu.memory_space<vmem>>, vector<1x99x16xf32>,
    %c0_419 = arith.constant 0 : index
    %c99 = arith.constant 99 : index
    %c32_420 = arith.constant 32 : index
    %550 = vector.load %arg25[%c0_419, %c99, %c32_420] : memref<1x100x96xf32, #tpu.memory_space<vmem>>, vector<1x1x16xf32>
    tpu.vector_store %arg25[%c0_419, %c99, %c32_420], %543 {strides = array<i32>} : memref<1x100x96xf32, #tpu.memory_space<vmem>>, vector<1x1x16xf32>,
    %c0_421 = arith.constant 0 : index
    %c0_422 = arith.constant 0 : index
    %c0_423 = arith.constant 0 : index
    %551 = vector.load %arg25[%c0_421, %c0_422, %c0_423] : memref<1x100x96xf32, #tpu.memory_space<vmem>>, vector<1x100x48xf32>
    %552 = vector.shape_cast %551 : vector<1x100x48xf32> to vector<100x48xf32>
    %cst_424 = arith.constant dense<0.000000e+00> : vector<100x6xf32>
    %553 = tpu.matmul %552, %542, %cst_424 {dimension_numbers = #tpu.dot_dimension_numbers<[1], [0], [0], [1], [0, 0, 1, 1], [], []>} : vector<100x48xf32>, vector<48x6xf32>, vector<100x6xf32> -> vector<100x6xf32>
    %c0_425 = arith.constant 0 : index
    %c0_426 = arith.constant 0 : index
    %554 = vector.load %arg23[%c0_425, %c0_426] : memref<1x6xf32, #tpu.memory_space<vmem>>, vector<1x6xf32>
    %555 = vector.broadcast %554 : vector<1x6xf32> to vector<100x6xf32>
    %556 = arith.addf %553, %555 : vector<100x6xf32>
    %557 = vector.shape_cast %556 : vector<100x6xf32> to vector<1x100x6xf32>
    %c0_427 = arith.constant 0 : index
    %c0_428 = arith.constant 0 : index
    %c0_429 = arith.constant 0 : index
    %558 = vector.load %arg24[%c0_427, %c0_428, %c0_429] : memref<1x100x6xf32, #tpu.memory_space<vmem>>, vector<1x100x6xf32>
    tpu.vector_store %arg24[%c0_427, %c0_428, %c0_429], %557 {strides = array<i32>} : memref<1x100x6xf32, #tpu.memory_space<vmem>>, vector<1x100x6xf32>,
    return
  }
  func.func @transform_0(%arg0: i32) -> (i32, i32, i32) {
    %c0_i32 = arith.constant 0 : i32
    %c0_i32_0 = arith.constant 0 : i32
    %c0_i32_1 = arith.constant 0 : i32
    return %arg0, %c0_i32, %c0_i32_0 : i32, i32, i32
  }
  func.func @transform_1(%arg0: i32) -> (i32, i32) {
    %c0_i32 = arith.constant 0 : i32
    %c0_i32_0 = arith.constant 0 : i32
    %c0_i32_1 = arith.constant 0 : i32
    return %c0_i32, %c0_i32_0 : i32, i32
  }
  func.func @transform_2(%arg0: i32) -> (i32, i32) {
    %c0_i32 = arith.constant 0 : i32
    %c0_i32_0 = arith.constant 0 : i32
    %c0_i32_1 = arith.constant 0 : i32
    return %c0_i32, %c0_i32_0 : i32, i32
  }
  func.func @transform_3(%arg0: i32) -> (i32, i32) {
    %c0_i32 = arith.constant 0 : i32
    %c0_i32_0 = arith.constant 0 : i32
    %c0_i32_1 = arith.constant 0 : i32
    return %c0_i32, %c0_i32_0 : i32, i32
  }
  func.func @transform_4(%arg0: i32) -> (i32, i32) {
    %c0_i32 = arith.constant 0 : i32
    %c0_i32_0 = arith.constant 0 : i32
    %c0_i32_1 = arith.constant 0 : i32
    return %c0_i32, %c0_i32_0 : i32, i32
  }
  func.func @transform_5(%arg0: i32) -> (i32, i32) {
    %c0_i32 = arith.constant 0 : i32
    %c0_i32_0 = arith.constant 0 : i32
    %c0_i32_1 = arith.constant 0 : i32
    return %c0_i32, %c0_i32_0 : i32, i32
  }
  func.func @transform_6(%arg0: i32) -> (i32, i32) {
    %c0_i32 = arith.constant 0 : i32
    %c0_i32_0 = arith.constant 0 : i32
    %c0_i32_1 = arith.constant 0 : i32
    return %c0_i32, %c0_i32_0 : i32, i32
  }
  func.func @transform_7(%arg0: i32) -> (i32, i32, i32) {
    %c0_i32 = arith.constant 0 : i32
    %c0_i32_0 = arith.constant 0 : i32
    %c0_i32_1 = arith.constant 0 : i32
    %c0_i32_2 = arith.constant 0 : i32
    return %c0_i32, %c0_i32_0, %c0_i32_1 : i32, i32, i32
  }
  func.func @transform_8(%arg0: i32) -> (i32, i32) {
    %c0_i32 = arith.constant 0 : i32
    %c0_i32_0 = arith.constant 0 : i32
    %c0_i32_1 = arith.constant 0 : i32
    return %c0_i32, %c0_i32_0 : i32, i32
  }
  func.func @transform_9(%arg0: i32) -> (i32, i32) {
    %c0_i32 = arith.constant 0 : i32
    %c0_i32_0 = arith.constant 0 : i32
    %c0_i32_1 = arith.constant 0 : i32
    return %c0_i32, %c0_i32_0 : i32, i32
  }
  func.func @transform_10(%arg0: i32) -> (i32, i32) {
    %c0_i32 = arith.constant 0 : i32
    %c0_i32_0 = arith.constant 0 : i32
    %c0_i32_1 = arith.constant 0 : i32
    return %c0_i32, %c0_i32_0 : i32, i32
  }
  func.func @transform_11(%arg0: i32) -> (i32, i32) {
    %c0_i32 = arith.constant 0 : i32
    %c0_i32_0 = arith.constant 0 : i32
    %c0_i32_1 = arith.constant 0 : i32
    return %c0_i32, %c0_i32_0 : i32, i32
  }
  func.func @transform_12(%arg0: i32) -> (i32, i32) {
    %c0_i32 = arith.constant 0 : i32
    %c0_i32_0 = arith.constant 0 : i32
    %c0_i32_1 = arith.constant 0 : i32
    return %c0_i32, %c0_i32_0 : i32, i32
  }
  func.func @transform_13(%arg0: i32) -> (i32, i32) {
    %c0_i32 = arith.constant 0 : i32
    %c0_i32_0 = arith.constant 0 : i32
    %c0_i32_1 = arith.constant 0 : i32
    return %c0_i32, %c0_i32_0 : i32, i32
  }
  func.func @transform_14(%arg0: i32) -> (i32, i32) {
    %c0_i32 = arith.constant 0 : i32
    %c0_i32_0 = arith.constant 0 : i32
    %c0_i32_1 = arith.constant 0 : i32
    return %c0_i32, %c0_i32_0 : i32, i32
  }
  func.func @transform_15(%arg0: i32) -> (i32, i32) {
    %c0_i32 = arith.constant 0 : i32
    %c0_i32_0 = arith.constant 0 : i32
    %c0_i32_1 = arith.constant 0 : i32
    return %c0_i32, %c0_i32_0 : i32, i32
  }
  func.func @transform_16(%arg0: i32) -> (i32, i32) {
    %c0_i32 = arith.constant 0 : i32
    %c0_i32_0 = arith.constant 0 : i32
    %c0_i32_1 = arith.constant 0 : i32
    return %c0_i32, %c0_i32_0 : i32, i32
  }
  func.func @transform_17(%arg0: i32) -> (i32, i32) {
    %c0_i32 = arith.constant 0 : i32
    %c0_i32_0 = arith.constant 0 : i32
    %c0_i32_1 = arith.constant 0 : i32
    return %c0_i32, %c0_i32_0 : i32, i32
  }
  func.func @transform_18(%arg0: i32) -> (i32, i32) {
    %c0_i32 = arith.constant 0 : i32
    %c0_i32_0 = arith.constant 0 : i32
    %c0_i32_1 = arith.constant 0 : i32
    return %c0_i32, %c0_i32_0 : i32, i32
  }
  func.func @transform_19(%arg0: i32) -> (i32, i32) {
    %c0_i32 = arith.constant 0 : i32
    %c0_i32_0 = arith.constant 0 : i32
    %c0_i32_1 = arith.constant 0 : i32
    return %c0_i32, %c0_i32_0 : i32, i32
  }
  func.func @transform_20(%arg0: i32) -> (i32, i32) {
    %c0_i32 = arith.constant 0 : i32
    %c0_i32_0 = arith.constant 0 : i32
    %c0_i32_1 = arith.constant 0 : i32
    return %c0_i32, %c0_i32_0 : i32, i32
  }
  func.func @transform_21(%arg0: i32) -> (i32, i32) {
    %c0_i32 = arith.constant 0 : i32
    %c0_i32_0 = arith.constant 0 : i32
    %c0_i32_1 = arith.constant 0 : i32
    return %c0_i32, %c0_i32_0 : i32, i32
  }
  func.func @transform_22(%arg0: i32) -> (i32, i32) {
    %c0_i32 = arith.constant 0 : i32
    %c0_i32_0 = arith.constant 0 : i32
    %c0_i32_1 = arith.constant 0 : i32
    return %c0_i32, %c0_i32_0 : i32, i32
  }
  func.func @transform_23(%arg0: i32) -> (i32, i32, i32) {
    %c0_i32 = arith.constant 0 : i32
    %c0_i32_0 = arith.constant 0 : i32
    %c0_i32_1 = arith.constant 0 : i32
    return %arg0, %c0_i32, %c0_i32_0 : i32, i32, i32
  }
}

</mosaic_0001>

<bundles_post_ra>
// kernel: cnn_autoencoder_forward.1
= control target key start
LH: loop header
LB: loop body
LE: loop exit
PB: predicated region body
PF: predicated region fallthrough
CT: control target
= control target key end

     0   :  { %s5396_s0 = inlined_call_operand.vmem [shape: f32[2,96,6], index: 0, kind: input, shape index: {}]   ;;  %s5397_s1 = inlined_call_operand.vmem [shape: f32[18,16], index: 1, kind: input, shape index: {}]   ;;  %s5398_s2 = inlined_call_operand.vmem [shape: f32[1,16], index: 2, kind: input, shape index: {}]   ;;  %s5399_s3 = inlined_call_operand.vmem [shape: f32[48,32], index: 3, kind: input, shape index: {}]   ;;  %s5400_s4 = inlined_call_operand.vmem [shape: f32[1,32], index: 4, kind: input, shape index: {}]   ;;  %s5401_s5 = inlined_call_operand.vmem [shape: f32[96,64], index: 5, kind: input, shape index: {}]   ;;  %s5402_s6 = inlined_call_operand.vmem [shape: f32[1,64], index: 6, kind: input, shape index: {}]   ;;  %s5403_s7 = inlined_call_operand.vmem [shape: f32[12,64,128], index: 7, kind: input, shape index: {}]   ;;  %s5404_s8 = inlined_call_operand.vmem [shape: f32[1,128], index: 8, kind: input, shape index: {}]   ;;  %s5405_s9 = inlined_call_operand.vmem [shape: f32[128,32], index: 9, kind: input, shape index: {}]   ;;  %s5406_s10 = inlined_call_operand.vmem [shape: f32[1,32], index: 10, kind: input, shape index: {}]   ;;  %s5407_s11 = inlined_call_operand.vmem [shape: f32[32,128], index: 11, kind: input, shape index: {}]   ;;  %s5408_s12 = inlined_call_operand.vmem [shape: f32[1,128], index: 12, kind: input, shape index: {}]   ;;  %s5409_s13 = inlined_call_operand.vmem [shape: f32[128,768], index: 13, kind: input, shape index: {}]   ;;  %s5410_s14 = inlined_call_operand.vmem [shape: f32[1,768], index: 14, kind: input, shape index: {}]   ;;  %s5411_s15 = inlined_call_operand.vmem [shape: f32[64,32], index: 15, kind: input, shape index: {}]   ;;  %s5412_s16 = inlined_call_operand.vmem [shape: f32[64,32], index: 16, kind: input, shape index: {}]   ;;  %s5413_s17 = inlined_call_operand.vmem [shape: f32[64,32], index: 17, kind: input, shape index: {}]   ;;  %s5414_s18 = inlined_call_operand.vmem [shape: f32[1,32], index: 18, kind: input, shape index: {}]   ;;  %s5415_s19 = inlined_call_operand.vmem [shape: f32[96,16], index: 19, kind: input, shape index: {}]   ;;  %s5416_s20 = inlined_call_operand.vmem [shape: f32[1,16], index: 20, kind: input, shape index: {}]   ;;  %s5417_s21 = inlined_call_operand.vmem [shape: f32[48,6], index: 21, kind: input, shape index: {}]   ;;  %s5418_s22 = inlined_call_operand.vmem [shape: f32[1,6], index: 22, kind: input, shape index: {}]   ;;  %s5419_s23 = inlined_call_operand.vmem [shape: f32[2,100,6], index: 23, kind: output, shape index: {}]  }
   0x1   :  { %5432 = sst [smem:[#allocation5_spill]] %s5396_s0 }
   0x2   :  { %5433 = sst [smem:[#allocation6_spill]] %s5397_s1 }
   0x3   :  { %5434 = sst [smem:[#allocation7_spill]] %s5398_s2 }
   0x4   :  { %5435 = sst [smem:[#allocation8_spill]] %s5399_s3 }
   0x5   :  { %5436 = sst [smem:[#allocation9_spill]] %s5400_s4  ;;  %s3896_s4 = smov 0  }
   0x6   :  { %5437 = sst [smem:[#allocation10_spill]] %s5401_s5 }
   0x7   :  { %5438 = sst [smem:[#allocation11_spill]] %s5402_s6 }
   0x8   :  { %5439 = sst [smem:[#allocation12_spill]] %s5403_s7 }
   0x9 LB: > { %s3489_s30 = sadd.s32 4294967295, %s3768_s4   ;;  %p3493_p0 = scmp.ge.s32.totalorder %s3768_s4, 1  ;;  %s3768_s4 = sphi %s3896_s4, %s33_s4  }
   0xa   : > { %p637_p1 = scmp.lt.s32.totalorder %s3768_s4, 3 }
   0xc   : > { %p638_p2 = pnand %p3493_p0, %p637_p1 }
   0xd   : > { %p701_p3 = scmp.lt.s32.totalorder (!%p638_p2), %s3489_s30, 1  ;;  %s5440_s1 = sld [smem:[#allocation5_spill]] (!%p638_p2) }
   0xe   : > { %641 = sbr.rel (%p638_p2) target bundleno = 2366 (0x93e), region = 112  ;;  %s3770_s2 = smov (!%p638_p2), 6  }
   0xf   : > { %s3771_s6 = smov (!%p638_p2), 12   ;;  %s5441_s28 = sld [smem:[#allocation6_spill]] (!%p638_p2) }
  0x10   : > { %s5443_s7 = sld [smem:[#allocation8_spill]] (!%p638_p2)  ;;  %s5428_s0 = smov (!%p638_p2), 64  }
  0x11   : > { %s5444_s3 = sld [smem:[#allocation9_spill]] (!%p638_p2) }
  0x12   : > { %s5445_s5 = sld [smem:[#allocation10_spill]] (!%p638_p2) }
  0x13   : > { %s5452_s30 = smov (!%p701_p3, %s3489_s30), 1  ;;  %vm728_vm0 = vcmask 48128   ;;  %vm740_vm1 = vcmask 47104   ;;  %vm726_vm2 = vcmask 40960   ;;  %v3772_v12 = vmov 0.0   ;;  %s5446_s29 = sld [smem:[#allocation12_spill]] }
  0x14   : > { %s3740_s24 = smul.u32 96, %s5452_s30  ;;  %727 = vst.msk [vmem:[#allocation2] sm:$0x1] %vm726_vm2, %v3772_v12  ;;  %vm790_vm3 = vcmask 97328   ;;  %vm908_vm4 = vcmask 1041408   ;;  %vm839_vm5 = vcmask 146529  }
  0x15   : > { %v725_v14 = vld [vmem:[%s5441_s28 + $0x10] sm:$0x3]  ;;  %v724_v15 = vld [vmem:[%s5441_s28 + $0x8] sm:$0xff]  ;;  %v723_v17 = vld [vmem:[%s5441_s28] sm:$0xff]  ;;  %vm841_vm6 = vcmask 146528   ;;  %vm871_vm7 = vcmask 146432  }
  0x16   : > { %s3910_s26 = scalar_lea.vmem %s5440_s1, %s3740_s24  ;;  %3496 = vmatpush.msk.msra.mxu0 %vm908_vm4, %v725_v14  ;;  %3731 = vmatpush.msk.msra.mxu2 %vm908_vm4, %v725_v14  ;;  %vm1259_vm8 = vcmask 122880   ;;  %vm853_vm9 = vcmask 139360   ;;  %s5442_s1 = sld [smem:[#allocation7_spill]]  ;;  %vm1355_vm10 = vcmask 1041409   ;;  %vm1357_vm11 = vcmask 1042434  }
  0x17   : > { %v711_v0 = vld [vmem:[%s3910_s26] sm:$0xff]  ;;  %v712_v1 = vld [vmem:[%s3910_s26 + $0x8] sm:$0xff]  ;;  %v713_v2 = vld [vmem:[%s3910_s26 + $0x10] sm:$0xff]  ;;  %vm1359_vm12 = vcmask 1043459   ;;  %vm1361_vm13 = vcmask 1044484   ;;  %vm1363_vm14 = vcmask 1045509  }
  0x18   : > { %754 = vrot.lane.b32.xlu0 %v711_v0, %s3770_s2  ;;  %729 = vst.msk [vmem:[#allocation2 + $0x1] sm:$0xff] %vm728_vm0, %v711_v0  ;;  %803 = vrot.lane.b32.xlu1 %v711_v0, %s3771_s6  ;;  %v714_v3 = vld [vmem:[%s3910_s26 + $0x18] sm:$0xff]  ;;  %v715_v4 = vld [vmem:[%s3910_s26 + $0x20] sm:$0xff]  ;;  %vm1365_vm15 = vcmask 1046534   ;;  %vm1409_vm2 = vcmask 130048   ;;  %vm1438_vm4 = vcmask 261248  }
  0x19   : > { %730 = vst.msk [vmem:[#allocation2 + $0x9] sm:$0xff] %vm728_vm0, %v712_v1  ;;  %758 = vrot.lane.b32.xlu2 %v713_v2, %s3770_s2  ;;  %v716_v5 = vld [vmem:[%s3910_s26 + $0x28] sm:$0xff]  ;;  %v717_v6 = vld [vmem:[%s3910_s26 + $0x30] sm:$0xff]  ;;  %v718_v7 = vld [vmem:[%s3910_s26 + $0x38] sm:$0xff]  ;;  %926 = vmatpush.msra.mxu0 %v724_v15  ;;  %s5450_s24 = smov 16  }
  0x1a   : > { %732 = vst.msk [vmem:[#allocation2 + $0x19] sm:$0xff] %vm728_vm0, %v714_v3  ;;  %v719_v8 = vld [vmem:[%s3910_s26 + $0x40] sm:$0xff]  ;;  %v721_v9 = vld [vmem:[%s3910_s26 + $0x50] sm:$0xff]  ;;  %v722_v10 = vld [vmem:[%s3910_s26 + $0x58] sm:$0xff]  ;;  %3732 = vmatpush.msra.mxu2 %v724_v15 }
  0x1b   : > { %733 = vst.msk [vmem:[#allocation2 + $0x21] sm:$0xff] %vm728_vm0, %v715_v4  ;;  %v720_v11 = vld [vmem:[%s3910_s26 + $0x48] sm:$0xff]  ;;  %927 = vmatpush.msra.mxu0 %v723_v17  ;;  %s5424_s26 = smov 16  }
  0x1c   : > { %731 = vst.msk [vmem:[#allocation2 + $0x11] sm:$0xff] %vm728_vm0, %v713_v2  ;;  %3733 = vmatpush.msra.mxu2 %v723_v17  ;;  %v4010_v52 = vld [vmem:[%s5442_s1] ss:$0 sm:$0xff]  ;;  %s5448_s1 = smov 64  }
  0x1d   : > { %734 = vst.msk [vmem:[#allocation2 + $0x29] sm:$0xff] %vm728_vm0, %v716_v5 }
  0x1e   : > { %735 = vst.msk [vmem:[#allocation2 + $0x31] sm:$0xff] %vm728_vm0, %v717_v6 }
  0x1f   : > { %736 = vst.msk [vmem:[#allocation2 + $0x39] sm:$0xff] %vm728_vm0, %v718_v7 }
  0x20   : > { %756 = vrot.lane.b32.xlu0 %v712_v1, %s3770_s2  ;;  %805 = vrot.lane.b32.xlu1 %v712_v1, %s3771_s6  ;;  %737 = vst.msk [vmem:[#allocation2 + $0x41] sm:$0xff] %vm728_vm0, %v719_v8 }
  0x21   : > { %807 = vrot.lane.b32.xlu2 %v713_v2, %s3771_s6  ;;  %739 = vst.msk [vmem:[#allocation2 + $0x51] sm:$0xff] %vm728_vm0, %v721_v9 }
  0x22   : > { %741 = vst.msk [vmem:[#allocation2 + $0x59] sm:$0x7f] %vm740_vm1, %v722_v10  ;;  %vm1367_vm1 = vcmask 1047559  }
  0x23   : > { %738 = vst.msk [vmem:[#allocation2 + $0x49] sm:$0xff] %vm728_vm0, %v720_v11 }
  0x28   : > { %760 = vrot.lane.b32.xlu0 %v714_v3, %s3770_s2  ;;  %809 = vrot.lane.b32.xlu1 %v714_v3, %s3771_s6 }
  0x29   : > { %762 = vrot.lane.b32.xlu2 %v715_v4, %s3770_s2 }
  0x30   : > { %811 = vrot.lane.b32.xlu0 %v715_v4, %s3771_s6  ;;  %764 = vrot.lane.b32.xlu1 %v716_v5, %s3770_s2 }
  0x31   : > { %813 = vrot.lane.b32.xlu2 %v716_v5, %s3771_s6 }
  0x38   : > { %766 = vrot.lane.b32.xlu0 %v717_v6, %s3770_s2  ;;  %815 = vrot.lane.b32.xlu1 %v717_v6, %s3771_s6 }
  0x39   : > { %768 = vrot.lane.b32.xlu2 %v718_v7, %s3770_s2 }
  0x40   : > { %817 = vrot.lane.b32.xlu0 %v718_v7, %s3771_s6  ;;  %770 = vrot.lane.b32.xlu1 %v719_v8, %s3770_s2 }
  0x41   : > { %772 = vrot.lane.b32.xlu2 %v720_v11, %s3770_s2 }
  0x48   : > { %774 = vrot.lane.b32.xlu0 %v721_v9, %s3770_s2  ;;  %819 = vrot.lane.b32.xlu1 %v719_v8, %s3771_s6 }
  0x49   : > { %821 = vrot.lane.b32.xlu2 %v720_v11, %s3771_s6 }
  0x50   : > { %823 = vrot.lane.b32.xlu0 %v721_v9, %s3771_s6  ;;  %776 = vrot.lane.b32.xlu1 %v722_v10, %s3770_s2  ;;  %s5426_s2 = smov 32  }
  0x51   : > { %825 = vrot.lane.b32.xlu2 %v722_v10, %s3771_s6  ;;  %s5449_s6 = smov 32  }
  0x73   : > { %v759_v13 = vpop.permute.xlu2 %758 }
  0x74   : > { %793 = vst.msk [vmem:[#allocation2 + $0x10] sm:$0xff] %vm790_vm3, %v759_v13 }
  0x7b   : > { %v808_v16 = vpop.permute.xlu2 %807 }
  0x83   : > { %v763_v18 = vpop.permute.xlu2 %762 }
  0x84   : > { %795 = vst.msk [vmem:[#allocation2 + $0x20] sm:$0xff] %vm790_vm3, %v763_v18 }
  0x8a   : > { %v755_v19 = vpop.permute.xlu0 %754  ;;  %v804_v20 = vpop.permute.xlu1 %803 }
  0x8b   : > { %791 = vst.msk [vmem:[#allocation2] sm:$0xff] %vm790_vm3, %v755_v19  ;;  %v814_v21 = vpop.permute.xlu2 %813 }
  0x8c   : > { %840 = vst.msk [vmem:[#allocation2 - $0x1] sm:$0xfe] %vm839_vm5, %v804_v20  ;;  %vm1504_vm5 = vcmask 392448  }
  0x92   : > { %v757_v22 = vpop.permute.xlu0 %756  ;;  %v806_v23 = vpop.permute.xlu1 %805 }
  0x93   : > { %792 = vst.msk [vmem:[#allocation2 + $0x8] sm:$0xff] %vm790_vm3, %v757_v22  ;;  %v769_v24 = vpop.permute.xlu2 %768 }
  0x94   : > { %843 = vst.msk [vmem:[#allocation2 + $0xf] sm:$0xff] %vm841_vm6, %v808_v16 }
  0x95   : > { %842 = vst.msk [vmem:[#allocation2 + $0x7] sm:$0xff] %vm841_vm6, %v806_v23 }
  0x96   : > { %798 = vst.msk [vmem:[#allocation2 + $0x38] sm:$0xff] %vm790_vm3, %v769_v24 }
  0x9a   : > { %v761_v25 = vpop.permute.xlu0 %760  ;;  %v810_v26 = vpop.permute.xlu1 %809 }
  0x9b   : > { %794 = vst.msk [vmem:[#allocation2 + $0x18] sm:$0xff] %vm790_vm3, %v761_v25  ;;  %v773_v28 = vpop.permute.xlu2 %772 }
  0x9c   : > { %844 = vst.msk [vmem:[#allocation2 + $0x17] sm:$0xff] %vm841_vm6, %v810_v26  ;;  %v855_v27 = vld [vmem:[#allocation2] sm:$0xff]  ;;  %v856_v31 = vld [vmem:[#allocation2 + $0x8] sm:$0xff] }
  0x9d   : > { %3497 = vmatmul.msk.f32.vlgmr.msra.gmra.mxu0 %vm871_vm7, %v855_v27  ;;  %1260 = vst.msk [vmem:[#allocation2] sm:$0x1] %vm1259_vm8, %v3772_v12 }
  0x9e   : > { %800 = vst.msk [vmem:[#allocation2 + $0x48] sm:$0xff] %vm790_vm3, %v773_v28 }
  0xa2   : > { %v812_v29 = vpop.permute.xlu0 %811  ;;  %v765_v30 = vpop.permute.xlu1 %764 }
  0xa3   : > { %845 = vst.msk [vmem:[#allocation2 + $0x1f] sm:$0xff] %vm841_vm6, %v812_v29  ;;  %v857_v34 = vld [vmem:[#allocation2 + $0x10] sm:$0xff]  ;;  %v822_v35 = vpop.permute.xlu2 %821 }
  0xa4   : > { %796 = vst.msk [vmem:[#allocation2 + $0x28] sm:$0xff] %vm790_vm3, %v765_v30 }
  0xa5   : > { %3498 = vmatmul.msk.f32.gmra.mxu0 %vm871_vm7, %v856_v31  ;;  %846 = vst.msk [vmem:[#allocation2 + $0x27] sm:$0xff] %vm841_vm6, %v814_v21 }
  0xaa   : > { %v767_v32 = vpop.permute.xlu0 %766  ;;  %v816_v33 = vpop.permute.xlu1 %815  ;;  %v858_v38 = vld [vmem:[#allocation2 + $0x18] sm:$0xff] }
  0xab   : > { %797 = vst.msk [vmem:[#allocation2 + $0x30] sm:$0xff] %vm790_vm3, %v767_v32  ;;  %v826_v44 = vpop.permute.xlu2 %825 }
  0xac   : > { %847 = vst.msk [vmem:[#allocation2 + $0x2f] sm:$0xff] %vm841_vm6, %v816_v33  ;;  %v859_v41 = vld [vmem:[#allocation2 + $0x20] sm:$0xff] }
  0xad   : > { %3499 = vmatmul.msk.f32.gmra.mxu0 %vm871_vm7, %v857_v34 }
  0xb2   : > { %v818_v36 = vpop.permute.xlu0 %817  ;;  %v771_v37 = vpop.permute.xlu1 %770 }
  0xb3   : > { %848 = vst.msk [vmem:[#allocation2 + $0x37] sm:$0xff] %vm841_vm6, %v818_v36  ;;  %v860_v45 = vld [vmem:[#allocation2 + $0x28] sm:$0xff] }
  0xb4   : > { %799 = vst.msk [vmem:[#allocation2 + $0x40] sm:$0xff] %vm790_vm3, %v771_v37 }
  0xb5   : > { %3500 = vmatmul.msk.f32.gmra.mxu0 %vm871_vm7, %v858_v38  ;;  %850 = vst.msk [vmem:[#allocation2 + $0x47] sm:$0xff] %vm841_vm6, %v822_v35 }
  0xba   : > { %v775_v39 = vpop.permute.xlu0 %774  ;;  %v820_v40 = vpop.permute.xlu1 %819  ;;  %v861_v47 = vld [vmem:[#allocation2 + $0x30] sm:$0xff] }
  0xbb   : > { %801 = vst.msk [vmem:[#allocation2 + $0x50] sm:$0xff] %vm790_vm3, %v775_v39 }
  0xbc   : > { %849 = vst.msk [vmem:[#allocation2 + $0x3f] sm:$0xff] %vm841_vm6, %v820_v40 }
  0xbd   : > { %3501 = vmatmul.msk.f32.gmra.mxu0 %vm871_vm7, %v859_v41 }
  0xc2   : > { %v824_v42 = vpop.permute.xlu0 %823  ;;  %v777_v43 = vpop.permute.xlu1 %776 }
  0xc3   : > { %851 = vst.msk [vmem:[#allocation2 + $0x4f] sm:$0xff] %vm841_vm6, %v824_v42  ;;  %v862_v49 = vld [vmem:[#allocation2 + $0x38] sm:$0xff]  ;;  %v863_v51 = vld [vmem:[#allocation2 + $0x40] sm:$0xff] }
  0xc4   : > { %802 = vst.msk [vmem:[#allocation2 + $0x58] sm:$0xff] %vm790_vm3, %v777_v43  ;;  %vm1415_vm3 = vcmask 129024  }
  0xc5   : > { %3502 = vmatmul.msk.f32.gmra.mxu0 %vm871_vm7, %v860_v45  ;;  %854 = vst.msk [vmem:[#allocation2 + $0x5f] sm:$0x1] %vm853_vm9, %v3772_v12  ;;  %vm1510_vm9 = vcmask 391424  }
  0xc6   : > { %852 = vst.msk [vmem:[#allocation2 + $0x57] sm:$0xff] %vm841_vm6, %v826_v44  ;;  %vm1524_vm6 = vcmask 392192  }
  0xca   : > { %v864_v46 = vld [vmem:[#allocation2 + $0x48] sm:$0xff] }
  0xcb   : > { %3506 = vmatmul.msk.f32.vlgmr.msra.gmra.mxu2 %vm871_vm7, %v864_v46 }
  0xcd   : > { %3503 = vmatmul.msk.f32.gmra.mxu0 %vm871_vm7, %v861_v47  ;;  %v865_v48 = vld [vmem:[#allocation2 + $0x50] sm:$0xff]  ;;  %v866_v50 = vld [vmem:[#allocation2 + $0x58] sm:$0xff] }
  0xd3   : > { %3507 = vmatmul.msk.f32.gmra.mxu2 %vm871_vm7, %v865_v48 }
  0xd5   : > { %3504 = vmatmul.msk.f32.gmra.mxu0 %vm871_vm7, %v862_v49 }
  0xdb   : > { %3508 = vmatmul.msk.f32.gmra.mxu2 %vm871_vm7, %v866_v50 }
  0xdd   : > { %3505 = vmatmul.msk.f32.gmra.mxu0 %vm871_vm7, %v863_v51  ;;  %vm1734_vm7 = vcmask 253952  }
 0x11a   : > { %v929_v53 = vpop.f32.mrf.mxu0 }
 0x11b   : > { %v930_v54 = vadd.f32 %v4010_v52, %v929_v53 }
 0x11d   : > { %v965_v55 = vmax.f32 %v930_v54, 0.0 }
 0x11f   : > { %v989_v56 = vrot.slane %v965_v55, 2  ;;  %v990_v57 = vrot.slane %v965_v55, 4  ;;  %v991_v58 = vrot.slane %v965_v55, 6  ;;  %v3509_v59 = vrot.slane %v965_v55, 9 }
 0x121   : > { %v3510_v60 = vrot.slane %v989_v56, 9  ;;  %v3511_v61 = vrot.slane %v990_v57, 9  ;;  %v3512_v62 = vrot.slane %v991_v58, 9  ;;  %v1205_v63 = vmax.f32 %v965_v55, %v3509_v59 }
 0x122   : > { %v932_v0 = vpop.f32.mrf.mxu0 }
 0x123   : > { %v1206_v1 = vmax.f32 %v989_v56, %v3510_v60  ;;  %v1207_v2 = vmax.f32 %v990_v57, %v3511_v61  ;;  %v933_v3 = vadd.f32 %v4010_v52, %v932_v0  ;;  %v1208_v4 = vmax.f32 %v991_v58, %v3512_v62 }
 0x124   : > { %v1308_v5 = vperm.slane %v1205_v63, 0 }
 0x125   : > { %v1309_v6 = vperm.slane %v1206_v1, 0  ;;  %v1310_v7 = vperm.slane %v1207_v2, 0  ;;  %v966_v8 = vmax.f32 %v933_v3, 0.0  ;;  %v1311_v15 = vperm.slane %v1208_v4, 0 }
 0x127   : > { %v1356_v9 = vsel %vm1355_vm10, %v1309_v6, %v1308_v5  ;;  %v3513_v10 = vrot.slane %v966_v8, 9  ;;  %v992_v11 = vrot.slane %v966_v8, 2  ;;  %v993_v13 = vrot.slane %v966_v8, 4 }
 0x128   : > { %v994_v14 = vrot.slane %v966_v8, 6  ;;  %v1358_v16 = vsel %vm1357_vm11, %v1310_v7, %v1356_v9  ;;  %v1445_v23 = vsel %vm1355_vm10, %v1310_v7, %v1309_v6 }
 0x129   : > { %v3514_v18 = vrot.slane %v992_v11, 9  ;;  %v3515_v19 = vrot.slane %v993_v13, 9  ;;  %v1209_v21 = vmax.f32 %v966_v8, %v3513_v10  ;;  %v1360_v29 = vsel %vm1359_vm12, %v1311_v15, %v1358_v16 }
 0x12a   : > { %v935_v17 = vpop.f32.mrf.mxu0  ;;  %v3516_v20 = vrot.slane %v994_v14, 9  ;;  %v1446_v33 = vsel %vm1357_vm11, %v1311_v15, %v1445_v23 }
 0x12b   : > { %v936_v22 = vadd.f32 %v4010_v52, %v935_v17  ;;  %v1210_v24 = vmax.f32 %v992_v11, %v3514_v18  ;;  %v1211_v25 = vmax.f32 %v993_v13, %v3515_v19  ;;  %v1312_v27 = vperm.slane %v1209_v21, 0 }
 0x12c   : > { %v1212_v26 = vmax.f32 %v994_v14, %v3516_v20 }
 0x12d   : > { %v967_v28 = vmax.f32 %v936_v22, 0.0  ;;  %v1313_v30 = vperm.slane %v1210_v24, 0  ;;  %v1314_v31 = vperm.slane %v1211_v25, 0  ;;  %v1362_v32 = vsel %vm1361_vm13, %v1312_v27, %v1360_v29 }
 0x12e   : > { %v1315_v38 = vperm.slane %v1212_v26, 0  ;;  %v1447_v40 = vsel %vm1359_vm12, %v1312_v27, %v1446_v33 }
 0x12f   : > { %v995_v34 = vrot.slane %v967_v28, 2  ;;  %v996_v35 = vrot.slane %v967_v28, 4  ;;  %v997_v36 = vrot.slane %v967_v28, 6  ;;  %v3517_v37 = vrot.slane %v967_v28, 9 }
 0x130   : > { %v1364_v39 = vsel %vm1363_vm14, %v1313_v30, %v1362_v32  ;;  %v1448_v48 = vsel %vm1361_vm13, %v1313_v30, %v1447_v40 }
 0x131   : > { %v3518_v41 = vrot.slane %v995_v34, 9  ;;  %v3519_v42 = vrot.slane %v996_v35, 9  ;;  %v3520_v43 = vrot.slane %v997_v36, 9  ;;  %v1366_v44 = vsel %vm1365_vm15, %v1314_v31, %v1364_v39 }
 0x132   : > { %v938_v45 = vpop.f32.mrf.mxu0  ;;  %v1368_v46 = vsel %vm1367_vm1, %v1315_v38, %v1366_v44  ;;  %v1213_v47 = vmax.f32 %v967_v28, %v3517_v37  ;;  %v1449_v55 = vsel %vm1363_vm14, %v1314_v31, %v1448_v48 }
 0x133   : > { %v1214_v49 = vmax.f32 %v995_v34, %v3518_v41  ;;  %v1215_v50 = vmax.f32 %v996_v35, %v3519_v42  ;;  %v939_v51 = vadd.f32 %v4010_v52, %v938_v45  ;;  %1420 = vrot.lane.b32.xlu0 %v1368_v46, %s5424_s26  ;;  %v1216_v53 = vmax.f32 %v997_v36, %v3520_v43 }
 0x134   : > { %v1316_v54 = vperm.slane %v1213_v47, 0  ;;  %1410 = vst.msk [vmem:[#allocation2 + $0x1] sm:$0xff] %vm1409_vm2, %v1368_v46  ;;  %v1450_v59 = vsel %vm1365_vm15, %v1315_v38, %v1449_v55 }
 0x135   : > { %v1318_v56 = vperm.slane %v1215_v50, 0  ;;  %v968_v57 = vmax.f32 %v939_v51, 0.0  ;;  %v1317_v58 = vperm.slane %v1214_v49, 0  ;;  %v1319_v2 = vperm.slane %v1216_v53, 0 }
 0x136   : > { %v1451_v60 = vsel %vm1367_vm1, %v1316_v54, %v1450_v59 }
 0x137   : > { %v3521_v61 = vrot.slane %v968_v57, 9  ;;  %v1369_v62 = vsel %vm1355_vm10, %v1317_v58, %v1316_v54  ;;  %1486 = vrot.lane.b32.xlu1 %v1451_v60, %s5426_s2  ;;  %v998_v63 = vrot.slane %v968_v57, 2  ;;  %v999_v0 = vrot.slane %v968_v57, 4 }
 0x138   : > { %v1000_v1 = vrot.slane %v968_v57, 6  ;;  %v1370_v3 = vsel %vm1357_vm11, %v1318_v56, %v1369_v62  ;;  %v1452_v7 = vsel %vm1355_vm10, %v1318_v56, %v1317_v58 }
 0x139   : > { %v3522_v4 = vrot.slane %v998_v63, 9  ;;  %v3523_v5 = vrot.slane %v999_v0, 9  ;;  %v1217_v6 = vmax.f32 %v968_v57, %v3521_v61  ;;  %v1371_v16 = vsel %vm1359_vm12, %v1319_v2, %v1370_v3 }
 0x13a   : > { %v941_v8 = vpop.f32.mrf.mxu0  ;;  %v3524_v9 = vrot.slane %v1000_v1, 9  ;;  %v1453_v17 = vsel %vm1357_vm11, %v1319_v2, %v1452_v7 }
 0x13b   : > { %v942_v10 = vadd.f32 %v4010_v52, %v941_v8  ;;  %v1218_v11 = vmax.f32 %v998_v63, %v3522_v4  ;;  %v1219_v13 = vmax.f32 %v999_v0, %v3523_v5  ;;  %v1320_v14 = vperm.slane %v1217_v6, 0 }
 0x13c   : > { %v1220_v15 = vmax.f32 %v1000_v1, %v3524_v9 }
 0x13d   : > { %v969_v18 = vmax.f32 %v942_v10, 0.0  ;;  %v1321_v19 = vperm.slane %v1218_v11, 0  ;;  %v1322_v20 = vperm.slane %v1219_v13, 0  ;;  %v1372_v21 = vsel %vm1361_vm13, %v1320_v14, %v1371_v16 }
 0x13e   : > { %v1323_v22 = vperm.slane %v1220_v15, 0  ;;  %v1454_v23 = vsel %vm1359_vm12, %v1320_v14, %v1453_v17 }
 0x13f   : > { %v1001_v24 = vrot.slane %v969_v18, 2  ;;  %v1002_v25 = vrot.slane %v969_v18, 4  ;;  %v1003_v26 = vrot.slane %v969_v18, 6  ;;  %v1373_v27 = vsel %vm1363_vm14, %v1321_v19, %v1372_v21 }
 0x140   : > { %v1374_v28 = vsel %vm1365_vm15, %v1322_v20, %v1373_v27  ;;  %v3525_v29 = vrot.slane %v969_v18, 9  ;;  %v1455_v30 = vsel %vm1361_vm13, %v1321_v19, %v1454_v23 }
 0x141   : > { %v3526_v31 = vrot.slane %v1001_v24, 9  ;;  %v3527_v32 = vrot.slane %v1002_v25, 9  ;;  %v3528_v33 = vrot.slane %v1003_v26, 9  ;;  %v1375_v34 = vsel %vm1367_vm1, %v1323_v22, %v1374_v28 }
 0x142   : > { %v944_v35 = vpop.f32.mrf.mxu0  ;;  %1422 = vrot.lane.b32.xlu2 %v1375_v34, %s5424_s26  ;;  %v1221_v36 = vmax.f32 %v969_v18, %v3525_v29  ;;  %v1456_v37 = vsel %vm1363_vm14, %v1322_v20, %v1455_v30  ;;  %1411 = vst.msk [vmem:[#allocation2 + $0x9] sm:$0xff] %vm1409_vm2, %v1375_v34 }
 0x143   : > { %v1222_v38 = vmax.f32 %v1001_v24, %v3526_v31  ;;  %v1223_v39 = vmax.f32 %v1002_v25, %v3527_v32  ;;  %v945_v40 = vadd.f32 %v4010_v52, %v944_v35  ;;  %v1224_v41 = vmax.f32 %v1003_v26, %v3528_v33 }
 0x144   : > { %v1324_v42 = vperm.slane %v1221_v36, 0  ;;  %v1457_v46 = vsel %vm1365_vm15, %v1323_v22, %v1456_v37 }
 0x145   : > { %v1326_v43 = vperm.slane %v1223_v39, 0  ;;  %v970_v44 = vmax.f32 %v945_v40, 0.0  ;;  %v1325_v45 = vperm.slane %v1222_v38, 0  ;;  %v1327_v54 = vperm.slane %v1224_v41, 0 }
 0x146   : > { %v1458_v47 = vsel %vm1367_vm1, %v1324_v42, %v1457_v46 }
 0x147   : > { %v3529_v48 = vrot.slane %v970_v44, 9  ;;  %v1376_v49 = vsel %vm1355_vm10, %v1325_v45, %v1324_v42  ;;  %1488 = vrot.lane.b32.xlu0 %v1458_v47, %s5426_s2  ;;  %v1004_v50 = vrot.slane %v970_v44, 2  ;;  %v1005_v51 = vrot.slane %v970_v44, 4 }
 0x148   : > { %v1006_v53 = vrot.slane %v970_v44, 6  ;;  %v1377_v58 = vsel %vm1357_vm11, %v1326_v43, %v1376_v49  ;;  %v1459_v61 = vsel %vm1355_vm10, %v1326_v43, %v1325_v45 }
 0x149   : > { %v3530_v55 = vrot.slane %v1004_v50, 9  ;;  %v3531_v56 = vrot.slane %v1005_v51, 9  ;;  %v1225_v57 = vmax.f32 %v970_v44, %v3529_v48  ;;  %v1378_v2 = vsel %vm1359_vm12, %v1327_v54, %v1377_v58 }
 0x14a   : > { %v947_v59 = vpop.f32.mrf.mxu0  ;;  %v3532_v60 = vrot.slane %v1006_v53, 9  ;;  %v1460_v6 = vsel %vm1357_vm11, %v1327_v54, %v1459_v61 }
 0x14b   : > { %v948_v62 = vadd.f32 %v4010_v52, %v947_v59  ;;  %v1226_v63 = vmax.f32 %v1004_v50, %v3530_v55  ;;  %v1227_v0 = vmax.f32 %v1005_v51, %v3531_v56  ;;  %v1328_v1 = vperm.slane %v1225_v57, 0 }
 0x14c   : > { %v1228_v8 = vmax.f32 %v1006_v53, %v3532_v60 }
 0x14d   : > { %v971_v3 = vmax.f32 %v948_v62, 0.0  ;;  %v1329_v4 = vperm.slane %v1226_v63, 0  ;;  %v1379_v5 = vsel %vm1361_vm13, %v1328_v1, %v1378_v2  ;;  %v1330_v9 = vperm.slane %v1227_v0, 0 }
 0x14e   : > { %v956_v7 = vpop.f32.mrf.mxu2  ;;  %v1461_v10 = vsel %vm1359_vm12, %v1328_v1, %v1460_v6  ;;  %v1331_v24 = vperm.slane %v1228_v8, 0 }
 0x14f   : > { %v1007_v11 = vrot.slane %v971_v3, 2  ;;  %v1008_v13 = vrot.slane %v971_v3, 4  ;;  %v1009_v14 = vrot.slane %v971_v3, 6  ;;  %v957_v15 = vadd.f32 %v4010_v52, %v956_v7 }
 0x150   : > { %v1380_v16 = vsel %vm1363_vm14, %v1329_v4, %v1379_v5  ;;  %v3533_v17 = vrot.slane %v971_v3, 9  ;;  %v1462_v18 = vsel %vm1361_vm13, %v1329_v4, %v1461_v10 }
 0x151   : > { %v3534_v19 = vrot.slane %v1007_v11, 9  ;;  %v3535_v20 = vrot.slane %v1008_v13, 9  ;;  %v3536_v21 = vrot.slane %v1009_v14, 9  ;;  %v4063_v22 = vmax.f32 %v957_v15, 0.0 }
 0x152   : > { %v950_v23 = vpop.f32.mrf.mxu0  ;;  %v1381_v25 = vsel %vm1365_vm15, %v1330_v9, %v1380_v16  ;;  %v1229_v26 = vmax.f32 %v971_v3, %v3533_v17  ;;  %v1463_v27 = vsel %vm1363_vm14, %v1330_v9, %v1462_v18 }
 0x153   : > { %v1230_v28 = vmax.f32 %v1007_v11, %v3534_v19  ;;  %v1231_v29 = vmax.f32 %v1008_v13, %v3535_v20  ;;  %v1232_v30 = vmax.f32 %v1009_v14, %v3536_v21  ;;  %v3545_v31 = vrot.slane %v4063_v22, 9 }
 0x154   : > { %v951_v32 = vadd.f32 %v4010_v52, %v950_v23  ;;  %v1382_v33 = vsel %vm1367_vm1, %v1331_v24, %v1381_v25  ;;  %v1332_v34 = vperm.slane %v1229_v26, 0  ;;  %v1464_v35 = vsel %vm1365_vm15, %v1331_v24, %v1463_v27 }
 0x155   : > { %v1334_v36 = vperm.slane %v1231_v29, 0  ;;  %1412 = vst.msk [vmem:[#allocation2 + $0x11] sm:$0xff] %vm1409_vm2, %v1382_v33  ;;  %1424 = vrot.lane.b32.xlu1 %v1382_v33, %s5424_s26  ;;  %v1333_v37 = vperm.slane %v1230_v28, 0  ;;  %v1335_v38 = vperm.slane %v1232_v30, 0  ;;  %v1016_v39 = vrot.slane %v4063_v22, 2 }
 0x156   : > { %v972_v40 = vmax.f32 %v951_v32, 0.0  ;;  %v1465_v41 = vsel %vm1367_vm1, %v1332_v34, %v1464_v35  ;;  %v959_v42 = vpop.f32.mrf.mxu2  ;;  %v1017_v43 = vrot.slane %v4063_v22, 4  ;;  %v1018_v44 = vrot.slane %v4063_v22, 6 }
 0x157   : > { %v1383_v45 = vsel %vm1355_vm10, %v1333_v37, %v1332_v34  ;;  %1490 = vrot.lane.b32.xlu2 %v1465_v41, %s5426_s2  ;;  %v960_v46 = vadd.f32 %v4010_v52, %v959_v42  ;;  %v1466_v47 = vsel %vm1355_vm10, %v1334_v36, %v1333_v37  ;;  %v4083_v48 = vrot.slane %v1016_v39, 9 }
 0x158   : > { %v3537_v49 = vrot.slane %v972_v40, 9  ;;  %v1010_v50 = vrot.slane %v972_v40, 2  ;;  %v1011_v51 = vrot.slane %v972_v40, 4  ;;  %v1012_v53 = vrot.slane %v972_v40, 6 }
 0x159   : > { %v4085_v54 = vmax.f32 %v960_v46, 0.0  ;;  %v1384_v55 = vsel %vm1357_vm11, %v1334_v36, %v1383_v45  ;;  %v1467_v56 = vsel %vm1357_vm11, %v1335_v38, %v1466_v47  ;;  %v3547_v57 = vrot.slane %v1017_v43, 9 }
 0x15a   : > { %v953_v58 = vpop.f32.mrf.mxu0  ;;  %v3538_v59 = vrot.slane %v1010_v50, 9  ;;  %v3539_v60 = vrot.slane %v1011_v51, 9  ;;  %v3540_v61 = vrot.slane %v1012_v53, 9  ;;  %v1233_v62 = vmax.f32 %v972_v40, %v3537_v49 }
 0x15b   : > { %v1019_v63 = vrot.slane %v4085_v54, 2  ;;  %v1020_v0 = vrot.slane %v4085_v54, 4  ;;  %v1021_v1 = vrot.slane %v4085_v54, 6  ;;  %v954_v2 = vadd.f32 %v4010_v52, %v953_v58 }
 0x15c   : > { %v1234_v3 = vmax.f32 %v1010_v50, %v3538_v59  ;;  %v1235_v4 = vmax.f32 %v1011_v51, %v3539_v60  ;;  %v1236_v5 = vmax.f32 %v1012_v53, %v3540_v61  ;;  %v1336_v6 = vperm.slane %v1233_v62, 0 }
 0x15d   : > { %v3550_v7 = vrot.slane %v1019_v63, 9  ;;  %v3551_v8 = vrot.slane %v1020_v0, 9  ;;  %v3552_v9 = vrot.slane %v1021_v1, 9  ;;  %v973_v10 = vmax.f32 %v954_v2, 0.0 }
 0x15e   : > { %v962_v11 = vpop.f32.mrf.mxu2  ;;  %v1337_v13 = vperm.slane %v1234_v3, 0  ;;  %v1338_v14 = vperm.slane %v1235_v4, 0  ;;  %v1339_v15 = vperm.slane %v1236_v5, 0  ;;  %v1385_v16 = vsel %vm1359_vm12, %v1335_v38, %v1384_v55 }
 0x15f   : > { %v4096_v17 = vmax.f32 %v1019_v63, %v3550_v7  ;;  %v4098_v18 = vmax.f32 %v1020_v0, %v3551_v8  ;;  %v4100_v19 = vmax.f32 %v1021_v1, %v3552_v9  ;;  %v1013_v20 = vrot.slane %v973_v10, 2 }
 0x160   : > { %v1014_v21 = vrot.slane %v973_v10, 4  ;;  %v1015_v23 = vrot.slane %v973_v10, 6  ;;  %v963_v24 = vadd.f32 %v4010_v52, %v962_v11  ;;  %v1386_v25 = vsel %vm1361_vm13, %v1336_v6, %v1385_v16 }
 0x161   : > { %v1350_v26 = vperm.slane %v4098_v18, 0  ;;  %v3542_v27 = vrot.slane %v1013_v20, 9  ;;  %v1387_v28 = vsel %vm1363_vm14, %v1337_v13, %v1386_v25  ;;  %v3541_v29 = vrot.slane %v973_v10, 9 }
 0x162   : > { %v3543_v30 = vrot.slane %v1014_v21, 9  ;;  %v3544_v32 = vrot.slane %v1015_v23, 9  ;;  %v976_v33 = vmax.f32 %v963_v24, 0.0  ;;  %v1388_v34 = vsel %vm1365_vm15, %v1338_v14, %v1387_v28 }
 0x163   : > { %v1238_v35 = vmax.f32 %v1013_v20, %v3542_v27  ;;  %v1389_v36 = vsel %vm1367_vm1, %v1339_v15, %v1388_v34  ;;  %v1237_v37 = vmax.f32 %v973_v10, %v3541_v29  ;;  %v1468_v38 = vsel %vm1359_vm12, %v1336_v6, %v1467_v56 }
 0x164   : > { %v1239_v52 = vmax.f32 %v1014_v21, %v3543_v30  ;;  %v1240_v40 = vmax.f32 %v1015_v23, %v3544_v32  ;;  %v3553_v41 = vrot.slane %v976_v33, 9  ;;  %1426 = vrot.lane.b32.xlu0 %v1389_v36, %s5424_s26  ;;  %1413 = vst.msk [vmem:[#allocation2 + $0x19] sm:$0xff] %vm1409_vm2, %v1389_v36  ;;  %v1469_v42 = vsel %vm1361_vm13, %v1337_v13, %v1468_v38 }
 0x165   : > { %v1340_v45 = vperm.slane %v1237_v37, 0  ;;  %v1341_v46 = vperm.slane %v1238_v35, 0  ;;  %v1470_v47 = vsel %vm1363_vm14, %v1338_v14, %v1469_v42  ;;  %v3548_v49 = vrot.slane %v1018_v44, 9  ;;  %v1258_v42 = vld [vmem:[%s5443_s7 + $0x28] sm:$0xff] }
 0x166   : > { %v1342_v50 = vperm.slane %v1239_v52, 0  ;;  %v1471_v51 = vsel %vm1365_vm15, %v1339_v15, %v1470_v47  ;;  %v1241_v53 = vmax.f32 %v4063_v22, %v3545_v31  ;;  %v1242_v55 = vmax.f32 %v1016_v39, %v4083_v48  ;;  %1553 = vmatpush.msra.mxu1 %v1258_v42  ;;  %v1255_v47 = vld [vmem:[%s5443_s7 + $0x10] sm:$0xff] }
 0x167   : > { %v1390_v56 = vsel %vm1355_vm10, %v1341_v46, %v1340_v45  ;;  %v1472_v58 = vsel %vm1367_vm1, %v1340_v45, %v1471_v51  ;;  %v1243_v59 = vmax.f32 %v1017_v43, %v3547_v57  ;;  %v1244_v60 = vmax.f32 %v1018_v44, %v3548_v49  ;;  %v1257_v45 = vld [vmem:[%s5443_s7 + $0x20] sm:$0xff]  ;;  %v1254_v49 = vld [vmem:[%s5443_s7 + $0x8] sm:$0xff] }
 0x168   : > { %1492 = vrot.lane.b32.xlu1 %v1472_v58, %s5426_s2  ;;  %v1343_v61 = vperm.slane %v1240_v40, 0  ;;  %v1344_v62 = vperm.slane %v1241_v53, 0  ;;  %v1345_v63 = vperm.slane %v1242_v55, 0  ;;  %v1391_v31 = vsel %vm1357_vm11, %v1342_v50, %v1390_v56  ;;  %1554 = vmatpush.msra.mxu1 %v1257_v45 }
 0x169   : > { %v1346_v0 = vperm.slane %v1243_v59, 0  ;;  %v1347_v1 = vperm.slane %v1244_v60, 0  ;;  %v3549_v39 = vrot.slane %v4085_v54, 9  ;;  %v1349_v48 = vperm.slane %v4096_v17, 0 }
 0x16a   : > { %v1392_v2 = vsel %vm1359_vm12, %v1343_v61, %v1391_v31  ;;  %v1473_v43 = vsel %vm1355_vm10, %v1342_v50, %v1341_v46  ;;  %v1022_v57 = vrot.slane %v976_v33, 2  ;;  %v1023_v22 = vrot.slane %v976_v33, 4  ;;  %v1256_v46 = vld [vmem:[%s5443_s7 + $0x18] sm:$0xff]  ;;  %v1253_v50 = vld [vmem:[%s5443_s7] sm:$0xff] }
 0x16b   : > { %v1393_v44 = vsel %vm1361_vm13, %v1344_v62, %v1392_v2  ;;  %v1245_v3 = vmax.f32 %v4085_v54, %v3549_v39  ;;  %v1474_v4 = vsel %vm1357_vm11, %v1343_v61, %v1473_v43  ;;  %v1024_v5 = vrot.slane %v976_v33, 6  ;;  %1555 = vmatpush.msra.mxu1 %v1256_v46 }
 0x16c   : > { %v1394_v6 = vsel %vm1363_vm14, %v1345_v63, %v1393_v44  ;;  %v1475_v7 = vsel %vm1359_vm12, %v1344_v62, %v1474_v4  ;;  %v3554_v8 = vrot.slane %v1022_v57, 9  ;;  %v3555_v9 = vrot.slane %v1023_v22, 9 }
 0x16d   : > { %v1395_v10 = vsel %vm1365_vm15, %v1346_v0, %v1394_v6  ;;  %v1348_v11 = vperm.slane %v1245_v3, 0  ;;  %v1476_v13 = vsel %vm1361_vm13, %v1345_v63, %v1475_v7  ;;  %v3556_v14 = vrot.slane %v1024_v5, 9  ;;  %1556 = vmatpush.msra.mxu1 %v1255_v47 }
 0x16e   : > { %v1396_v15 = vsel %vm1367_vm1, %v1347_v1, %v1395_v10  ;;  %v1477_v16 = vsel %vm1363_vm14, %v1346_v0, %v1476_v13  ;;  %v1249_v54 = vmax.f32 %v976_v33, %v3553_v41  ;;  %v1250_v17 = vmax.f32 %v1022_v57, %v3554_v8 }
 0x16f   : > { %1428 = vrot.lane.b32.xlu2 %v1396_v15, %s5424_s26  ;;  %1414 = vst.msk [vmem:[#allocation2 + $0x21] sm:$0xff] %vm1409_vm2, %v1396_v15  ;;  %v1397_v20 = vsel %vm1355_vm10, %v1349_v48, %v1348_v11  ;;  %v1478_v21 = vsel %vm1365_vm15, %v1347_v1, %v1477_v16  ;;  %v1251_v23 = vmax.f32 %v1023_v22, %v3555_v9  ;;  %v1351_v24 = vperm.slane %v4100_v19, 0  ;;  %v4210_v22 = vld [vmem:[%s5444_s3] ss:$0 sm:$0xff]  ;;  %s5447_s3 = sld [smem:[#allocation11_spill]] }
 0x170   : > { %v1479_v25 = vsel %vm1367_vm1, %v1348_v11, %v1478_v21  ;;  %v1252_v27 = vmax.f32 %v1024_v5, %v3556_v14  ;;  %v1352_v28 = vperm.slane %v1249_v54, 0  ;;  %v1353_v29 = vperm.slane %v1250_v17, 0  ;;  %1557 = vmatpush.msra.mxu1 %v1254_v49 }
 0x171   : > { %1494 = vrot.lane.b32.xlu0 %v1479_v25, %s5426_s2  ;;  %v1354_v30 = vperm.slane %v1251_v23, 0  ;;  %v1398_v32 = vsel %vm1357_vm11, %v1350_v26, %v1397_v20  ;;  %v1480_v33 = vsel %vm1355_vm10, %v1350_v26, %v1349_v48 }
 0x172   : > { %v1399_v34 = vsel %vm1359_vm12, %v1351_v24, %v1398_v32  ;;  %v1418_v35 = vperm.slane %v1252_v27, 0  ;;  %v1481_v19 = vsel %vm1357_vm11, %v1351_v24, %v1480_v33  ;;  %1558 = vmatpush.msra.mxu1 %v1253_v50 }
 0x173   : > { %v1400_v36 = vsel %vm1361_vm13, %v1352_v28, %v1399_v34  ;;  %v1482_v37 = vsel %vm1359_vm12, %v1352_v28, %v1481_v19 }
 0x174   : > { %v1401_v38 = vsel %vm1363_vm14, %v1353_v29, %v1400_v36  ;;  %v1483_v52 = vsel %vm1361_vm13, %v1353_v29, %v1482_v37 }
 0x175   : > { %v1402_v40 = vsel %vm1365_vm15, %v1354_v30, %v1401_v38  ;;  %v1484_v18 = vsel %vm1363_vm14, %v1354_v30, %v1483_v52 }
 0x176   : > { %1416 = vst.msk [vmem:[#allocation2 + $0x29] sm:$0x7f] %vm1415_vm3, %v1402_v40  ;;  %v1419_v26 = vsel %vm1367_vm1, %v1418_v35, %v1402_v40  ;;  %v1485_v41 = vsel %vm1365_vm15, %v1418_v35, %v1484_v18  ;;  %vm1512_vm3 = vcmask 385280  }
 0x177   : > { %1430 = vrot.lane.b32.xlu1 %v1419_v26, %s5424_s26  ;;  %1496 = vrot.lane.b32.xlu2 %v1485_v41, %s5426_s2 }
 0x19c   : > { %v1423_v51 = vpop.permute.xlu2 %1422 }
 0x19d   : > { %1440 = vst.msk [vmem:[#allocation2 + $0x8] sm:$0xff] %vm1438_vm4, %v1423_v51 }
 0x1a5   : > { %v1421_v53 = vpop.permute.xlu0 %1420 }
 0x1a6   : > { %1439 = vst.msk [vmem:[#allocation2] sm:$0xff] %vm1438_vm4, %v1421_v53 }
 0x1a9   : > { %v1487_v55 = vpop.permute.xlu1 %1486 }
 0x1aa   : > { %1505 = vst.msk [vmem:[#allocation2] sm:$0xff] %vm1504_vm5, %v1487_v55 }
 0x1b1   : > { %v1514_v56 = vld [vmem:[#allocation2] sm:$0xff]  ;;  %v1491_v59 = vpop.permute.xlu2 %1490 }
 0x1b2   : > { %3557 = vmatmul.msk.f32.vlgmr.msra.gmra.mxu1 %vm1524_vm6, %v1514_v56  ;;  %1735 = vst.msk [vmem:[#allocation2] sm:$0x1] %vm1734_vm7, %v3772_v12 }
 0x1b9   : > { %v1489_v58 = vpop.permute.xlu0 %1488 }
 0x1ba   : > { %1506 = vst.msk [vmem:[#allocation2 + $0x8] sm:$0xff] %vm1504_vm5, %v1489_v58 }
 0x1c1   : > { %v1515_v60 = vld [vmem:[#allocation2 + $0x8] sm:$0xff] }
 0x1c2   : > { %3558 = vmatmul.msk.f32.gmra.mxu1 %vm1524_vm6, %v1515_v60 }
 0x1c7   : > { %v1425_v61 = vpop.permute.xlu1 %1424 }
 0x1c8   : > { %1441 = vst.msk [vmem:[#allocation2 + $0x10] sm:$0xff] %vm1438_vm4, %v1425_v61 }
 0x1c9   : > { %1507 = vst.msk [vmem:[#allocation2 + $0x10] sm:$0xff] %vm1504_vm5, %v1491_v59  ;;  %v1429_v62 = vpop.permute.xlu2 %1428 }
 0x1ca   : > { %1443 = vst.msk [vmem:[#allocation2 + $0x20] sm:$0xff] %vm1438_vm4, %v1429_v62 }
 0x1d0   : > { %v1516_v63 = vld [vmem:[#allocation2 + $0x10] sm:$0xff] }
 0x1d1   : > { %3559 = vmatmul.msk.f32.gmra.mxu1 %vm1524_vm6, %v1516_v63  ;;  %v1497_v2 = vpop.permute.xlu2 %1496 }
 0x1d6   : > { %v1427_v31 = vpop.permute.xlu0 %1426 }
 0x1d7   : > { %1442 = vst.msk [vmem:[#allocation2 + $0x18] sm:$0xff] %vm1438_vm4, %v1427_v31 }
 0x1da   : > { %v1493_v0 = vpop.permute.xlu1 %1492 }
 0x1db   : > { %1508 = vst.msk [vmem:[#allocation2 + $0x18] sm:$0xff] %vm1504_vm5, %v1493_v0 }
 0x1e2   : > { %v1517_v1 = vld [vmem:[#allocation2 + $0x18] sm:$0xff] }
 0x1e3   : > { %v1495_v39 = vpop.permute.xlu0 %1494  ;;  %3560 = vmatmul.msk.f32.gmra.mxu1 %vm1524_vm6, %v1517_v1 }
 0x1e4   : > { %1509 = vst.msk [vmem:[#allocation2 + $0x20] sm:$0xff] %vm1504_vm5, %v1495_v39 }
 0x1e9   : > { %v1431_v48 = vpop.permute.xlu1 %1430 }
 0x1ea   : > { %1444 = vst.msk [vmem:[#allocation2 + $0x28] sm:$0xff] %vm1438_vm4, %v1431_v48 }
 0x1eb   : > { %1511 = vst.msk [vmem:[#allocation2 + $0x28] sm:$0x7f] %vm1510_vm9, %v1497_v2  ;;  %v1518_v43 = vld [vmem:[#allocation2 + $0x20] sm:$0xff]  ;;  %vm1805_vm9 = vcmask 261120  }
 0x1ec   : > { %1513 = vst.msk [vmem:[#allocation2 + $0x2f] sm:$0x1] %vm1512_vm3, %v3772_v12  ;;  %3561 = vmatmul.msk.f32.gmra.mxu1 %vm1524_vm6, %v1518_v43 }
 0x1f3   : > { %v1519_v57 = vld [vmem:[#allocation2 + $0x28] sm:$0xff] }
 0x1f4   : > { %3562 = vmatmul.msk.f32.gmra.mxu1 %vm1524_vm6, %v1519_v57 }
 0x22f   : > { %v1560_v44 = vpop.f32.mrf.mxu1 }
 0x230   : > { %v1561_v3 = vadd.f32 %v4210_v22, %v1560_v44 }
 0x232   : > { %v1578_v4 = vmax.f32 %v1561_v3, 0.0 }
 0x234   : > { %v1590_v5 = vrot.slane %v1578_v4, 2  ;;  %v1591_v6 = vrot.slane %v1578_v4, 4  ;;  %v3563_v8 = vrot.slane %v1578_v4, 9  ;;  %v1592_v11 = vrot.slane %v1578_v4, 6 }
 0x236   : > { %v3564_v7 = vrot.slane %v1590_v5, 9  ;;  %v3565_v9 = vrot.slane %v1591_v6, 9  ;;  %v1698_v13 = vmax.f32 %v1578_v4, %v3563_v8  ;;  %v3566_v16 = vrot.slane %v1592_v11, 9  ;;  %v1732_v8 = vld [vmem:[%s5445_s5 + $0x50] sm:$0xff] }
 0x238   : > { %v1699_v10 = vmax.f32 %v1590_v5, %v3564_v7  ;;  %v1700_v14 = vmax.f32 %v1591_v6, %v3565_v9  ;;  %v1759_v17 = vperm.slane %v1698_v13, 0  ;;  %v1701_v25 = vmax.f32 %v1592_v11, %v3566_v16  ;;  %v1733_v7 = vld [vmem:[%s5445_s5 + $0x58] sm:$0xff] }
 0x239   : > { %1883 = vmatpush.msrb.mxu2 %v1733_v7 }
 0x23a   : > { %v1760_v15 = vperm.slane %v1699_v10, 0  ;;  %v1761_v21 = vperm.slane %v1700_v14, 0  ;;  %v1762_v36 = vperm.slane %v1701_v25, 0  ;;  %v1731_v14 = vld [vmem:[%s5445_s5 + $0x48] sm:$0xff] }
 0x23b   : > { %1884 = vmatpush.msrb.mxu2 %v1732_v8 }
 0x23c   : > { %v1782_v24 = vsel %vm1355_vm10, %v1760_v15, %v1759_v17  ;;  %v1826_v45 = vsel %vm1355_vm10, %v1761_v21, %v1760_v15 }
 0x23d   : > { %v1783_v32 = vsel %vm1357_vm11, %v1761_v21, %v1782_v24  ;;  %v1827_v53 = vsel %vm1357_vm11, %v1762_v36, %v1826_v45  ;;  %1885 = vmatpush.msrb.mxu2 %v1731_v14 }
 0x23e   : > { %v1784_v18 = vsel %vm1359_vm12, %v1762_v36, %v1783_v32 }
 0x23f   : > { %v1563_v54 = vpop.f32.mrf.mxu1 }
 0x240   : > { %v1564_v20 = vadd.f32 %v4210_v22, %v1563_v54 }
 0x242   : > { %v1579_v23 = vmax.f32 %v1564_v20, 0.0 }
 0x244   : > { %v3567_v27 = vrot.slane %v1579_v23, 9  ;;  %v1593_v28 = vrot.slane %v1579_v23, 2  ;;  %v1594_v29 = vrot.slane %v1579_v23, 4  ;;  %v1595_v30 = vrot.slane %v1579_v23, 6 }
 0x246   : > { %v3568_v33 = vrot.slane %v1593_v28, 9  ;;  %v3569_v34 = vrot.slane %v1594_v29, 9  ;;  %v3570_v35 = vrot.slane %v1595_v30, 9  ;;  %v1702_v19 = vmax.f32 %v1579_v23, %v3567_v27 }
 0x248   : > { %v1703_v37 = vmax.f32 %v1593_v28, %v3568_v33  ;;  %v1704_v38 = vmax.f32 %v1594_v29, %v3569_v34  ;;  %v1705_v52 = vmax.f32 %v1595_v30, %v3570_v35  ;;  %v1763_v40 = vperm.slane %v1702_v19, 0 }
 0x24a   : > { %v1764_v26 = vperm.slane %v1703_v37, 0  ;;  %v1765_v41 = vperm.slane %v1704_v38, 0  ;;  %v1785_v42 = vsel %vm1361_vm13, %v1763_v40, %v1784_v18  ;;  %v1766_v46 = vperm.slane %v1705_v52, 0 }
 0x24b   : > { %v1828_v56 = vsel %vm1359_vm12, %v1763_v40, %v1827_v53 }
 0x24c   : > { %v1786_v47 = vsel %vm1363_vm14, %v1764_v26, %v1785_v42  ;;  %v1829_v59 = vsel %vm1361_vm13, %v1764_v26, %v1828_v56 }
 0x24d   : > { %v1787_v49 = vsel %vm1365_vm15, %v1765_v41, %v1786_v47  ;;  %v1830_v63 = vsel %vm1363_vm14, %v1765_v41, %v1829_v59 }
 0x24e   : > { %v1566_v50 = vpop.f32.mrf.mxu1  ;;  %v1788_v51 = vsel %vm1367_vm1, %v1766_v46, %v1787_v49  ;;  %v1831_v39 = vsel %vm1365_vm15, %v1766_v46, %v1830_v63 }
 0x24f   : > { %v1567_v55 = vadd.f32 %v4210_v22, %v1566_v50  ;;  %1813 = vrot.lane.b32.xlu0 %v1788_v51, %s5426_s2  ;;  %1806 = vst.msk [vmem:[#allocation2 + $0x1] sm:$0xff] %vm1805_vm9, %v1788_v51 }
 0x251   : > { %v1580_v58 = vmax.f32 %v1567_v55, 0.0 }
 0x253   : > { %v1596_v60 = vrot.slane %v1580_v58, 2  ;;  %v3571_v61 = vrot.slane %v1580_v58, 9  ;;  %v1597_v31 = vrot.slane %v1580_v58, 4  ;;  %v1598_v2 = vrot.slane %v1580_v58, 6 }
 0x255   : > { %v1706_v62 = vmax.f32 %v1580_v58, %v3571_v61  ;;  %v3572_v0 = vrot.slane %v1596_v60, 9  ;;  %v3573_v43 = vrot.slane %v1597_v31, 9  ;;  %v3574_v44 = vrot.slane %v1598_v2, 9 }
 0x257   : > { %v1767_v1 = vperm.slane %v1706_v62, 0  ;;  %v1707_v57 = vmax.f32 %v1596_v60, %v3572_v0  ;;  %v1708_v3 = vmax.f32 %v1597_v31, %v3573_v43  ;;  %v1709_v9 = vmax.f32 %v1598_v2, %v3574_v44 }
 0x259   : > { %v1832_v48 = vsel %vm1367_vm1, %v1767_v1, %v1831_v39  ;;  %v1768_v4 = vperm.slane %v1707_v57, 0  ;;  %v1769_v10 = vperm.slane %v1708_v3, 0  ;;  %v1770_v20 = vperm.slane %v1709_v9, 0 }
 0x25a   : > { %1846 = vrot.lane.b32.xlu1 %v1832_v48, %s5428_s0 }
 0x25b   : > { %v1789_v11 = vsel %vm1355_vm10, %v1768_v4, %v1767_v1  ;;  %v1833_v28 = vsel %vm1355_vm10, %v1769_v10, %v1768_v4 }
 0x25c   : > { %v1790_v21 = vsel %vm1357_vm11, %v1769_v10, %v1789_v11  ;;  %v1834_v52 = vsel %vm1357_vm11, %v1770_v20, %v1833_v28 }
 0x25d   : > { %v1791_v19 = vsel %vm1359_vm12, %v1770_v20, %v1790_v21 }
 0x260   : > { %v1569_v5 = vpop.f32.mrf.mxu1 }
 0x261   : > { %v1570_v6 = vadd.f32 %v4210_v22, %v1569_v5 }
 0x263   : > { %v1581_v13 = vmax.f32 %v1570_v6, 0.0 }
 0x265   : > { %v3575_v15 = vrot.slane %v1581_v13, 9  ;;  %v1599_v16 = vrot.slane %v1581_v13, 2  ;;  %v1600_v54 = vrot.slane %v1581_v13, 4  ;;  %v1601_v17 = vrot.slane %v1581_v13, 6 }
 0x267   : > { %v3576_v23 = vrot.slane %v1599_v16, 9  ;;  %v3577_v24 = vrot.slane %v1600_v54, 9  ;;  %v3578_v25 = vrot.slane %v1601_v17, 9  ;;  %v1710_v27 = vmax.f32 %v1581_v13, %v3575_v15 }
 0x269   : > { %v1572_v29 = vpop.f32.mrf.mxu1  ;;  %v1711_v30 = vmax.f32 %v1599_v16, %v3576_v23  ;;  %v1712_v32 = vmax.f32 %v1600_v54, %v3577_v24  ;;  %v1713_v33 = vmax.f32 %v1601_v17, %v3578_v25  ;;  %v1771_v34 = vperm.slane %v1710_v27, 0 }
 0x26a   : > { %v1573_v35 = vadd.f32 %v4210_v22, %v1572_v29 }
 0x26b   : > { %v1772_v36 = vperm.slane %v1711_v30, 0  ;;  %v1773_v37 = vperm.slane %v1712_v32, 0  ;;  %v1792_v38 = vsel %vm1361_vm13, %v1771_v34, %v1791_v19  ;;  %v1835_v18 = vsel %vm1359_vm12, %v1771_v34, %v1834_v52  ;;  %v1730_v34 = vld [vmem:[%s5445_s5 + $0x40] sm:$0xff]  ;;  %v1728_v19 = vld [vmem:[%s5445_s5 + $0x30] sm:$0xff] }
 0x26c   : > { %v1582_v40 = vmax.f32 %v1573_v35, 0.0  ;;  %v1774_v26 = vperm.slane %v1713_v33, 0  ;;  %v1729_v35 = vld [vmem:[%s5445_s5 + $0x38] sm:$0xff]  ;;  %1886 = vmatpush.msrb.mxu2 %v1730_v34  ;;  %v1724_v52 = vld [vmem:[%s5445_s5 + $0x10] sm:$0xff] }
 0x26d   : > { %v1793_v41 = vsel %vm1363_vm14, %v1772_v36, %v1792_v38  ;;  %v1836_v42 = vsel %vm1361_vm13, %v1772_v36, %v1835_v18  ;;  %v1727_v36 = vld [vmem:[%s5445_s5 + $0x28] sm:$0xff]  ;;  %v1725_v38 = vld [vmem:[%s5445_s5 + $0x18] sm:$0xff]  ;;  %v1722_v18 = vld [vmem:[%s5445_s5] sm:$0xff] }
 0x26e   : > { %v1602_v45 = vrot.slane %v1582_v40, 2  ;;  %v1603_v46 = vrot.slane %v1582_v40, 4  ;;  %v1604_v47 = vrot.slane %v1582_v40, 6  ;;  %v1794_v49 = vsel %vm1365_vm15, %v1773_v37, %v1793_v41  ;;  %1887 = vmatpush.msrb.mxu2 %v1729_v35 }
 0x26f   : > { %v1795_v50 = vsel %vm1367_vm1, %v1774_v26, %v1794_v49  ;;  %v3579_v51 = vrot.slane %v1582_v40, 9  ;;  %v1837_v60 = vsel %vm1363_vm14, %v1773_v37, %v1836_v42  ;;  %v1726_v37 = vld [vmem:[%s5445_s5 + $0x20] sm:$0xff]  ;;  %v3607_v49 = vld [vmem:[%s5446_s29 + $0x68] sm:$0xff] }
 0x270   : > { %v3580_v53 = vrot.slane %v1602_v45, 9  ;;  %v3581_v55 = vrot.slane %v1603_v46, 9  ;;  %v3582_v56 = vrot.slane %v1604_v47, 9  ;;  %1815 = vrot.lane.b32.xlu2 %v1795_v50, %s5426_s2  ;;  %1807 = vst.msk [vmem:[#allocation2 + $0x9] sm:$0xff] %vm1805_vm9, %v1795_v50  ;;  %v1838_v2 = vsel %vm1365_vm15, %v1774_v26, %v1837_v60  ;;  %1888 = vmatpush.msrb.mxu2 %v1728_v19  ;;  %v3619_v50 = vld [vmem:[%s5446_s29 + $0xb8] sm:$0xff]  ;;  %v3657_v19 = vld [vmem:[%s5446_s29 + $0x1c0] sm:$0xff] }
 0x271   : > { %v1575_v58 = vpop.f32.mrf.mxu1  ;;  %v1714_v59 = vmax.f32 %v1582_v40, %v3579_v51  ;;  %v1723_v40 = vld [vmem:[%s5445_s5 + $0x8] sm:$0xff]  ;;  %v3618_v51 = vld [vmem:[%s5446_s29 + $0xb0] sm:$0xff]  ;;  %v3615_v60 = vld [vmem:[%s5446_s29 + $0x98] sm:$0xff] }
 0x272   : > { %v1715_v61 = vmax.f32 %v1602_v45, %v3580_v53  ;;  %v1716_v62 = vmax.f32 %v1603_v46, %v3581_v55  ;;  %v1576_v63 = vadd.f32 %v4210_v22, %v1575_v58  ;;  %v1717_v31 = vmax.f32 %v1604_v47, %v3582_v56  ;;  %1889 = vmatpush.msrb.mxu2 %v1727_v36  ;;  %v3609_v46 = vld [vmem:[%s5446_s29 + $0x78] sm:$0xff]  ;;  %v3608_v47 = vld [vmem:[%s5446_s29 + $0x70] sm:$0xff]  ;;  %v3606_v53 = vld [vmem:[%s5446_s29 + $0x60] sm:$0xff] }
 0x273   : > { %v1775_v0 = vperm.slane %v1714_v59, 0  ;;  %2006 = vmatpush.msra.mxu3 %v3609_v46  ;;  %v3617_v55 = vld [vmem:[%s5446_s29 + $0xa8] sm:$0xff]  ;;  %v3605_v56 = vld [vmem:[%s5446_s29 + $0x58] sm:$0xff]  ;;  %v3616_v58 = vld [vmem:[%s5446_s29 + $0xa0] sm:$0xff] }
 0x274   : > { %v1777_v1 = vperm.slane %v1716_v62, 0  ;;  %v1583_v39 = vmax.f32 %v1576_v63, 0.0  ;;  %v1776_v48 = vperm.slane %v1715_v61, 0  ;;  %v1778_v6 = vperm.slane %v1717_v31, 0  ;;  %1890 = vmatpush.msrb.mxu2 %v1726_v37  ;;  %v3604_v59 = vld [vmem:[%s5446_s29 + $0x50] sm:$0xff]  ;;  %v3603_v62 = vld [vmem:[%s5446_s29 + $0x48] sm:$0xff] }
 0x275   : > { %v1839_v43 = vsel %vm1367_vm1, %v1775_v0, %v1838_v2  ;;  %2007 = vmatpush.msra.mxu3 %v3608_v47  ;;  %v3602_v63 = vld [vmem:[%s5446_s29 + $0x40] sm:$0xff]  ;;  %v1984_v31 = vld [vmem:[%s5446_s29 + $0x38] sm:$0xff]  ;;  %v3644_v46 = vld [vmem:[%s5446_s29 + $0x168] sm:$0xff] }
 0x276   : > { %v3583_v57 = vrot.slane %v1583_v39, 9  ;;  %v1796_v44 = vsel %vm1355_vm10, %v1776_v48, %v1775_v0  ;;  %1848 = vrot.lane.b32.xlu0 %v1839_v43, %s5428_s0  ;;  %v1605_v3 = vrot.slane %v1583_v39, 2  ;;  %v1606_v4 = vrot.slane %v1583_v39, 4  ;;  %1891 = vmatpush.msrb.mxu2 %v1725_v38  ;;  %v1983_v0 = vld [vmem:[%s5446_s29 + $0x30] sm:$0xff]  ;;  %v1982_v43 = vld [vmem:[%s5446_s29 + $0x28] sm:$0xff]  ;;  %v3628_v38 = vld [vmem:[%s5446_s29 + $0xf8] sm:$0xff] }
 0x277   : > { %v1607_v5 = vrot.slane %v1583_v39, 6  ;;  %v1840_v22 = vsel %vm1355_vm10, %v1777_v1, %v1776_v48  ;;  %v1797_v10 = vsel %vm1357_vm11, %v1777_v1, %v1796_v44  ;;  %vm1808_vm10 = vcmask 260096   ;;  %2008 = vmatpush.msra.mxu3 %v3607_v49  ;;  %v1981_v44 = vld [vmem:[%s5446_s29 + $0x20] sm:$0xff]  ;;  %v3689_v47 = vld [vmem:[%s5446_s29 + $0x2a8] sm:$0xff] }
 0x278   : > { %v3584_v7 = vrot.slane %v1605_v3, 9  ;;  %v3585_v8 = vrot.slane %v1606_v4, 9  ;;  %v1718_v9 = vmax.f32 %v1583_v39, %v3583_v57  ;;  %v1841_v54 = vsel %vm1357_vm11, %v1778_v6, %v1840_v22  ;;  %1892 = vmatpush.msrb.mxu2 %v1724_v52  ;;  %v3614_v57 = vld [vmem:[%s5446_s29 + $0x90] sm:$0xff]  ;;  %v3646_v52 = vld [vmem:[%s5446_s29 + $0x178] sm:$0xff]  ;;  %v3625_v49 = vld [vmem:[%s5446_s29 + $0xe0] sm:$0xff] }
 0x279   : > { %v3586_v11 = vrot.slane %v1607_v5, 9  ;;  %v1798_v17 = vsel %vm1359_vm12, %v1778_v6, %v1797_v10  ;;  %vm1822_vm11 = vcmask 523520   ;;  %2009 = vmatpush.msra.mxu3 %v3606_v53  ;;  %v3637_v6 = vld [vmem:[%s5446_s29 + $0x138] sm:$0xff]  ;;  %v1979_v22 = vld [vmem:[%s5446_s29 + $0x10] sm:$0xff]  ;;  %v1977_v10 = vld [vmem:[%s5446_s29] sm:$0xff] }
 0x27a   : > { %v1719_v13 = vmax.f32 %v1605_v3, %v3584_v7  ;;  %v1720_v14 = vmax.f32 %v1606_v4, %v3585_v8  ;;  %v1779_v15 = vperm.slane %v1718_v9, 0  ;;  %1893 = vmatpush.msrb.mxu2 %v1723_v40  ;;  %v3613_v3 = vld [vmem:[%s5446_s29 + $0x88] sm:$0xff]  ;;  %v1980_v4 = vld [vmem:[%s5446_s29 + $0x18] sm:$0xff]  ;;  %v3636_v7 = vld [vmem:[%s5446_s29 + $0x130] sm:$0xff] }
 0x27b   : > { %v1721_v16 = vmax.f32 %v1607_v5, %v3586_v11  ;;  %2010 = vmatpush.msra.mxu3 %v3605_v56  ;;  %v3612_v5 = vld [vmem:[%s5446_s29 + $0x80] sm:$0xff]  ;;  %v1978_v8 = vld [vmem:[%s5446_s29 + $0x8] sm:$0xff]  ;;  %v3691_v40 = vld [vmem:[%s5446_s29 + $0x2b8] sm:$0xff] }
 0x27c   : > { %v1780_v20 = vperm.slane %v1719_v13, 0  ;;  %v1781_v21 = vperm.slane %v1720_v14, 0  ;;  %v1842_v23 = vsel %vm1359_vm12, %v1779_v15, %v1841_v54  ;;  %v1799_v24 = vsel %vm1361_vm13, %v1779_v15, %v1798_v17  ;;  %1894 = vmatpush.msrb.mxu2 %v1722_v18  ;;  %v3635_v9 = vld [vmem:[%s5446_s29 + $0x128] sm:$0xff]  ;;  %v3634_v11 = vld [vmem:[%s5446_s29 + $0x120] sm:$0xff]  ;;  %v3664_v13 = vld [vmem:[%s5446_s29 + $0x1f8] sm:$0xff] }
 0x27d   : > { %v1811_v25 = vperm.slane %v1721_v16, 0  ;;  %vm1855_vm12 = vcmask 785920   ;;  %2011 = vmatpush.msra.mxu3 %v3604_v59  ;;  %2226 = vmatpush.msrb.mxu1 %v3664_v13  ;;  %v3633_v14 = vld [vmem:[%s5446_s29 + $0x118] sm:$0xff]  ;;  %v3632_v15 = vld [vmem:[%s5446_s29 + $0x110] sm:$0xff]  ;;  %v3631_v16 = vld [vmem:[%s5446_s29 + $0x108] sm:$0xff] }
 0x27e   : > { %v1843_v27 = vsel %vm1361_vm13, %v1780_v20, %v1842_v23  ;;  %v1800_v28 = vsel %vm1363_vm14, %v1780_v20, %v1799_v24  ;;  %vm1869_vm13 = vcmask 785408   ;;  %2061 = vmatpush.msra.mxu2 %v3619_v50  ;;  %v3663_v54 = vld [vmem:[%s5446_s29 + $0x1f0] sm:$0xff]  ;;  %v3630_v17 = vld [vmem:[%s5446_s29 + $0x100] sm:$0xff]  ;;  %v3662_v20 = vld [vmem:[%s5446_s29 + $0x1e8] sm:$0xff] }
 0x27f   : > { %v1844_v29 = vsel %vm1363_vm14, %v1781_v21, %v1843_v27  ;;  %v1801_v30 = vsel %vm1365_vm15, %v1781_v21, %v1800_v28  ;;  %2012 = vmatpush.msra.mxu3 %v3603_v62  ;;  %vm1858_vm14 = vcmask 784896   ;;  %2227 = vmatpush.msrb.mxu1 %v3663_v54  ;;  %v4423_v21 = vld [vmem:[%s5447_s3] ss:$0 sm:$0xff]  ;;  %v3660_v27 = vld [vmem:[%s5446_s29 + $0x1d8] sm:$0xff]  ;;  %v3627_v18 = vld [vmem:[%s5446_s29 + $0xf0] sm:$0xff] }
 0x280   : > { %v1845_v32 = vsel %vm1365_vm15, %v1811_v25, %v1844_v29  ;;  %1809 = vst.msk [vmem:[#allocation2 + $0x11] sm:$0x7f] %vm1808_vm10, %v1801_v30  ;;  %v1812_v33 = vsel %vm1367_vm1, %v1811_v25, %v1801_v30  ;;  %2062 = vmatpush.msra.mxu2 %v3618_v51  ;;  %vm1860_vm15 = vcmask 778752   ;;  %v3661_v25 = vld [vmem:[%s5446_s29 + $0x1e0] sm:$0xff]  ;;  %v3659_v29 = vld [vmem:[%s5446_s29 + $0x1d0] sm:$0xff]  ;;  %vm1994_vm1 = vcmask 523264  }
 0x281   : > { %1850 = vrot.lane.b32.xlu2 %v1845_v32, %s5428_s0  ;;  %1817 = vrot.lane.b32.xlu1 %v1812_v33, %s5426_s2  ;;  %v3658_v33 = vld [vmem:[%s5446_s29 + $0x1c8] sm:$0xff]  ;;  %v3643_v50 = vld [vmem:[%s5446_s29 + $0x160] sm:$0xff]  ;;  %vm2668_vm10 = vcmask 516096  }
 0x282   : > { %2063 = vmatpush.msra.mxu2 %v3617_v55  ;;  %2013 = vmatpush.msra.mxu3 %v3602_v63  ;;  %v3688_v51 = vld [vmem:[%s5446_s29 + $0x2a0] sm:$0xff]  ;;  %v3624_v55 = vld [vmem:[%s5446_s29 + $0xd8] sm:$0xff]  ;;  %v3686_v62 = vld [vmem:[%s5446_s29 + $0x290] sm:$0xff]  ;;  %2669 = vst.msk [vmem:[#allocation3] sm:$0x1] %vm2668_vm10, %v3772_v12 }
 0x283   : > { %2228 = vmatpush.msrb.mxu1 %v3662_v20  ;;  %v3642_v56 = vld [vmem:[%s5446_s29 + $0x158] sm:$0xff]  ;;  %v3622_v63 = vld [vmem:[%s5446_s29 + $0xc8] sm:$0xff]  ;;  %2670 = vst.msk [vmem:[#allocation3 + $0xd] sm:$0x1] %vm2668_vm10, %v3772_v12 }
 0x284   : > { %2064 = vmatpush.msra.mxu2 %v3616_v58  ;;  %2029 = vmatpush.msrb.mxu3 %v1984_v31  ;;  %v3687_v59 = vld [vmem:[%s5446_s29 + $0x298] sm:$0xff]  ;;  %v3640_v31 = vld [vmem:[%s5446_s29 + $0x148] sm:$0xff] }
 0x285   : > { %2229 = vmatpush.msrb.mxu1 %v3661_v25  ;;  %v3649_v54 = vld [vmem:[%s5446_s29 + $0x188] sm:$0xff]  ;;  %v2388_v20 = vld [vmem:[%s5405_s9 + $0x78] sm:$0xff]  ;;  %v2387_v25 = vld [vmem:[%s5405_s9 + $0x70] sm:$0xff] }
 0x286   : > { %2065 = vmatpush.msra.mxu2 %v3615_v60  ;;  %2030 = vmatpush.msrb.mxu3 %v1983_v0  ;;  %v3623_v60 = vld [vmem:[%s5446_s29 + $0xd0] sm:$0xff] }
 0x287   : > { %2230 = vmatpush.msrb.mxu1 %v3660_v27  ;;  %v3648_v27 = vld [vmem:[%s5446_s29 + $0x180] sm:$0xff]  ;;  %2390 = vmatpush.msrb.mxu0 %v2388_v20  ;;  %v2413_v20 = vld [vmem:[%s5407_s11 + $0x18] sm:$0xff] }
 0x288   : > { %2031 = vmatpush.msrb.mxu3 %v1982_v43  ;;  %2066 = vmatpush.msra.mxu2 %v3614_v57  ;;  %v3684_v43 = vld [vmem:[%s5446_s29 + $0x280] sm:$0xff] }
 0x289   : > { %2231 = vmatpush.msrb.mxu1 %v3659_v29  ;;  %2391 = vmatpush.msrb.mxu0 %v2387_v25 }
 0x28a   : > { %2032 = vmatpush.msrb.mxu3 %v1981_v44  ;;  %2067 = vmatpush.msra.mxu2 %v3613_v3  ;;  %v3654_v44 = vld [vmem:[%s5446_s29 + $0x1b0] sm:$0xff] }
 0x28b   : > { %2232 = vmatpush.msrb.mxu1 %v3658_v33  ;;  %v2386_v33 = vld [vmem:[%s5405_s9 + $0x68] sm:$0xff] }
 0x28c   : > { %2033 = vmatpush.msrb.mxu3 %v1980_v4  ;;  %2068 = vmatpush.msra.mxu2 %v3612_v5  ;;  %v3653_v4 = vld [vmem:[%s5446_s29 + $0x1a8] sm:$0xff] }
 0x28d   : > { %2233 = vmatpush.msrb.mxu1 %v3657_v19  ;;  %2392 = vmatpush.msrb.mxu0 %v2386_v33 }
 0x28e   : > { %2034 = vmatpush.msrb.mxu3 %v1979_v22 }
 0x28f   : > { %2325 = vmatpush.msra.mxu1 %v3691_v40  ;;  %v3668_v40 = vld [vmem:[%s5446_s29 + $0x210] sm:$0xff] }
 0x290   : > { %2035 = vmatpush.msrb.mxu3 %v1978_v8 }
 0x292   : > { %2036 = vmatpush.msrb.mxu3 %v1977_v10 }
 0x2c1   : > { %v1814_v26 = vpop.permute.xlu0 %1813 }
 0x2c2   : > { %1823 = vst.msk [vmem:[#allocation2] sm:$0xff] %vm1822_vm11, %v1814_v26  ;;  %v3645_v26 = vld [vmem:[%s5446_s29 + $0x170] sm:$0xff] }
 0x2ca   : > { %v1816_v41 = vpop.permute.xlu2 %1815 }
 0x2cb   : > { %1824 = vst.msk [vmem:[#allocation2 + $0x8] sm:$0xff] %vm1822_vm11, %v1816_v41  ;;  %v3690_v41 = vld [vmem:[%s5446_s29 + $0x2b0] sm:$0xff] }
 0x2cc   : > { %v1847_v42 = vpop.permute.xlu1 %1846  ;;  %2326 = vmatpush.msra.mxu1 %v3690_v41  ;;  %v3667_v41 = vld [vmem:[%s5446_s29 + $0x208] sm:$0xff] }
 0x2cd   : > { %1856 = vst.msk [vmem:[#allocation2] sm:$0xff] %vm1855_vm12, %v1847_v42  ;;  %v3626_v42 = vld [vmem:[%s5446_s29 + $0xe8] sm:$0xff] }
 0x2ce   : > { %2327 = vmatpush.msra.mxu1 %v3689_v47 }
 0x2d0   : > { %2328 = vmatpush.msra.mxu1 %v3688_v51 }
 0x2d2   : > { %2329 = vmatpush.msra.mxu1 %v3687_v59 }
 0x2d4   : > { %v1862_v45 = vld [vmem:[#allocation2] sm:$0xff]  ;;  %2330 = vmatpush.msra.mxu1 %v3686_v62 }
 0x2d5   : > { %3587 = vmatmul.msk.f32.vlgmr.msrb.gmra.mxu2 %vm1869_vm13, %v1862_v45  ;;  %2900 = vst.msk [vmem:[#allocation2] sm:$0x1] %vm1734_vm7, %v3772_v12 }
 0x2d6   : > { %2127 = vmatpush.msrb.mxu2 %v3637_v6  ;;  %v3652_v6 = vld [vmem:[%s5446_s29 + $0x1a0] sm:$0xff] }
 0x2d8   : > { %2128 = vmatpush.msrb.mxu2 %v3636_v7  ;;  %v3651_v7 = vld [vmem:[%s5446_s29 + $0x198] sm:$0xff] }
 0x2da   : > { %2129 = vmatpush.msrb.mxu2 %v3635_v9 }
 0x2db   : > { %v1851_v48 = vpop.permute.xlu2 %1850 }
 0x2dc   : > { %2130 = vmatpush.msrb.mxu2 %v3634_v11  ;;  %v3650_v11 = vld [vmem:[%s5446_s29 + $0x190] sm:$0xff] }
 0x2de   : > { %2131 = vmatpush.msrb.mxu2 %v3633_v14 }
 0x2e0   : > { %2132 = vmatpush.msrb.mxu2 %v3632_v15  ;;  %v3673_v15 = vld [vmem:[%s5446_s29 + $0x238] sm:$0xff] }
 0x2e2   : > { %2133 = vmatpush.msrb.mxu2 %v3631_v16 }
 0x2e4   : > { %2134 = vmatpush.msrb.mxu2 %v3630_v17 }
 0x2e8   : > { %v1849_v61 = vpop.permute.xlu0 %1848 }
 0x2e9   : > { %1857 = vst.msk [vmem:[#allocation2 + $0x8] sm:$0xff] %vm1855_vm12, %v1849_v61  ;;  %v3641_v61 = vld [vmem:[%s5446_s29 + $0x150] sm:$0xff] }
 0x2f0   : > { %v1863_v1 = vld [vmem:[#allocation2 + $0x8] sm:$0xff] }
 0x2f1   : > { %3588 = vmatmul.msk.f32.gmra.mxu2 %vm1869_vm13, %v1863_v1  ;;  %v3685_v1 = vld [vmem:[%s5446_s29 + $0x288] sm:$0xff] }
 0x2f2   : > { %2331 = vmatpush.msra.mxu1 %v3685_v1  ;;  %v3695_v1 = vld [vmem:[%s5446_s29 + $0x2d0] sm:$0xff] }
 0x2f3   : > { %v1818_v39 = vpop.permute.xlu1 %1817 }
 0x2f4   : > { %1825 = vst.msk [vmem:[#allocation2 + $0x10] sm:$0xff] %vm1822_vm11, %v1818_v39  ;;  %v3621_v39 = vld [vmem:[%s5446_s29 + $0xc0] sm:$0xff]  ;;  %2332 = vmatpush.msra.mxu1 %v3684_v43 }
 0x2f5   : > { %1859 = vst.msk [vmem:[#allocation2 + $0x10] sm:$0x7f] %vm1858_vm14, %v1851_v48  ;;  %v3639_v48 = vld [vmem:[%s5446_s29 + $0x140] sm:$0xff]  ;;  %vm2831_vm14 = vcmask 254976  }
 0x2f6   : > { %1861 = vst.msk [vmem:[#allocation2 + $0x17] sm:$0x1] %vm1860_vm15, %v3772_v12 }
 0x2fd   : > { %v1864_v2 = vld [vmem:[#allocation2 + $0x10] sm:$0xff] }
 0x2fe   : > { %3589 = vmatmul.msk.f32.gmra.mxu2 %vm1869_vm13, %v1864_v2  ;;  %v3655_v2 = vld [vmem:[%s5446_s29 + $0x1b8] sm:$0xff] }
 0x358   : > { %v1896_v23 = vpop.f32.mrf.mxu2 }
 0x359   : > { %v1897_v24 = vadd.f32 %v4423_v21, %v1896_v23 }
 0x35b   : > { %v4432_v28 = vmax.f32 %v1897_v24, 0.0  ;;  %v3672_v24 = vld [vmem:[%s5446_s29 + $0x230] sm:$0xff] }
 0x35d   : > { %v1912_v30 = vrot.slane %v4432_v28, 4  ;;  %v1911_v32 = vrot.slane %v4432_v28, 2  ;;  %v3590_v45 = vrot.slane %v4432_v28, 9  ;;  %v1913_v58 = vrot.slane %v4432_v28, 6 }
 0x35f   : > { %v3591_v34 = vrot.slane %v1911_v32, 9  ;;  %v3592_v35 = vrot.slane %v1912_v30, 9  ;;  %v1965_v53 = vmax.f32 %v4432_v28, %v3590_v45  ;;  %v3593_v0 = vrot.slane %v1913_v58, 9  ;;  %v3671_v28 = vld [vmem:[%s5446_s29 + $0x228] sm:$0xff] }
 0x361   : > { %v1966_v36 = vmax.f32 %v1911_v32, %v3591_v34  ;;  %v1967_v37 = vmax.f32 %v1912_v30, %v3592_v35  ;;  %v1968_v57 = vmax.f32 %v1913_v58, %v3593_v0  ;;  %v3682_v32 = vld [vmem:[%s5446_s29 + $0x278] sm:$0xff]  ;;  %v3670_v35 = vld [vmem:[%s5446_s29 + $0x220] sm:$0xff]  ;;  %v3699_v58 = vld [vmem:[%s5446_s29 + $0x2f0] sm:$0xff] }
 0x362   : > { %v3696_v0 = vld [vmem:[%s5446_s29 + $0x2d8] sm:$0xff] }
 0x363   : > { %3610 = vmatmul.msk.f32.vlgmr.msra.gmra.mxu3 %vm1994_vm1, %v1966_v36  ;;  %3620 = vmatmul.msk.f32.vlgmr.msra.gmra.mxu2 %vm1994_vm1, %v1967_v37  ;;  %v3681_v36 = vld [vmem:[%s5446_s29 + $0x270] sm:$0xff] }
 0x364   : > { %2094 = vmatpush.msra.mxu3 %v3628_v38  ;;  %2160 = vmatpush.msra.mxu2 %v3646_v52  ;;  %v3669_v38 = vld [vmem:[%s5446_s29 + $0x218] sm:$0xff] }
 0x366   : > { %2095 = vmatpush.msra.mxu3 %v3627_v18  ;;  %2161 = vmatpush.msra.mxu2 %v3645_v26  ;;  %v3679_v26 = vld [vmem:[%s5446_s29 + $0x260] sm:$0xff] }
 0x368   : > { %2096 = vmatpush.msra.mxu3 %v3626_v42  ;;  %2162 = vmatpush.msra.mxu2 %v3644_v46  ;;  %v3678_v46 = vld [vmem:[%s5446_s29 + $0x258] sm:$0xff] }
 0x36a   : > { %2097 = vmatpush.msra.mxu3 %v3625_v49  ;;  %2163 = vmatpush.msra.mxu2 %v3643_v50  ;;  %v3666_v49 = vld [vmem:[%s5446_s29 + $0x200] sm:$0xff]  ;;  %v3677_v50 = vld [vmem:[%s5446_s29 + $0x250] sm:$0xff] }
 0x36b   : > { %3611 = vmatmul.msk.f32.vlgmr.msrb.gmra.mxu3 %vm1994_vm1, %v1965_v53  ;;  %v3700_v53 = vld [vmem:[%s5446_s29 + $0x2f8] sm:$0xff] }
 0x36c   : > { %2098 = vmatpush.msra.mxu3 %v3624_v55  ;;  %2164 = vmatpush.msra.mxu2 %v3642_v56  ;;  %v3676_v56 = vld [vmem:[%s5446_s29 + $0x248] sm:$0xff] }
 0x36e   : > { %2099 = vmatpush.msra.mxu3 %v3623_v60  ;;  %2165 = vmatpush.msra.mxu2 %v3641_v61  ;;  %v3675_v60 = vld [vmem:[%s5446_s29 + $0x240] sm:$0xff]  ;;  %v3698_v61 = vld [vmem:[%s5446_s29 + $0x2e8] sm:$0xff] }
 0x370   : > { %2100 = vmatpush.msra.mxu3 %v3622_v63  ;;  %2166 = vmatpush.msra.mxu2 %v3640_v31  ;;  %v3697_v63 = vld [vmem:[%s5446_s29 + $0x2e0] sm:$0xff] }
 0x372   : > { %2101 = vmatpush.msra.mxu3 %v3621_v39  ;;  %2167 = vmatpush.msra.mxu2 %v3639_v48  ;;  %v3694_v39 = vld [vmem:[%s5446_s29 + $0x2c8] sm:$0xff] }
 0x373   : > { %3629 = vmatmul.msk.f32.vlgmr.msra.gmra.mxu3 %vm1994_vm1, %v1968_v57  ;;  %v2385_v57 = vld [vmem:[%s5405_s9 + $0x60] sm:$0xff] }
 0x374   : > { %2193 = vmatpush.msrb.mxu3 %v3655_v2  ;;  %v1899_v3 = vpop.f32.mrf.mxu2  ;;  %v3693_v2 = vld [vmem:[%s5446_s29 + $0x2c0] sm:$0xff]  ;;  %2393 = vmatpush.msrb.mxu0 %v2385_v57  ;;  %v2487_v57 = vld [vmem:[%s5409_s13 + $0x188] sm:$0xff] }
 0x375   : > { %v1900_v5 = vadd.f32 %v4423_v21, %v1899_v3  ;;  %v2383_v3 = vld [vmem:[%s5405_s9 + $0x50] sm:$0xff] }
 0x376   : > { %2194 = vmatpush.msrb.mxu3 %v3654_v44  ;;  %v2384_v44 = vld [vmem:[%s5405_s9 + $0x58] sm:$0xff] }
 0x377   : > { %v1906_v22 = vmax.f32 %v1900_v5, 0.0  ;;  %2394 = vmatpush.msrb.mxu0 %v2384_v44  ;;  %v2381_v5 = vld [vmem:[%s5405_s9 + $0x40] sm:$0xff]  ;;  %v2512_v44 = vld [vmem:[%s5409_s13 + $0x250] sm:$0xff] }
 0x378   : > { %2195 = vmatpush.msrb.mxu3 %v3653_v4  ;;  %v2382_v4 = vld [vmem:[%s5405_s9 + $0x48] sm:$0xff] }
 0x379   : > { %v1915_v8 = vrot.slane %v1906_v22, 4  ;;  %v3594_v9 = vrot.slane %v1906_v22, 9  ;;  %v1916_v10 = vrot.slane %v1906_v22, 6  ;;  %v1914_v13 = vrot.slane %v1906_v22, 2  ;;  %2395 = vmatpush.msrb.mxu0 %v2383_v3  ;;  %v2513_v3 = vld [vmem:[%s5409_s13 + $0x258] sm:$0xff] }
 0x37a   : > { %2196 = vmatpush.msrb.mxu3 %v3652_v6  ;;  %v2380_v6 = vld [vmem:[%s5405_s9 + $0x38] sm:$0xff] }
 0x37b   : > { %v1969_v14 = vmax.f32 %v1906_v22, %v3594_v9  ;;  %v3597_v16 = vrot.slane %v1916_v10, 9  ;;  %v3596_v17 = vrot.slane %v1915_v8, 9  ;;  %v3595_v29 = vrot.slane %v1914_v13, 9  ;;  %2396 = vmatpush.msrb.mxu0 %v2382_v4  ;;  %v2379_v22 = vld [vmem:[%s5405_s9 + $0x30] sm:$0xff]  ;;  %v2376_v9 = vld [vmem:[%s5405_s9 + $0x18] sm:$0xff] }
 0x37c   : > { %2197 = vmatpush.msrb.mxu3 %v3651_v7  ;;  %v2378_v7 = vld [vmem:[%s5405_s9 + $0x28] sm:$0xff]  ;;  %v2480_v4 = vld [vmem:[%s5409_s13 + $0x150] sm:$0xff] }
 0x37d   : > { %3638 = vmatmul.msk.f32.vlgmr.msrb.gmra.mxu2 %vm1994_vm1, %v1969_v14  ;;  %v1972_v23 = vmax.f32 %v1916_v10, %v3597_v16  ;;  %v1971_v30 = vmax.f32 %v1915_v8, %v3596_v17  ;;  %v1970_v37 = vmax.f32 %v1914_v13, %v3595_v29  ;;  %2397 = vmatpush.msrb.mxu0 %v2381_v5  ;;  %v2377_v8 = vld [vmem:[%s5405_s9 + $0x20] sm:$0xff]  ;;  %v2374_v13 = vld [vmem:[%s5405_s9 + $0x8] sm:$0xff]  ;;  %v2481_v5 = vld [vmem:[%s5409_s13 + $0x158] sm:$0xff] }
 0x37e   : > { %2198 = vmatpush.msrb.mxu3 %v3650_v11  ;;  %2259 = vmatpush.msrb.mxu2 %v3673_v15  ;;  %v2375_v11 = vld [vmem:[%s5405_s9 + $0x10] sm:$0xff] }
 0x37f   : > { %3665 = vmatmul.msk.f32.vlgmr.msrb.gmra.mxu1 %vm1994_vm1, %v1972_v23  ;;  %2398 = vmatpush.msrb.mxu0 %v2380_v6  ;;  %v2412_v23 = vld [vmem:[%s5407_s11 + $0x10] sm:$0xff]  ;;  %v2506_v6 = vld [vmem:[%s5409_s13 + $0x220] sm:$0xff] }
 0x380   : > { %2199 = vmatpush.msrb.mxu3 %v3649_v54  ;;  %2260 = vmatpush.msrb.mxu2 %v3672_v24  ;;  %v2373_v54 = vld [vmem:[%s5405_s9] sm:$0xff]  ;;  %v2411_v24 = vld [vmem:[%s5407_s11 + $0x8] sm:$0xff] }
 0x381   : > { %v1902_v34 = vpop.f32.mrf.mxu2  ;;  %2399 = vmatpush.msrb.mxu0 %v2379_v22  ;;  %v2507_v22 = vld [vmem:[%s5409_s13 + $0x228] sm:$0xff] }
 0x382   : > { %2200 = vmatpush.msrb.mxu3 %v3648_v27  ;;  %v1903_v19 = vadd.f32 %v4423_v21, %v1902_v34  ;;  %2261 = vmatpush.msrb.mxu2 %v3671_v28  ;;  %v3680_v21 = vld [vmem:[%s5446_s29 + $0x268] sm:$0xff] }
 0x383   : > { %3656 = vmatmul.msk.f32.vlgmr.msrb.gmra.mxu3 %vm1994_vm1, %v1971_v30  ;;  %2400 = vmatpush.msrb.mxu0 %v2378_v7  ;;  %v2474_v7 = vld [vmem:[%s5409_s13 + $0x120] sm:$0xff] }
 0x384   : > { %2292 = vmatpush.msra.mxu3 %v3682_v32  ;;  %v1907_v52 = vmax.f32 %v1903_v19, 0.0  ;;  %2262 = vmatpush.msrb.mxu2 %v3670_v35 }
 0x385   : > { %3647 = vmatmul.msk.f32.vlgmr.msra.gmra.mxu2 %vm1994_vm1, %v1970_v37  ;;  %2401 = vmatpush.msrb.mxu0 %v2377_v8  ;;  %v2475_v8 = vld [vmem:[%s5409_s13 + $0x128] sm:$0xff] }
 0x386   : > { %2293 = vmatpush.msra.mxu3 %v3681_v36  ;;  %v1918_v18 = vrot.slane %v1907_v52, 4  ;;  %2263 = vmatpush.msrb.mxu2 %v3669_v38  ;;  %v1917_v42 = vrot.slane %v1907_v52, 2  ;;  %v3598_v45 = vrot.slane %v1907_v52, 9  ;;  %v1919_v31 = vrot.slane %v1907_v52, 6 }
 0x387   : > { %2402 = vmatpush.msrb.mxu0 %v2376_v9  ;;  %v2500_v9 = vld [vmem:[%s5409_s13 + $0x1f0] sm:$0xff] }
 0x388   : > { %2294 = vmatpush.msra.mxu3 %v3680_v21  ;;  %2264 = vmatpush.msrb.mxu2 %v3668_v40  ;;  %v3600_v47 = vrot.slane %v1918_v18, 9  ;;  %v1973_v55 = vmax.f32 %v1907_v52, %v3598_v45  ;;  %v3599_v59 = vrot.slane %v1917_v42, 9  ;;  %v3601_v48 = vrot.slane %v1919_v31, 9  ;;  %v2410_v45 = vld [vmem:[%s5407_s11] sm:$0xff] }
 0x389   : > { %2403 = vmatpush.msrb.mxu0 %v2375_v11  ;;  %v2468_v11 = vld [vmem:[%s5409_s13 + $0xf0] sm:$0xff] }
 0x38a   : > { %2295 = vmatpush.msra.mxu3 %v3679_v26  ;;  %2265 = vmatpush.msrb.mxu2 %v3667_v41  ;;  %v1975_v51 = vmax.f32 %v1918_v18, %v3600_v47  ;;  %v1974_v62 = vmax.f32 %v1917_v42, %v3599_v59  ;;  %v1976_v43 = vmax.f32 %v1919_v31, %v3601_v48  ;;  %v2371_v26 = vld [vmem:[%s5404_s8] sm:$0x1]  ;;  %v2529_v47 = vld [vmem:[%s5409_s13 + $0x2d8] sm:$0xff]  ;;  %v2524_v31 = vld [vmem:[%s5409_s13 + $0x2b0] sm:$0xff] }
 0x38b   : > { %2404 = vmatpush.msrb.mxu0 %v2374_v13  ;;  %2568 = vmatpush.msrb.mxu1 %v2529_v47  ;;  %v2505_v59 = vld [vmem:[%s5409_s13 + $0x218] sm:$0xff]  ;;  %v2518_v48 = vld [vmem:[%s5409_s13 + $0x280] sm:$0xff]  ;;  %v2520_v47 = vld [vmem:[%s5409_s13 + $0x290] sm:$0xff] }
 0x38c   : > { %2296 = vmatpush.msra.mxu3 %v3678_v46  ;;  %2266 = vmatpush.msrb.mxu2 %v3666_v49  ;;  %v2528_v46 = vld [vmem:[%s5409_s13 + $0x2d0] sm:$0xff]  ;;  %v2522_v49 = vld [vmem:[%s5409_s13 + $0x2a0] sm:$0xff]  ;;  %v2469_v13 = vld [vmem:[%s5409_s13 + $0xf8] sm:$0xff] }
 0x38d   : > { %3692 = vmatmul.msk.f32.vlgmr.msra.gmra.mxu1 %vm1994_vm1, %v1975_v51  ;;  %3674 = vmatmul.msk.f32.vlgmr.msrb.gmra.mxu2 %vm1994_vm1, %v1973_v55  ;;  %v2516_v51 = vld [vmem:[%s5409_s13 + $0x270] sm:$0xff]  ;;  %v2510_v55 = vld [vmem:[%s5409_s13 + $0x240] sm:$0xff] }
 0x38e   : > { %2297 = vmatpush.msra.mxu3 %v3677_v50  ;;  %2358 = vmatpush.msra.mxu2 %v3700_v53  ;;  %v2523_v50 = vld [vmem:[%s5409_s13 + $0x2a8] sm:$0xff]  ;;  %v2517_v53 = vld [vmem:[%s5409_s13 + $0x278] sm:$0xff] }
 0x38f   : > { %2405 = vmatpush.msrb.mxu0 %v2373_v54  ;;  %2569 = vmatpush.msrb.mxu1 %v2523_v50  ;;  %v2463_v54 = vld [vmem:[%s5409_s13 + $0xc8] sm:$0xff]  ;;  %v2521_v50 = vld [vmem:[%s5409_s13 + $0x298] sm:$0xff] }
 0x390   : > { %2298 = vmatpush.msra.mxu3 %v3676_v56  ;;  %2359 = vmatpush.msra.mxu2 %v3699_v58  ;;  %v2511_v56 = vld [vmem:[%s5409_s13 + $0x248] sm:$0xff]  ;;  %v2504_v58 = vld [vmem:[%s5409_s13 + $0x210] sm:$0xff] }
 0x391   : > { %2570 = vmatpush.msrb.mxu1 %v2517_v53  ;;  %v2514_v53 = vld [vmem:[%s5409_s13 + $0x260] sm:$0xff] }
 0x392   : > { %2299 = vmatpush.msra.mxu3 %v3675_v60  ;;  %2360 = vmatpush.msra.mxu2 %v3698_v61  ;;  %v2498_v60 = vld [vmem:[%s5409_s13 + $0x1e0] sm:$0xff]  ;;  %v2499_v61 = vld [vmem:[%s5409_s13 + $0x1e8] sm:$0xff] }
 0x393   : > { %3683 = vmatmul.msk.f32.vlgmr.msra.gmra.mxu3 %vm1994_vm1, %v1974_v62  ;;  %2571 = vmatpush.msrb.mxu1 %v2511_v56  ;;  %v2530_v62 = vld [vmem:[%s5409_s13 + $0x2e0] sm:$0xff]  ;;  %v2515_v56 = vld [vmem:[%s5409_s13 + $0x268] sm:$0xff] }
 0x394   : > { %2361 = vmatpush.msra.mxu2 %v3697_v63  ;;  %2548 = vmatpush.msrb.mxu3 %v2528_v46  ;;  %v2531_v63 = vld [vmem:[%s5409_s13 + $0x2e8] sm:$0xff]  ;;  %v2458_v46 = vld [vmem:[%s5409_s13 + $0xa0] sm:$0xff] }
 0x395   : > { %2572 = vmatpush.msrb.mxu1 %v2505_v59  ;;  %2608 = vmatpush.msra.mxu0 %v2531_v63  ;;  %v2509_v59 = vld [vmem:[%s5409_s13 + $0x238] sm:$0xff] }
 0x396   : > { %2362 = vmatpush.msra.mxu2 %v3696_v0  ;;  %2549 = vmatpush.msrb.mxu3 %v2522_v49  ;;  %v2525_v0 = vld [vmem:[%s5409_s13 + $0x2b8] sm:$0xff]  ;;  %v2459_v49 = vld [vmem:[%s5409_s13 + $0xa8] sm:$0xff] }
 0x397   : > { %2573 = vmatpush.msrb.mxu1 %v2499_v61  ;;  %2609 = vmatpush.msra.mxu0 %v2525_v0  ;;  %v2503_v61 = vld [vmem:[%s5409_s13 + $0x208] sm:$0xff]  ;;  %v2497_v63 = vld [vmem:[%s5409_s13 + $0x1d8] sm:$0xff] }
 0x398   : > { %2363 = vmatpush.msra.mxu2 %v3695_v1  ;;  %2550 = vmatpush.msrb.mxu3 %v2516_v51  ;;  %v2492_v1 = vld [vmem:[%s5409_s13 + $0x1b0] sm:$0xff]  ;;  %v2491_v0 = vld [vmem:[%s5409_s13 + $0x1a8] sm:$0xff] }
 0x399   : > { %v2452_v51 = vld [vmem:[%s5409_s13 + $0x70] sm:$0xff] }
 0x39a   : > { %2364 = vmatpush.msra.mxu2 %v3694_v39  ;;  %2551 = vmatpush.msrb.mxu3 %v2510_v55  ;;  %v2493_v39 = vld [vmem:[%s5409_s13 + $0x1b8] sm:$0xff] }
 0x39b   : > { %2574 = vmatpush.msrb.mxu1 %v2493_v39  ;;  %v2453_v55 = vld [vmem:[%s5409_s13 + $0x78] sm:$0xff] }
 0x39c   : > { %2365 = vmatpush.msra.mxu2 %v3693_v2  ;;  %2552 = vmatpush.msrb.mxu3 %v2504_v58  ;;  %v2519_v2 = vld [vmem:[%s5409_s13 + $0x288] sm:$0xff]  ;;  %v2508_v58 = vld [vmem:[%s5409_s13 + $0x230] sm:$0xff]  ;;  %v2485_v39 = vld [vmem:[%s5409_s13 + $0x178] sm:$0xff] }
 0x39d   : > { %3701 = vmatmul.msk.f32.vlgmr.msra.gmra.mxu2 %vm1994_vm1, %v1976_v43  ;;  %v2486_v43 = vld [vmem:[%s5409_s13 + $0x180] sm:$0xff]  ;;  %2610 = vmatpush.msra.mxu0 %v2519_v2  ;;  %v2479_v2 = vld [vmem:[%s5409_s13 + $0x148] sm:$0xff] }
 0x39e   : > { %2430 = vmatpush.msrb.mxu2 %v2413_v20  ;;  %2553 = vmatpush.msrb.mxu3 %v2498_v60  ;;  %v2489_v20 = vld [vmem:[%s5409_s13 + $0x198] sm:$0xff]  ;;  %v2502_v60 = vld [vmem:[%s5409_s13 + $0x200] sm:$0xff] }
 0x39f   : > { %2575 = vmatpush.msrb.mxu1 %v2487_v57  ;;  %2611 = vmatpush.msra.mxu0 %v2513_v3  ;;  %v2447_v57 = vld [vmem:[%s5409_s13 + $0x48] sm:$0xff]  ;;  %v2473_v3 = vld [vmem:[%s5409_s13 + $0x118] sm:$0xff] }
 0x3a0   : > { %2431 = vmatpush.msrb.mxu2 %v2412_v23  ;;  %2554 = vmatpush.msrb.mxu3 %v2492_v1  ;;  %v2456_v23 = vld [vmem:[%s5409_s13 + $0x90] sm:$0xff] }
 0x3a1   : > { %2576 = vmatpush.msrb.mxu1 %v2481_v5  ;;  %2612 = vmatpush.msra.mxu0 %v2507_v22  ;;  %v2484_v1 = vld [vmem:[%s5409_s13 + $0x170] sm:$0xff]  ;;  %v2441_v5 = vld [vmem:[%s5409_s13 + $0x18] sm:$0xff]  ;;  %v2467_v22 = vld [vmem:[%s5409_s13 + $0xe8] sm:$0xff] }
 0x3a2   : > { %2432 = vmatpush.msrb.mxu2 %v2411_v24  ;;  %2555 = vmatpush.msrb.mxu3 %v2486_v43  ;;  %v2457_v24 = vld [vmem:[%s5409_s13 + $0x98] sm:$0xff]  ;;  %v2446_v43 = vld [vmem:[%s5409_s13 + $0x40] sm:$0xff] }
 0x3a3   : > { %2577 = vmatpush.msrb.mxu1 %v2475_v8  ;;  %v2461_v8 = vld [vmem:[%s5409_s13 + $0xb8] sm:$0xff] }
 0x3a4   : > { %2433 = vmatpush.msrb.mxu2 %v2410_v45  ;;  %2556 = vmatpush.msrb.mxu3 %v2480_v4  ;;  %v2527_v45 = vld [vmem:[%s5409_s13 + $0x2c8] sm:$0xff]  ;;  %v2440_v4 = vld [vmem:[%s5409_s13 + $0x10] sm:$0xff] }
 0x3a5   : > { %2578 = vmatpush.msrb.mxu1 %v2469_v13  ;;  %v2449_v13 = vld [vmem:[%s5409_s13 + $0x58] sm:$0xff] }
 0x3a6   : > { %2588 = vmatpush.msra.mxu2 %v2530_v62  ;;  %2557 = vmatpush.msrb.mxu3 %v2474_v7  ;;  %v2496_v62 = vld [vmem:[%s5409_s13 + $0x1d0] sm:$0xff] }
 0x3a7   : > { %2579 = vmatpush.msrb.mxu1 %v2463_v54  ;;  %v2460_v7 = vld [vmem:[%s5409_s13 + $0xb0] sm:$0xff] }
 0x3a8   : > { %2589 = vmatpush.msra.mxu2 %v2524_v31  ;;  %2558 = vmatpush.msrb.mxu3 %v2468_v11  ;;  %v2490_v31 = vld [vmem:[%s5409_s13 + $0x1a0] sm:$0xff]  ;;  %v2448_v11 = vld [vmem:[%s5409_s13 + $0x50] sm:$0xff] }
 0x3a9   : > { %2580 = vmatpush.msrb.mxu1 %v2457_v24 }
 0x3aa   : > { %2590 = vmatpush.msra.mxu2 %v2518_v48  ;;  %v2478_v48 = vld [vmem:[%s5409_s13 + $0x140] sm:$0xff] }
 0x3ac   : > { %2591 = vmatpush.msra.mxu2 %v2512_v44  ;;  %v2472_v44 = vld [vmem:[%s5409_s13 + $0x110] sm:$0xff] }
 0x3ae   : > { %2592 = vmatpush.msra.mxu2 %v2506_v6  ;;  %v2466_v6 = vld [vmem:[%s5409_s13 + $0xe0] sm:$0xff] }
 0x3b0   : > { %2593 = vmatpush.msra.mxu2 %v2500_v9  ;;  %v2454_v9 = vld [vmem:[%s5409_s13 + $0x80] sm:$0xff] }
 0x3e6   : > { %v2015_v10 = vpop.f32.mrf.mxu3  ;;  %v2070_v14 = vpop.f32.mrf.mxu2 }
 0x3ee   : > { %v2038_v15 = vpop.f32.mrf.mxu3 }
 0x3ef   : > { %v2039_v17 = vadd.f32 %v2038_v15, %v2015_v10  ;;  %v2501_v10 = vld [vmem:[%s5409_s13 + $0x1f8] sm:$0xff]  ;;  %v2495_v15 = vld [vmem:[%s5409_s13 + $0x1c8] sm:$0xff] }
 0x3f0   : > { %2613 = vmatpush.msra.mxu0 %v2501_v10  ;;  %v2455_v10 = vld [vmem:[%s5409_s13 + $0x88] sm:$0xff] }
 0x3f1   : > { %v2073_v27 = vadd.f32 %v2070_v14, %v2039_v17  ;;  %v2494_v14 = vld [vmem:[%s5409_s13 + $0x1c0] sm:$0xff]  ;;  %v2488_v17 = vld [vmem:[%s5409_s13 + $0x190] sm:$0xff] }
 0x3f2   : > { %2594 = vmatpush.msra.mxu2 %v2494_v14  ;;  %2614 = vmatpush.msra.mxu0 %v2495_v15  ;;  %v2442_v14 = vld [vmem:[%s5409_s13 + $0x20] sm:$0xff]  ;;  %v2443_v15 = vld [vmem:[%s5409_s13 + $0x28] sm:$0xff] }
 0x3f4   : > { %2595 = vmatpush.msra.mxu2 %v2488_v17  ;;  %2615 = vmatpush.msra.mxu0 %v2489_v20  ;;  %v2534_v20 = vld [vmem:[%s5410_s14] sm:$0x3f] }
 0x3f5   : > { %v2539_v24 = vperm.slane %v2534_v20, 3 }
 0x3f6   : > { %v2103_v25 = vpop.f32.mrf.mxu3 }
 0x3f7   : > { %v2106_v28 = vadd.f32 %v2103_v25, %v2073_v27  ;;  %v2482_v25 = vld [vmem:[%s5409_s13 + $0x160] sm:$0xff]  ;;  %v2483_v27 = vld [vmem:[%s5409_s13 + $0x168] sm:$0xff] }
 0x3f8   : > { %2596 = vmatpush.msra.mxu2 %v2482_v25  ;;  %2616 = vmatpush.msra.mxu0 %v2483_v27 }
 0x3fc   : > { %v2235_v35 = vpop.f32.mrf.mxu1 }
 0x400   : > { %v2136_v16 = vpop.f32.mrf.mxu2 }
 0x401   : > { %v2139_v30 = vadd.f32 %v2136_v16, %v2106_v28  ;;  %v2462_v16 = vld [vmem:[%s5409_s13 + $0xc0] sm:$0xff] }
 0x402   : > { %2559 = vmatpush.msrb.mxu3 %v2462_v16  ;;  %v2450_v28 = vld [vmem:[%s5409_s13 + $0x60] sm:$0xff] }
 0x403   : > { %v2414_v16 = vld [vmem:[%s5408_s12] sm:$0x1] }
 0x404   : > { %2560 = vmatpush.msrb.mxu3 %v2456_v23  ;;  %v2537_v23 = vperm.slane %v2534_v20, 1 }
 0x406   : > { %v2202_v33 = vpop.f32.mrf.mxu3  ;;  %2561 = vmatpush.msrb.mxu3 %v2450_v28 }
 0x408   : > { %v2169_v29 = vpop.f32.mrf.mxu2 }
 0x409   : > { %v2172_v32 = vadd.f32 %v2169_v29, %v2139_v30  ;;  %v2451_v29 = vld [vmem:[%s5409_s13 + $0x68] sm:$0xff]  ;;  %v2476_v30 = vld [vmem:[%s5409_s13 + $0x130] sm:$0xff] }
 0x40a   : > { %v2334_v21 = vpop.f32.mrf.mxu1  ;;  %2581 = vmatpush.msrb.mxu1 %v2451_v29  ;;  %2597 = vmatpush.msra.mxu2 %v2476_v30  ;;  %v2536_v30 = vperm.slane %v2534_v20, 0 }
 0x40b   : > { %v2205_v34 = vadd.f32 %v2202_v33, %v2172_v32  ;;  %v2477_v32 = vld [vmem:[%s5409_s13 + $0x138] sm:$0xff]  ;;  %v2444_v33 = vld [vmem:[%s5409_s13 + $0x30] sm:$0xff] }
 0x40c   : > { %2617 = vmatpush.msra.mxu0 %v2477_v32  ;;  %2562 = vmatpush.msrb.mxu3 %v2444_v33  ;;  %v2538_v32 = vperm.slane %v2534_v20, 2  ;;  %v2541_v33 = vperm.slane %v2534_v20, 5 }
 0x40d   : > { %v2238_v36 = vadd.f32 %v2235_v35, %v2205_v34  ;;  %v2445_v34 = vld [vmem:[%s5409_s13 + $0x38] sm:$0xff]  ;;  %v2389_v35 = vld [vmem:[%s5406_s10] sm:$0x1] }
 0x40e   : > { %2582 = vmatpush.msrb.mxu1 %v2445_v34 }
 0x410   : > { %v2268_v19 = vpop.f32.mrf.mxu2 }
 0x411   : > { %v2271_v38 = vadd.f32 %v2268_v19, %v2238_v36  ;;  %v2470_v19 = vld [vmem:[%s5409_s13 + $0x100] sm:$0xff]  ;;  %v2471_v36 = vld [vmem:[%s5409_s13 + $0x108] sm:$0xff] }
 0x412   : > { %2598 = vmatpush.msra.mxu2 %v2470_v19  ;;  %2618 = vmatpush.msra.mxu0 %v2471_v36 }
 0x416   : > { %v2301_v37 = vpop.f32.mrf.mxu3 }
 0x417   : > { %v2304_v52 = vadd.f32 %v2301_v37, %v2271_v38  ;;  %v2438_v37 = vld [vmem:[%s5409_s13] sm:$0xff]  ;;  %v2439_v38 = vld [vmem:[%s5409_s13 + $0x8] sm:$0xff] }
 0x418   : > { %2563 = vmatpush.msrb.mxu3 %v2438_v37  ;;  %2583 = vmatpush.msrb.mxu1 %v2439_v38 }
 0x419   : > { %v2337_v40 = vadd.f32 %v2334_v21, %v2304_v52  ;;  %v2532_v21 = vld [vmem:[%s5409_s13 + $0x2f0] sm:$0xff] }
 0x41a   : > { %2628 = vmatpush.msra.mxu3 %v2532_v21 }
 0x420   : > { %v2367_v18 = vpop.f32.mrf.mxu2 }
 0x421   : > { %v2370_v41 = vadd.f32 %v2367_v18, %v2337_v40  ;;  %v2533_v18 = vld [vmem:[%s5409_s13 + $0x2f8] sm:$0xff] }
 0x422   : > { %2648 = vmatpush.msra.mxu1 %v2533_v18  ;;  %v2727_v18 = vld [vmem:[%s5413_s17 + $0x38] sm:$0xff] }
 0x423   : > { %v2372_v42 = vadd.f32 %v2371_v26, %v2370_v41  ;;  %v2464_v26 = vld [vmem:[%s5409_s13 + $0xd0] sm:$0xff]  ;;  %v2526_v41 = vld [vmem:[%s5409_s13 + $0x2c0] sm:$0xff] }
 0x424   : > { %2599 = vmatpush.msra.mxu2 %v2464_v26  ;;  %2629 = vmatpush.msra.mxu3 %v2526_v41  ;;  %v2726_v26 = vld [vmem:[%s5413_s17 + $0x30] sm:$0xff]  ;;  %v2725_v41 = vld [vmem:[%s5413_s17 + $0x28] sm:$0xff] }
 0x425   : > { %2406 = vmatmul.f32.vlgmr.msrb.gmra.mxu0 %v2372_v42  ;;  %v2465_v42 = vld [vmem:[%s5409_s13 + $0xd8] sm:$0xff]  ;;  %2649 = vmatpush.msra.mxu1 %v2527_v45 }
 0x426   : > { %2619 = vmatpush.msra.mxu0 %v2465_v42  ;;  %2600 = vmatpush.msra.mxu2 %v2458_v46  ;;  %v2724_v42 = vld [vmem:[%s5413_s17 + $0x20] sm:$0xff]  ;;  %v2723_v45 = vld [vmem:[%s5413_s17 + $0x18] sm:$0xff] }
 0x427   : > { %2630 = vmatpush.msra.mxu3 %v2520_v47  ;;  %2650 = vmatpush.msra.mxu1 %v2521_v50  ;;  %v2719_v46 = vld [vmem:[%s5411_s15 + $0x38] sm:$0xff]  ;;  %v2722_v47 = vld [vmem:[%s5413_s17 + $0x10] sm:$0xff]  ;;  %v2721_v50 = vld [vmem:[%s5413_s17 + $0x8] sm:$0xff] }
 0x428   : > { %2620 = vmatpush.msra.mxu0 %v2459_v49  ;;  %2601 = vmatpush.msra.mxu2 %v2452_v51  ;;  %v2718_v49 = vld [vmem:[%s5411_s15 + $0x30] sm:$0xff]  ;;  %v2717_v51 = vld [vmem:[%s5411_s15 + $0x28] sm:$0xff] }
 0x429   : > { %2631 = vmatpush.msra.mxu3 %v2514_v53  ;;  %2651 = vmatpush.msra.mxu1 %v2515_v56  ;;  %v2720_v53 = vld [vmem:[%s5413_s17] sm:$0xff] }
 0x42a   : > { %2621 = vmatpush.msra.mxu0 %v2453_v55  ;;  %2602 = vmatpush.msra.mxu2 %v2446_v43  ;;  %v2716_v55 = vld [vmem:[%s5411_s15 + $0x20] sm:$0xff] }
 0x42b   : > { %2632 = vmatpush.msra.mxu3 %v2508_v58  ;;  %2652 = vmatpush.msra.mxu1 %v2509_v59  ;;  %v2801_v58 = vld [vmem:[%s5412_s16 + $0x38] sm:$0xff]  ;;  %v2794_v43 = vld [vmem:[%s5412_s16] sm:$0xff] }
 0x42c   : > { %2622 = vmatpush.msra.mxu0 %v2447_v57  ;;  %2603 = vmatpush.msra.mxu2 %v2440_v4  ;;  %v2715_v59 = vld [vmem:[%s5411_s15 + $0x18] sm:$0xff] }
 0x42d   : > { %2633 = vmatpush.msra.mxu3 %v2502_v60  ;;  %2653 = vmatpush.msra.mxu1 %v2503_v61  ;;  %v2800_v60 = vld [vmem:[%s5412_s16 + $0x30] sm:$0xff] }
 0x42e   : > { %2623 = vmatpush.msra.mxu0 %v2441_v5  ;;  %v2714_v61 = vld [vmem:[%s5411_s15 + $0x10] sm:$0xff] }
 0x42f   : > { %2634 = vmatpush.msra.mxu3 %v2496_v62  ;;  %2654 = vmatpush.msra.mxu1 %v2497_v63  ;;  %v2799_v62 = vld [vmem:[%s5412_s16 + $0x28] sm:$0xff] }
 0x430   : > { %2771 = vmatpush.msrb.mxu0 %v2719_v46  ;;  %v2713_v63 = vld [vmem:[%s5411_s15 + $0x8] sm:$0xff] }
 0x431   : > { %2635 = vmatpush.msra.mxu3 %v2490_v31  ;;  %2655 = vmatpush.msra.mxu1 %v2491_v0  ;;  %v2798_v31 = vld [vmem:[%s5412_s16 + $0x20] sm:$0xff] }
 0x432   : > { %2772 = vmatpush.msrb.mxu0 %v2718_v49  ;;  %v2712_v0 = vld [vmem:[%s5411_s15] sm:$0xff] }
 0x433   : > { %2636 = vmatpush.msra.mxu3 %v2484_v1  ;;  %2656 = vmatpush.msra.mxu1 %v2485_v39  ;;  %v2797_v39 = vld [vmem:[%s5412_s16 + $0x18] sm:$0xff] }
 0x434   : > { %2773 = vmatpush.msrb.mxu0 %v2717_v51 }
 0x435   : > { %2637 = vmatpush.msra.mxu3 %v2478_v48  ;;  %2657 = vmatpush.msra.mxu1 %v2479_v2  ;;  %v2796_v48 = vld [vmem:[%s5412_s16 + $0x10] sm:$0xff]  ;;  %v2795_v2 = vld [vmem:[%s5412_s16 + $0x8] sm:$0xff] }
 0x436   : > { %2774 = vmatpush.msrb.mxu0 %v2716_v55 }
 0x437   : > { %2638 = vmatpush.msra.mxu3 %v2472_v44  ;;  %2658 = vmatpush.msra.mxu1 %v2473_v3 }
 0x438   : > { %2775 = vmatpush.msrb.mxu0 %v2715_v59 }
 0x439   : > { %2639 = vmatpush.msra.mxu3 %v2466_v6  ;;  %2659 = vmatpush.msra.mxu1 %v2467_v22 }
 0x43a   : > { %2776 = vmatpush.msrb.mxu0 %v2714_v61 }
 0x43b   : > { %2640 = vmatpush.msra.mxu3 %v2460_v7  ;;  %2660 = vmatpush.msra.mxu1 %v2461_v8 }
 0x43c   : > { %2777 = vmatpush.msrb.mxu0 %v2713_v63 }
 0x43d   : > { %2641 = vmatpush.msra.mxu3 %v2454_v9  ;;  %2661 = vmatpush.msra.mxu1 %v2455_v10  ;;  %v3759_v10 = vld [vmem:[%s5414_s18] ss:$0 sm:$0xff] }
 0x43e   : > { %2778 = vmatpush.msrb.mxu0 %v2712_v0 }
 0x43f   : > { %2642 = vmatpush.msra.mxu3 %v2448_v11  ;;  %2662 = vmatpush.msra.mxu1 %v2449_v13 }
 0x441   : > { %2643 = vmatpush.msra.mxu3 %v2442_v14  ;;  %2663 = vmatpush.msra.mxu1 %v2443_v15 }
 0x4a2   : > { %v2407_v52 = vpop.f32.mrf.mxu0 }
 0x4a3   : > { %v2408_v40 = vadd.f32 %v2407_v52, %v2389_v35  ;;  %v2540_v52 = vperm.slane %v2534_v20, 4 }
 0x4a5   : > { %3702 = vmatmul.msk.f32.vlgmr.msrb.gmra.mxu2 %vm1805_vm9, %v2408_v40 }
 0x4a6   : > { %2742 = vmatpush.msrb.mxu2 %v2727_v18 }
 0x4a8   : > { %2743 = vmatpush.msrb.mxu2 %v2726_v26 }
 0x4aa   : > { %2744 = vmatpush.msrb.mxu2 %v2725_v41 }
 0x4ac   : > { %2745 = vmatpush.msrb.mxu2 %v2724_v42 }
 0x4ae   : > { %2746 = vmatpush.msrb.mxu2 %v2723_v45 }
 0x4b0   : > { %2747 = vmatpush.msrb.mxu2 %v2722_v47 }
 0x4b2   : > { %2748 = vmatpush.msrb.mxu2 %v2721_v50 }
 0x4b4   : > { %2749 = vmatpush.msrb.mxu2 %v2720_v53 }
 0x528   : > { %v2435_v54 = vpop.f32.mrf.mxu2 }
 0x529   : > { %v2436_v17 = vadd.f32 %v2435_v54, %v2414_v16 }
 0x52b   : > { %2564 = vmatmul.f32.vlgmr.msrb.gmra.mxu3 %v2436_v17  ;;  %2584 = vmatmul.f32.vlgmr.msrb.gmra.mxu1 %v2436_v17 }
 0x52c   : > { %2604 = vmatmul.f32.vlgmr.msra.gmra.mxu2 %v2436_v17  ;;  %2624 = vmatmul.f32.vlgmr.msra.gmra.mxu0 %v2436_v17 }
 0x52d   : > { %2813 = vmatpush.msra.mxu2 %v2801_v58 }
 0x52f   : > { %2814 = vmatpush.msra.mxu2 %v2800_v60 }
 0x531   : > { %2815 = vmatpush.msra.mxu2 %v2799_v62 }
 0x533   : > { %2644 = vmatmul.f32.vlgmr.msra.gmra.mxu3 %v2436_v17  ;;  %2664 = vmatmul.f32.vlgmr.msra.gmra.mxu1 %v2436_v17 }
 0x534   : > { %2816 = vmatpush.msra.mxu2 %v2798_v31 }
 0x536   : > { %2817 = vmatpush.msra.mxu2 %v2797_v39  ;;  %v2898_v39 = vld [vmem:[%s5415_s19 + $0x50] sm:$0xff] }
 0x538   : > { %2818 = vmatpush.msra.mxu2 %v2796_v48  ;;  %v2897_v48 = vld [vmem:[%s5415_s19 + $0x48] sm:$0xff] }
 0x53a   : > { %2819 = vmatpush.msra.mxu2 %v2795_v2  ;;  %v2896_v2 = vld [vmem:[%s5415_s19 + $0x40] sm:$0xff] }
 0x53c   : > { %2820 = vmatpush.msra.mxu2 %v2794_v43  ;;  %v2895_v43 = vld [vmem:[%s5415_s19 + $0x38] sm:$0xff] }
 0x5a8   : > { %v2585_v25 = vpop.f32.mrf.mxu1 }
 0x5a9   : > { %v2586_v27 = vadd.f32 %v2585_v25, %v2537_v23  ;;  %v2625_v28 = vpop.f32.mrf.mxu0 }
 0x5aa   : > { %v2626_v29 = vadd.f32 %v2625_v28, %v2539_v24 }
 0x5ab   : > { %2677 = vst.msk [vmem:[#allocation3 + $0x3] sm:$0x1] %vm2668_vm10, %v2586_v27  ;;  %2679 = vrot.lane.b32.xlu1 %v2586_v27, %s5448_s1 }
 0x5ac   : > { %2689 = vst.msk [vmem:[#allocation3 + $0x7] sm:$0x1] %vm2668_vm10, %v2626_v29 }
 0x5ae   : > { %v2565_v34 = vpop.f32.mrf.mxu3 }
 0x5af   : > { %v2566_v35 = vadd.f32 %v2565_v34, %v2536_v30  ;;  %v2605_v19 = vpop.f32.mrf.mxu2 }
 0x5b0   : > { %v2606_v36 = vadd.f32 %v2605_v19, %v2538_v32  ;;  %v2665_v37 = vpop.f32.mrf.mxu1 }
 0x5b1   : > { %2671 = vst.msk [vmem:[#allocation3 + $0x1] sm:$0x1] %vm2668_vm10, %v2566_v35  ;;  %v2666_v38 = vadd.f32 %v2665_v37, %v2541_v33  ;;  %2673 = vrot.lane.b32.xlu0 %v2566_v35, %s5448_s1 }
 0x5b2   : > { %2683 = vst.msk [vmem:[#allocation3 + $0x5] sm:$0x1] %vm2668_vm10, %v2606_v36  ;;  %2685 = vrot.lane.b32.xlu2 %v2606_v36, %s5448_s1 }
 0x5b3   : > { %2701 = vst.msk [vmem:[#allocation3 + $0xb] sm:$0x1] %vm2668_vm10, %v2666_v38 }
 0x5b6   : > { %v2645_v21 = vpop.f32.mrf.mxu3 }
 0x5b7   : > { %v2646_v40 = vadd.f32 %v2645_v21, %v2540_v52 }
 0x5b9   : > { %2695 = vst.msk [vmem:[#allocation3 + $0x9] sm:$0x1] %vm2668_vm10, %v2646_v40  ;;  %2697 = vrot.lane.b32.xlu1 %v2646_v40, %s5448_s1  ;;  %2691 = vrot.lane.b32.xlu0 %v2626_v29, %s5448_s1 }
 0x5ba   : > { %2703 = vrot.lane.b32.xlu2 %v2666_v38, %s5448_s1 }
 0x60c   : > { %v2686_v56 = vpop.permute.xlu2 %2685 }
 0x60d   : > { %2688 = vst.msk [vmem:[#allocation3 + $0x6] sm:$0x1] %vm2668_vm10, %v2686_v56 }
 0x614   : > { %v2704_v1 = vpop.permute.xlu2 %2703 }
 0x615   : > { %2706 = vst.msk [vmem:[#allocation3 + $0xc] sm:$0x1] %vm2668_vm10, %v2704_v1  ;;  %v2899_v1 = vld [vmem:[%s5415_s19 + $0x58] sm:$0xff] }
 0x616   : > { %3011 = vmatpush.msra.mxu0 %v2899_v1 }
 0x618   : > { %3012 = vmatpush.msra.mxu0 %v2898_v39 }
 0x61a   : > { %3013 = vmatpush.msra.mxu0 %v2897_v48 }
 0x61c   : > { %3014 = vmatpush.msra.mxu0 %v2896_v2 }
 0x61d   : > { %v2680_v57 = vpop.permute.xlu1 %2679 }
 0x61e   : > { %2682 = vst.msk [vmem:[#allocation3 + $0x4] sm:$0x1] %vm2668_vm10, %v2680_v57  ;;  %v2894_v57 = vld [vmem:[%s5415_s19 + $0x30] sm:$0xff]  ;;  %3015 = vmatpush.msra.mxu0 %v2895_v43 }
 0x620   : > { %3016 = vmatpush.msra.mxu0 %v2894_v57 }
 0x623   : > { %v2674_v44 = vpop.permute.xlu0 %2673 }
 0x624   : > { %2676 = vst.msk [vmem:[#allocation3 + $0x2] sm:$0x1] %vm2668_vm10, %v2674_v44  ;;  %v2893_v44 = vld [vmem:[%s5415_s19 + $0x28] sm:$0xff] }
 0x625   : > { %3017 = vmatpush.msra.mxu0 %v2893_v44 }
 0x62b   : > { %v2698_v3 = vpop.permute.xlu1 %2697  ;;  %v2692_v4 = vpop.permute.xlu0 %2691  ;;  %v2709_v5 = vld [vmem:[#allocation3] sm:$0xff] }
 0x62c   : > { %2700 = vst.msk [vmem:[#allocation3 + $0xa] sm:$0x1] %vm2668_vm10, %v2698_v3  ;;  %3703 = vmatmul.msk.f32.vlgmr.msrb.gmra.mxu2 %vm1994_vm1, %v2709_v5  ;;  %v2892_v3 = vld [vmem:[%s5415_s19 + $0x20] sm:$0xff]  ;;  %v2891_v5 = vld [vmem:[%s5415_s19 + $0x18] sm:$0xff] }
 0x62d   : > { %2694 = vst.msk [vmem:[#allocation3 + $0x8] sm:$0x1] %vm2668_vm10, %v2692_v4  ;;  %3018 = vmatpush.msra.mxu0 %v2892_v3 }
 0x62f   : > { %3019 = vmatpush.msra.mxu0 %v2891_v5 }
 0x633   : > { %v2708_v7 = vld [vmem:[#allocation3 + $0x9] sm:$0x1f] }
 0x634   : > { %v2710_v6 = vld [vmem:[#allocation3 + $0x8] sm:$0x1f] }
 0x635   : > { %v2707_v22 = vld [vmem:[#allocation3 + $0x1] sm:$0xff]  ;;  %3704 = vmatmul.msk.f32.gmra.mxu2 %vm1994_vm1, %v2710_v6  ;;  %v2711_v8 = vld [vmem:[#allocation3 + $0x9] sm:$0xf] }
 0x636   : > { %3705 = vmatmul.msk.f32.vlgmr.msrb.gmra.mxu0 %vm1994_vm1, %v2707_v22  ;;  %v2890_v6 = vld [vmem:[%s5415_s19 + $0x10] sm:$0xff] }
 0x637   : > { %3020 = vmatpush.msra.mxu0 %v2890_v6 }
 0x63d   : > { %3707 = vmatmul.msk.f32.vlgmr.msra.gmra.mxu2 %vm1994_vm1, %v2707_v22  ;;  %v2889_v22 = vld [vmem:[%s5415_s19 + $0x8] sm:$0xff] }
 0x63e   : > { %3706 = vmatmul.msk.f32.gmra.mxu0 %vm1994_vm1, %v2708_v7 }
 0x63f   : > { %3021 = vmatpush.msra.mxu0 %v2889_v22 }
 0x645   : > { %3708 = vmatmul.msk.f32.gmra.mxu2 %vm1994_vm1, %v2711_v8  ;;  %v2888_v8 = vld [vmem:[%s5415_s19] sm:$0xff]  ;;  %vm2972_vm1 = vcmask 779776  }
 0x646   : > { %3022 = vmatpush.msra.mxu0 %v2888_v8 }
 0x6af   : > { %v2751_v9 = vpop.f32.mrf.mxu2 }
 0x6b3   : > { %v2780_v11 = vpop.f32.mrf.mxu0 }
 0x6b4   : > { %v2781_v13 = vadd.f32 %v2780_v11, %v2751_v9 }
 0x6b6   : > { %v2790_v14 = vadd.f32 %v3759_v10, %v2781_v13 }
 0x6b8   : > { %v2792_v15 = vmax.f32 %v2790_v14, 0.0  ;;  %v2754_v16 = vpop.f32.mrf.mxu2 }
 0x6ba   : > { %v2830_v54 = vperm.slane %v2792_v15, 0  ;;  %v2833_v17 = vperm.slane %v2792_v15, 1  ;;  %v2835_v20 = vperm.slane %v2792_v15, 2  ;;  %v2837_v23 = vperm.slane %v2792_v15, 3 }
 0x6bb   : > { %v2783_v24 = vpop.f32.mrf.mxu0  ;;  %v2839_v25 = vperm.slane %v2792_v15, 4  ;;  %v2841_v28 = vperm.slane %v2792_v15, 5  ;;  %v2843_v29 = vperm.slane %v2792_v15, 6  ;;  %v2845_v32 = vperm.slane %v2792_v15, 7 }
 0x6bc   : > { %2832 = vst.msk [vmem:[#allocation4] sm:$0x3] %vm2831_vm14, %v2830_v54  ;;  %v2784_v27 = vadd.f32 %v2783_v24, %v2754_v16 }
 0x6bd   : > { %2834 = vst.msk [vmem:[#allocation4 + $0x4] sm:$0x3] %vm2831_vm14, %v2833_v17 }
 0x6be   : > { %2836 = vst.msk [vmem:[#allocation4 + $0x8] sm:$0x3] %vm2831_vm14, %v2835_v20  ;;  %v2791_v30 = vadd.f32 %v3759_v10, %v2784_v27 }
 0x6bf   : > { %2838 = vst.msk [vmem:[#allocation4 + $0xc] sm:$0x3] %vm2831_vm14, %v2837_v23 }
 0x6c0   : > { %2840 = vst.msk [vmem:[#allocation4 + $0x10] sm:$0x3] %vm2831_vm14, %v2839_v25  ;;  %v2793_v33 = vmax.f32 %v2791_v30, 0.0  ;;  %v2822_v34 = vpop.f32.mrf.mxu2 }
 0x6c1   : > { %2842 = vst.msk [vmem:[#allocation4 + $0x14] sm:$0x3] %vm2831_vm14, %v2841_v28  ;;  %v2823_v38 = vadd.f32 %v3759_v10, %v2822_v34  ;;  %v5201_v34 = vld [vmem:[%s5416_s20] ss:$0 sm:$0xff] }
 0x6c2   : > { %2844 = vst.msk [vmem:[#allocation4 + $0x18] sm:$0x3] %vm2831_vm14, %v2843_v29  ;;  %v2847_v35 = vperm.slane %v2793_v33, 0  ;;  %v2849_v19 = vperm.slane %v2793_v33, 1  ;;  %v2851_v36 = vperm.slane %v2793_v33, 2  ;;  %v2853_v37 = vperm.slane %v2793_v33, 3 }
 0x6c3   : > { %2846 = vst.msk [vmem:[#allocation4 + $0x1c] sm:$0x3] %vm2831_vm14, %v2845_v32  ;;  %v2855_v52 = vperm.slane %v2793_v33, 4  ;;  %v2828_v21 = vmax.f32 %v2823_v38, 0.0 }
 0x6c4   : > { %2848 = vst.msk [vmem:[#allocation4 + $0x20] sm:$0x3] %vm2831_vm14, %v2847_v35 }
 0x6c5   : > { %2850 = vst.msk [vmem:[#allocation4 + $0x24] sm:$0x3] %vm2831_vm14, %v2849_v19  ;;  %v2857_v40 = vperm.slane %v2828_v21, 0  ;;  %v2859_v18 = vperm.slane %v2828_v21, 1  ;;  %v2861_v26 = vperm.slane %v2828_v21, 2  ;;  %v2863_v41 = vperm.slane %v2828_v21, 3 }
 0x6c6   : > { %2852 = vst.msk [vmem:[#allocation4 + $0x28] sm:$0x3] %vm2831_vm14, %v2851_v36  ;;  %v2865_v42 = vperm.slane %v2828_v21, 4  ;;  %v2867_v46 = vperm.slane %v2828_v21, 5  ;;  %v2869_v49 = vperm.slane %v2828_v21, 6  ;;  %v2871_v50 = vperm.slane %v2828_v21, 7 }
 0x6c7   : > { %2854 = vst.msk [vmem:[#allocation4 + $0x2c] sm:$0x3] %vm2831_vm14, %v2853_v37 }
 0x6c8   : > { %2856 = vst.msk [vmem:[#allocation4 + $0x30] sm:$0x3] %vm2831_vm14, %v2855_v52  ;;  %v2825_v45 = vpop.f32.mrf.mxu2 }
 0x6c9   : > { %2858 = vst.msk [vmem:[#allocation4 + $0x2] sm:$0x3] %vm2831_vm14, %v2857_v40  ;;  %v2826_v47 = vadd.f32 %v3759_v10, %v2825_v45 }
 0x6ca   : > { %2860 = vst.msk [vmem:[#allocation4 + $0x6] sm:$0x3] %vm2831_vm14, %v2859_v18 }
 0x6cb   : > { %2862 = vst.msk [vmem:[#allocation4 + $0xa] sm:$0x3] %vm2831_vm14, %v2861_v26  ;;  %v2829_v51 = vmax.f32 %v2826_v47, 0.0 }
 0x6cc   : > { %2864 = vst.msk [vmem:[#allocation4 + $0xe] sm:$0x3] %vm2831_vm14, %v2863_v41 }
 0x6cd   : > { %2866 = vst.msk [vmem:[#allocation4 + $0x12] sm:$0x3] %vm2831_vm14, %v2865_v42  ;;  %v2873_v53 = vperm.slane %v2829_v51, 0  ;;  %v2875_v55 = vperm.slane %v2829_v51, 1  ;;  %v2877_v56 = vperm.slane %v2829_v51, 2  ;;  %v2879_v58 = vperm.slane %v2829_v51, 3 }
 0x6ce   : > { %2868 = vst.msk [vmem:[#allocation4 + $0x16] sm:$0x3] %vm2831_vm14, %v2867_v46 }
 0x6cf   : > { %2870 = vst.msk [vmem:[#allocation4 + $0x1a] sm:$0x3] %vm2831_vm14, %v2869_v49  ;;  %v2887_v62 = vld [vmem:[#allocation4 + $0x30] sm:$0x3] }
 0x6d0   : > { %2872 = vst.msk [vmem:[#allocation4 + $0x1e] sm:$0x3] %vm2831_vm14, %v2871_v50 }
 0x6d1   : > { %2874 = vst.msk [vmem:[#allocation4 + $0x22] sm:$0x3] %vm2831_vm14, %v2873_v53  ;;  %v2881_v59 = vld [vmem:[#allocation4] sm:$0xff] }
 0x6d2   : > { %2876 = vst.msk [vmem:[#allocation4 + $0x26] sm:$0x3] %vm2831_vm14, %v2875_v55  ;;  %2944 = vrot.lane.b32.xlu2 %v2881_v59, %s5448_s1  ;;  %2915 = vrot.lane.b32.xlu0 %v2881_v59, %s5449_s6 }
 0x6d3   : > { %2878 = vst.msk [vmem:[#allocation4 + $0x2a] sm:$0x3] %vm2831_vm14, %v2877_v56  ;;  %v2882_v60 = vld [vmem:[#allocation4 + $0x8] sm:$0xff] }
 0x6d4   : > { %2880 = vst.msk [vmem:[#allocation4 + $0x2e] sm:$0x3] %vm2831_vm14, %v2879_v58  ;;  %2917 = vrot.lane.b32.xlu1 %v2882_v60, %s5449_s6 }
 0x6d5   : > { %2902 = vst.msk [vmem:[#allocation2 + $0x9] sm:$0xff] %vm1805_vm9, %v2882_v60  ;;  %v2883_v61 = vld [vmem:[#allocation4 + $0x10] sm:$0xff] }
 0x6d6   : > { %2901 = vst.msk [vmem:[#allocation2 + $0x1] sm:$0xff] %vm1805_vm9, %v2881_v59 }
 0x6d7   : > { %2903 = vst.msk [vmem:[#allocation2 + $0x11] sm:$0xff] %vm1805_vm9, %v2883_v61  ;;  %v2884_v63 = vld [vmem:[#allocation4 + $0x18] sm:$0xff] }
 0x6d8   : > { %2904 = vst.msk [vmem:[#allocation2 + $0x19] sm:$0xff] %vm1805_vm9, %v2884_v63 }
 0x6d9   : > { %v2885_v31 = vld [vmem:[#allocation4 + $0x20] sm:$0xff]  ;;  %2907 = vst.msk [vmem:[#allocation2 + $0x31] sm:$0x1] %vm1734_vm7, %v2887_v62  ;;  %vm2965_vm7 = vcmask 785921  }
 0x6da   : > { %2948 = vrot.lane.b32.xlu2 %v2883_v61, %s5448_s1  ;;  %2946 = vrot.lane.b32.xlu0 %v2882_v60, %s5448_s1  ;;  %2905 = vst.msk [vmem:[#allocation2 + $0x21] sm:$0xff] %vm1805_vm9, %v2885_v31 }
 0x6db   : > { %v2886_v0 = vld [vmem:[#allocation4 + $0x28] sm:$0xff] }
 0x6dc   : > { %2919 = vrot.lane.b32.xlu1 %v2883_v61, %s5449_s6  ;;  %2906 = vst.msk [vmem:[#allocation2 + $0x29] sm:$0xff] %vm1805_vm9, %v2886_v0  ;;  %vm2942_vm9 = vcmask 517376  }
 0x6e2   : > { %2923 = vrot.lane.b32.xlu2 %v2885_v31, %s5449_s6  ;;  %2921 = vrot.lane.b32.xlu0 %v2884_v63, %s5449_s6 }
 0x6e4   : > { %2950 = vrot.lane.b32.xlu1 %v2884_v63, %s5448_s1 }
 0x6ea   : > { %2954 = vrot.lane.b32.xlu2 %v2886_v0, %s5448_s1  ;;  %2952 = vrot.lane.b32.xlu0 %v2885_v31, %s5448_s1 }
 0x6ec   : > { %2925 = vrot.lane.b32.xlu1 %v2886_v0, %s5449_s6 }
 0x6f2   : > { %2927 = vrot.lane.b32.xlu0 %v2887_v62, %s5449_s6 }
 0x6f4   : > { %2956 = vrot.lane.b32.xlu1 %v2887_v62, %s5448_s1  ;;  %s3741_s1 = smul.u32 104, %s5452_s30 }
 0x6f6   : > { %s5366_s2 = scalar_lea.vmem %s5419_s23, %s3741_s1 }
 0x72c   : > { %v2945_v4 = vpop.permute.xlu2 %2944 }
 0x734   : > { %v2949_v7 = vpop.permute.xlu2 %2948 }
 0x73c   : > { %v2924_v9 = vpop.permute.xlu2 %2923 }
 0x73d   : > { %2940 = vst.msk [vmem:[#allocation2 + $0x20] sm:$0xff] %vm1822_vm11, %v2924_v9 }
 0x744   : > { %v2916_v10 = vpop.permute.xlu0 %2915  ;;  %v2955_v24 = vpop.permute.xlu2 %2954 }
 0x745   : > { %2936 = vst.msk [vmem:[#allocation2] sm:$0xff] %vm1822_vm11, %v2916_v10 }
 0x746   : > { %v2918_v11 = vpop.permute.xlu1 %2917  ;;  %2966 = vst.msk [vmem:[#allocation2 - $0x1] sm:$0xfe] %vm2965_vm7, %v2945_v4 }
 0x747   : > { %2937 = vst.msk [vmem:[#allocation2 + $0x8] sm:$0xff] %vm1822_vm11, %v2918_v11 }
 0x74c   : > { %v2947_v13 = vpop.permute.xlu0 %2946 }
 0x74d   : > { %2967 = vst.msk [vmem:[#allocation2 + $0x7] sm:$0xff] %vm1855_vm12, %v2947_v13 }
 0x74e   : > { %v2920_v14 = vpop.permute.xlu1 %2919 }
 0x74f   : > { %2938 = vst.msk [vmem:[#allocation2 + $0x10] sm:$0xff] %vm1822_vm11, %v2920_v14 }
 0x750   : > { %2968 = vst.msk [vmem:[#allocation2 + $0xf] sm:$0xff] %vm1855_vm12, %v2949_v7 }
 0x754   : > { %v2922_v15 = vpop.permute.xlu0 %2921  ;;  %v2975_v16 = vld [vmem:[#allocation2] sm:$0xff] }
 0x755   : > { %2939 = vst.msk [vmem:[#allocation2 + $0x18] sm:$0xff] %vm1822_vm11, %v2922_v15  ;;  %3709 = vmatmul.msk.f32.vlgmr.msra.gmra.mxu0 %vm1869_vm13, %v2975_v16 }
 0x756   : > { %v2951_v54 = vpop.permute.xlu1 %2950  ;;  %3172 = vst.msk [vmem:[#allocation2] sm:$0x1] %vm1259_vm8, %v3772_v12  ;;  %vm3053_vm8 = vcmask 123904  }
 0x757   : > { %2969 = vst.msk [vmem:[#allocation2 + $0x17] sm:$0xff] %vm1855_vm12, %v2951_v54  ;;  %v2976_v20 = vld [vmem:[#allocation2 + $0x8] sm:$0xff] }
 0x75c   : > { %v2953_v17 = vpop.permute.xlu0 %2952 }
 0x75d   : > { %2970 = vst.msk [vmem:[#allocation2 + $0x1f] sm:$0xff] %vm1855_vm12, %v2953_v17  ;;  %3710 = vmatmul.msk.f32.gmra.mxu0 %vm1869_vm13, %v2976_v20 }
 0x75e   : > { %v2926_v23 = vpop.permute.xlu1 %2925  ;;  %v2977_v27 = vld [vmem:[#allocation2 + $0x10] sm:$0xff] }
 0x75f   : > { %2941 = vst.msk [vmem:[#allocation2 + $0x28] sm:$0xff] %vm1822_vm11, %v2926_v23  ;;  %vm3185_vm11 = vcmask 124928  }
 0x760   : > { %2971 = vst.msk [vmem:[#allocation2 + $0x27] sm:$0xff] %vm1855_vm12, %v2955_v24  ;;  %vm3305_vm12 = vcmask 388352  }
 0x764   : > { %v2928_v25 = vpop.permute.xlu0 %2927  ;;  %v2978_v29 = vld [vmem:[#allocation2 + $0x18] sm:$0xff] }
 0x765   : > { %2943 = vst.msk [vmem:[#allocation2 + $0x30] sm:$0x3] %vm2942_vm9, %v2928_v25  ;;  %3711 = vmatmul.msk.f32.gmra.mxu0 %vm1869_vm13, %v2977_v27 }
 0x766   : > { %v2957_v28 = vpop.permute.xlu1 %2956  ;;  %2974 = vst.msk [vmem:[#allocation2 + $0x31] sm:$0x1] %vm1860_vm15, %v3772_v12 }
 0x767   : > { %2973 = vst.msk [vmem:[#allocation2 + $0x2f] sm:$0x3] %vm2972_vm1, %v2957_v28  ;;  %v2979_v30 = vld [vmem:[#allocation2 + $0x20] sm:$0xff] }
 0x76d   : > { %3712 = vmatmul.msk.f32.gmra.mxu0 %vm1869_vm13, %v2978_v29 }
 0x76e   : > { %v2980_v32 = vld [vmem:[#allocation2 + $0x28] sm:$0xff]  ;;  %v2981_v33 = vld [vmem:[#allocation2 + $0x30] sm:$0x3] }
 0x775   : > { %3713 = vmatmul.msk.f32.gmra.mxu0 %vm1869_vm13, %v2979_v30 }
 0x77d   : > { %3714 = vmatmul.msk.f32.gmra.mxu0 %vm1869_vm13, %v2980_v32 }
 0x785   : > { %3715 = vmatmul.msk.f32.gmra.mxu0 %vm1869_vm13, %v2981_v33 }
 0x7d2   : > { %v3024_v35 = vpop.f32.mrf.mxu0 }
 0x7d3   : > { %v3025_v19 = vadd.f32 %v5201_v34, %v3024_v35 }
 0x7d5   : > { %v3045_v36 = vmax.f32 %v3025_v19, 0.0 }
 0x7d7   : > { %v3052_v37 = vperm.slane %v3045_v36, 0  ;;  %v3061_v38 = vperm.slane %v3045_v36, 4  ;;  %v3063_v52 = vperm.slane %v3045_v36, 5  ;;  %v3065_v21 = vperm.slane %v3045_v36, 6 }
 0x7d8   : > { %v3067_v40 = vperm.slane %v3045_v36, 7  ;;  %v3055_v18 = vperm.slane %v3045_v36, 1  ;;  %v3057_v41 = vperm.slane %v3045_v36, 2  ;;  %v3059_v45 = vperm.slane %v3045_v36, 3 }
 0x7d9   : > { %3054 = vst.msk [vmem:[#allocation4] sm:$0x3] %vm3053_vm8, %v3052_v37 }
 0x7da   : > { %v3027_v26 = vpop.f32.mrf.mxu0  ;;  %3062 = vst.msk [vmem:[#allocation4 + $0x8] sm:$0x3] %vm3053_vm8, %v3061_v38 }
 0x7db   : > { %v3028_v42 = vadd.f32 %v5201_v34, %v3027_v26  ;;  %3064 = vst.msk [vmem:[#allocation4 + $0xa] sm:$0x3] %vm3053_vm8, %v3063_v52 }
 0x7dc   : > { %3066 = vst.msk [vmem:[#allocation4 + $0xc] sm:$0x3] %vm3053_vm8, %v3065_v21 }
 0x7dd   : > { %v3046_v46 = vmax.f32 %v3028_v42, 0.0  ;;  %3068 = vst.msk [vmem:[#allocation4 + $0xe] sm:$0x3] %vm3053_vm8, %v3067_v40 }
 0x7de   : > { %3056 = vst.msk [vmem:[#allocation4 + $0x2] sm:$0x3] %vm3053_vm8, %v3055_v18 }
 0x7df   : > { %v3069_v47 = vperm.slane %v3046_v46, 0  ;;  %v3071_v49 = vperm.slane %v3046_v46, 1  ;;  %v3073_v50 = vperm.slane %v3046_v46, 2  ;;  %3058 = vst.msk [vmem:[#allocation4 + $0x4] sm:$0x3] %vm3053_vm8, %v3057_v41  ;;  %v3075_v51 = vperm.slane %v3046_v46, 3 }
 0x7e0   : > { %3060 = vst.msk [vmem:[#allocation4 + $0x6] sm:$0x3] %vm3053_vm8, %v3059_v45  ;;  %v3077_v53 = vperm.slane %v3046_v46, 4  ;;  %v3079_v56 = vperm.slane %v3046_v46, 5  ;;  %v3081_v59 = vperm.slane %v3046_v46, 6  ;;  %v3083_v61 = vperm.slane %v3046_v46, 7 }
 0x7e1   : > { %3070 = vst.msk [vmem:[#allocation4 + $0x10] sm:$0x3] %vm3053_vm8, %v3069_v47 }
 0x7e2   : > { %3072 = vst.msk [vmem:[#allocation4 + $0x12] sm:$0x3] %vm3053_vm8, %v3071_v49  ;;  %v3030_v55 = vpop.f32.mrf.mxu0 }
 0x7e3   : > { %3074 = vst.msk [vmem:[#allocation4 + $0x14] sm:$0x3] %vm3053_vm8, %v3073_v50  ;;  %v3031_v58 = vadd.f32 %v5201_v34, %v3030_v55 }
 0x7e4   : > { %v3154_v60 = vld [vmem:[#allocation4 + $0x8] sm:$0xff]  ;;  %3076 = vst.msk [vmem:[#allocation4 + $0x16] sm:$0x3] %vm3053_vm8, %v3075_v51 }
 0x7e5   : > { %3202 = vrot.lane.b32.xlu0 %v3154_v60, %s5450_s24  ;;  %3174 = vst.msk [vmem:[#allocation2 + $0x9] sm:$0xff] %vm1409_vm2, %v3154_v60  ;;  %v3047_v62 = vmax.f32 %v3031_v58, 0.0  ;;  %v3171_v58 = vld [vmem:[%s5417_s21 + $0x28] sm:$0xff] }
 0x7e6   : > { %3078 = vst.msk [vmem:[#allocation4 + $0x18] sm:$0x3] %vm3053_vm8, %v3077_v53  ;;  %3374 = vmatpush.msrb.mxu1 %v3171_v58  ;;  %3734 = vmatpush.msrb.mxu3 %v3171_v58 }
 0x7e7   : > { %3080 = vst.msk [vmem:[#allocation4 + $0x1a] sm:$0x3] %vm3053_vm8, %v3079_v56  ;;  %v3153_v63 = vld [vmem:[#allocation4] sm:$0xff]  ;;  %v3085_v31 = vperm.slane %v3047_v62, 0  ;;  %v3087_v0 = vperm.slane %v3047_v62, 1  ;;  %v3089_v1 = vperm.slane %v3047_v62, 2 }
 0x7e8   : > { %3082 = vst.msk [vmem:[#allocation4 + $0x1c] sm:$0x3] %vm3053_vm8, %v3081_v59  ;;  %3253 = vrot.lane.b32.xlu1 %v3153_v63, %s5449_s6  ;;  %3200 = vrot.lane.b32.xlu2 %v3153_v63, %s5450_s24  ;;  %v3091_v39 = vperm.slane %v3047_v62, 3  ;;  %v3093_v2 = vperm.slane %v3047_v62, 4  ;;  %v3095_v44 = vperm.slane %v3047_v62, 5  ;;  %v3097_v3 = vperm.slane %v3047_v62, 6 }
 0x7e9   : > { %3084 = vst.msk [vmem:[#allocation4 + $0x1e] sm:$0x3] %vm3053_vm8, %v3083_v61  ;;  %v3099_v5 = vperm.slane %v3047_v62, 7  ;;  %v3170_v59 = vld [vmem:[%s5417_s21 + $0x20] sm:$0xff]  ;;  %v3168_v61 = vld [vmem:[%s5417_s21 + $0x10] sm:$0xff]  ;;  %v3167_v62 = vld [vmem:[%s5417_s21 + $0x8] sm:$0xff] }
 0x7ea   : > { %3173 = vst.msk [vmem:[#allocation2 + $0x1] sm:$0xff] %vm1409_vm2, %v3153_v63  ;;  %v3033_v48 = vpop.f32.mrf.mxu0  ;;  %3375 = vmatpush.msrb.mxu1 %v3170_v59  ;;  %3735 = vmatpush.msrb.mxu3 %v3170_v59 }
 0x7eb   : > { %3086 = vst.msk [vmem:[#allocation4 + $0x20] sm:$0x3] %vm3053_vm8, %v3085_v31  ;;  %v3155_v43 = vld [vmem:[#allocation4 + $0x10] sm:$0xff]  ;;  %v3034_v57 = vadd.f32 %v5201_v34, %v3033_v48  ;;  %v3166_v31 = vld [vmem:[%s5417_s21] sm:$0xff] }
 0x7ec   : > { %3088 = vst.msk [vmem:[#allocation4 + $0x22] sm:$0x3] %vm3053_vm8, %v3087_v0 }
 0x7ed   : > { %3090 = vst.msk [vmem:[#allocation4 + $0x24] sm:$0x3] %vm3053_vm8, %v3089_v1  ;;  %3257 = vrot.lane.b32.xlu0 %v3155_v43, %s5449_s6  ;;  %v3048_v4 = vmax.f32 %v3034_v57, 0.0 }
 0x7ee   : > { %3092 = vst.msk [vmem:[#allocation4 + $0x26] sm:$0x3] %vm3053_vm8, %v3091_v39 }
 0x7ef   : > { %3094 = vst.msk [vmem:[#allocation4 + $0x28] sm:$0x3] %vm3053_vm8, %v3093_v2  ;;  %v3101_v6 = vperm.slane %v3048_v4, 0  ;;  %v3103_v22 = vperm.slane %v3048_v4, 1  ;;  %v3105_v7 = vperm.slane %v3048_v4, 2  ;;  %v3107_v9 = vperm.slane %v3048_v4, 3 }
 0x7f0   : > { %3096 = vst.msk [vmem:[#allocation4 + $0x2a] sm:$0x3] %vm3053_vm8, %v3095_v44  ;;  %3255 = vrot.lane.b32.xlu2 %v3154_v60, %s5449_s6  ;;  %v3109_v11 = vperm.slane %v3048_v4, 4  ;;  %v3111_v13 = vperm.slane %v3048_v4, 5  ;;  %v3113_v15 = vperm.slane %v3048_v4, 6  ;;  %v3115_v16 = vperm.slane %v3048_v4, 7 }
 0x7f1   : > { %3098 = vst.msk [vmem:[#allocation4 + $0x2c] sm:$0x3] %vm3053_vm8, %v3097_v3  ;;  %v3169_v60 = vld [vmem:[%s5417_s21 + $0x18] sm:$0xff] }
 0x7f2   : > { %3100 = vst.msk [vmem:[#allocation4 + $0x2e] sm:$0x3] %vm3053_vm8, %v3099_v5  ;;  %v3036_v8 = vpop.f32.mrf.mxu0  ;;  %3376 = vmatpush.msrb.mxu1 %v3169_v60  ;;  %3736 = vmatpush.msrb.mxu3 %v3169_v60 }
 0x7f3   : > { %3175 = vst.msk [vmem:[#allocation2 + $0x11] sm:$0xff] %vm1409_vm2, %v3155_v43  ;;  %v3037_v10 = vadd.f32 %v5201_v34, %v3036_v8 }
 0x7f4   : > { %3102 = vst.msk [vmem:[#allocation4 + $0x30] sm:$0x3] %vm3053_vm8, %v3101_v6  ;;  %3377 = vmatpush.msrb.mxu1 %v3168_v61  ;;  %3737 = vmatpush.msrb.mxu3 %v3168_v61 }
 0x7f5   : > { %3104 = vst.msk [vmem:[#allocation4 + $0x32] sm:$0x3] %vm3053_vm8, %v3103_v22  ;;  %v3049_v14 = vmax.f32 %v3037_v10, 0.0  ;;  %v3157_v51 = vld [vmem:[#allocation4 + $0x20] sm:$0xff] }
 0x7f6   : > { %3106 = vst.msk [vmem:[#allocation4 + $0x34] sm:$0x3] %vm3053_vm8, %v3105_v7  ;;  %3378 = vmatpush.msrb.mxu1 %v3167_v62  ;;  %3738 = vmatpush.msrb.mxu3 %v3167_v62 }
 0x7f7   : > { %3108 = vst.msk [vmem:[#allocation4 + $0x36] sm:$0x3] %vm3053_vm8, %v3107_v9  ;;  %v3117_v54 = vperm.slane %v3049_v14, 0  ;;  %v3119_v17 = vperm.slane %v3049_v14, 1  ;;  %v3121_v20 = vperm.slane %v3049_v14, 2  ;;  %v3123_v24 = vperm.slane %v3049_v14, 3 }
 0x7f8   : > { %3110 = vst.msk [vmem:[#allocation4 + $0x38] sm:$0x3] %vm3053_vm8, %v3109_v11  ;;  %3204 = vrot.lane.b32.xlu2 %v3155_v43, %s5450_s24  ;;  %v3125_v27 = vperm.slane %v3049_v14, 4  ;;  %v3127_v28 = vperm.slane %v3049_v14, 5  ;;  %v3129_v29 = vperm.slane %v3049_v14, 6  ;;  %v3131_v33 = vperm.slane %v3049_v14, 7  ;;  %3379 = vmatpush.msrb.mxu1 %v3166_v31 }
 0x7f9   : > { %3112 = vst.msk [vmem:[#allocation4 + $0x3a] sm:$0x3] %vm3053_vm8, %v3111_v13  ;;  %v3158_v53 = vld [vmem:[#allocation4 + $0x28] sm:$0xff]  ;;  %3739 = vmatpush.msrb.mxu3 %v3166_v31 }
 0x7fa   : > { %3114 = vst.msk [vmem:[#allocation4 + $0x3c] sm:$0x3] %vm3053_vm8, %v3113_v15  ;;  %v3039_v23 = vpop.f32.mrf.mxu0 }
 0x7fb   : > { %3116 = vst.msk [vmem:[#allocation4 + $0x3e] sm:$0x3] %vm3053_vm8, %v3115_v16  ;;  %v3040_v25 = vadd.f32 %v5201_v34, %v3039_v23 }
 0x7fc   : > { %3118 = vst.msk [vmem:[#allocation4 + $0x40] sm:$0x3] %vm3053_vm8, %v3117_v54 }
 0x7fd   : > { %3120 = vst.msk [vmem:[#allocation4 + $0x42] sm:$0x3] %vm3053_vm8, %v3119_v17  ;;  %v3050_v32 = vmax.f32 %v3040_v25, 0.0 }
 0x7fe   : > { %3122 = vst.msk [vmem:[#allocation4 + $0x44] sm:$0x3] %vm3053_vm8, %v3121_v20  ;;  %v5253_v30 = vld [vmem:[#allocation4 + $0x30] sm:$0xff] }
 0x7ff   : > { %3124 = vst.msk [vmem:[#allocation4 + $0x46] sm:$0x3] %vm3053_vm8, %v3123_v24  ;;  %3212 = vrot.lane.b32.xlu0 %v5253_v30, %s5450_s24  ;;  %v3133_v19 = vperm.slane %v3050_v32, 0  ;;  %v3135_v37 = vperm.slane %v3050_v32, 1  ;;  %v3137_v38 = vperm.slane %v3050_v32, 2  ;;  %v3139_v21 = vperm.slane %v3050_v32, 3 }
 0x800   : > { %3126 = vst.msk [vmem:[#allocation4 + $0x48] sm:$0x3] %vm3053_vm8, %v3125_v27  ;;  %v3141_v40 = vperm.slane %v3050_v32, 4  ;;  %v3143_v26 = vperm.slane %v3050_v32, 5  ;;  %v3145_v41 = vperm.slane %v3050_v32, 6  ;;  %v3147_v45 = vperm.slane %v3050_v32, 7 }
 0x801   : > { %3128 = vst.msk [vmem:[#allocation4 + $0x4a] sm:$0x3] %vm3053_vm8, %v3127_v28 }
 0x802   : > { %3130 = vst.msk [vmem:[#allocation4 + $0x4c] sm:$0x3] %vm3053_vm8, %v3129_v29  ;;  %v3160_v35 = vld [vmem:[#allocation4 + $0x38] sm:$0xff]  ;;  %v3042_v36 = vpop.f32.mrf.mxu0 }
 0x803   : > { %3132 = vst.msk [vmem:[#allocation4 + $0x4e] sm:$0x3] %vm3053_vm8, %v3131_v33  ;;  %3214 = vrot.lane.b32.xlu1 %v3160_v35, %s5450_s24  ;;  %v3043_v52 = vadd.f32 %v5201_v34, %v3042_v36  ;;  %v3156_v34 = vld [vmem:[#allocation4 + $0x18] sm:$0xff] }
 0x804   : > { %3179 = vst.msk [vmem:[#allocation2 + $0x31] sm:$0xff] %vm1409_vm2, %v5253_v30 }
 0x805   : > { %3180 = vst.msk [vmem:[#allocation2 + $0x39] sm:$0xff] %vm1409_vm2, %v3160_v35  ;;  %v3051_v42 = vmax.f32 %v3043_v52, 0.0 }
 0x806   : > { %3134 = vst.msk [vmem:[#allocation4 + $0x50] sm:$0x3] %vm3053_vm8, %v3133_v19  ;;  %v3161_v18 = vld [vmem:[#allocation4 + $0x40] sm:$0xff] }
 0x807   : > { %3136 = vst.msk [vmem:[#allocation4 + $0x52] sm:$0x3] %vm3053_vm8, %v3135_v37  ;;  %3267 = vrot.lane.b32.xlu0 %v3160_v35, %s5449_s6  ;;  %3216 = vrot.lane.b32.xlu2 %v3161_v18, %s5450_s24  ;;  %v3149_v46 = vperm.slane %v3051_v42, 0  ;;  %v3151_v47 = vperm.slane %v3051_v42, 1 }
 0x808   : > { %3138 = vst.msk [vmem:[#allocation4 + $0x54] sm:$0x3] %vm3053_vm8, %v3137_v38  ;;  %v3761_v38 = vld [vmem:[%s5418_s22] ss:$0 sm:$0xff] }
 0x809   : > { %3140 = vst.msk [vmem:[#allocation4 + $0x56] sm:$0x3] %vm3053_vm8, %v3139_v21 }
 0x80a   : > { %3142 = vst.msk [vmem:[#allocation4 + $0x58] sm:$0x3] %vm3053_vm8, %v3141_v40  ;;  %v3162_v49 = vld [vmem:[#allocation4 + $0x48] sm:$0xff] }
 0x80b   : > { %3144 = vst.msk [vmem:[#allocation4 + $0x5a] sm:$0x3] %vm3053_vm8, %v3143_v26  ;;  %3259 = vrot.lane.b32.xlu1 %v3156_v34, %s5449_s6 }
 0x80c   : > { %3146 = vst.msk [vmem:[#allocation4 + $0x5c] sm:$0x3] %vm3053_vm8, %v3145_v41 }
 0x80d   : > { %3148 = vst.msk [vmem:[#allocation4 + $0x5e] sm:$0x3] %vm3053_vm8, %v3147_v45 }
 0x80e   : > { %3176 = vst.msk [vmem:[#allocation2 + $0x19] sm:$0xff] %vm1409_vm2, %v3156_v34 }
 0x80f   : > { %3181 = vst.msk [vmem:[#allocation2 + $0x41] sm:$0xff] %vm1409_vm2, %v3161_v18  ;;  %3206 = vrot.lane.b32.xlu0 %v3156_v34, %s5450_s24  ;;  %3271 = vrot.lane.b32.xlu2 %v3162_v49, %s5449_s6 }
 0x810   : > { %3150 = vst.msk [vmem:[#allocation4 + $0x60] sm:$0x3] %vm3053_vm8, %v3149_v46  ;;  %v3163_v50 = vld [vmem:[#allocation4 + $0x50] sm:$0xff] }
 0x811   : > { %3152 = vst.msk [vmem:[#allocation4 + $0x62] sm:$0x3] %vm3053_vm8, %v3151_v47 }
 0x812   : > { %3182 = vst.msk [vmem:[#allocation2 + $0x49] sm:$0xff] %vm1409_vm2, %v3162_v49 }
 0x813   : > { %3269 = vrot.lane.b32.xlu1 %v3161_v18, %s5449_s6  ;;  %3183 = vst.msk [vmem:[#allocation2 + $0x51] sm:$0xff] %vm1409_vm2, %v3163_v50 }
 0x814   : > { %v3164_v55 = vld [vmem:[#allocation4 + $0x58] sm:$0xff]  ;;  %3177 = vst.msk [vmem:[#allocation2 + $0x21] sm:$0xff] %vm1409_vm2, %v3157_v51 }
 0x815   : > { %3184 = vst.msk [vmem:[#allocation2 + $0x59] sm:$0xff] %vm1409_vm2, %v3164_v55 }
 0x816   : > { %3178 = vst.msk [vmem:[#allocation2 + $0x29] sm:$0xff] %vm1409_vm2, %v3158_v53  ;;  %vm3292_vm2 = vcmask 392449  }
 0x817   : > { %3273 = vrot.lane.b32.xlu0 %v3163_v50, %s5449_s6  ;;  %3220 = vrot.lane.b32.xlu2 %v3163_v50, %s5450_s24 }
 0x818   : > { %v3165_v56 = vld [vmem:[#allocation4 + $0x60] sm:$0xf] }
 0x819   : > { %3186 = vst.msk [vmem:[#allocation2 + $0x61] sm:$0x7] %vm3185_vm11, %v3165_v56 }
 0x81b   : > { %3218 = vrot.lane.b32.xlu1 %v3162_v49, %s5450_s24 }
 0x81f   : > { %3222 = vrot.lane.b32.xlu0 %v3164_v55, %s5450_s24  ;;  %3261 = vrot.lane.b32.xlu2 %v3157_v51, %s5449_s6 }
 0x823   : > { %3208 = vrot.lane.b32.xlu1 %v3157_v51, %s5450_s24 }
 0x827   : > { %3263 = vrot.lane.b32.xlu0 %v3158_v53, %s5449_s6  ;;  %3210 = vrot.lane.b32.xlu2 %v3158_v53, %s5450_s24 }
 0x82b   : > { %3275 = vrot.lane.b32.xlu1 %v3164_v55, %s5449_s6 }
 0x82f   : > { %3265 = vrot.lane.b32.xlu0 %v5253_v30, %s5449_s6  ;;  %3277 = vrot.lane.b32.xlu2 %v3165_v56, %s5449_s6 }
 0x833   : > { %3224 = vrot.lane.b32.xlu1 %v3165_v56, %s5450_s24 }
 0x842   : > { %v3201_v63 = vpop.permute.xlu2 %3200 }
 0x843   : > { %3239 = vst.msk [vmem:[#allocation2] sm:$0xff] %vm1438_vm4, %v3201_v63 }
 0x84a   : > { %v3256_v0 = vpop.permute.xlu2 %3255 }
 0x852   : > { %v3205_v1 = vpop.permute.xlu2 %3204 }
 0x853   : > { %3241 = vst.msk [vmem:[#allocation2 + $0x10] sm:$0xff] %vm1438_vm4, %v3205_v1 }
 0x857   : > { %v3203_v39 = vpop.permute.xlu0 %3202 }
 0x858   : > { %3240 = vst.msk [vmem:[#allocation2 + $0x8] sm:$0xff] %vm1438_vm4, %v3203_v39 }
 0x859   : > { %3294 = vst.msk [vmem:[#allocation2 + $0x7] sm:$0xff] %vm1504_vm5, %v3256_v0 }
 0x85a   : > { %v3254_v48 = vpop.permute.xlu1 %3253 }
 0x85b   : > { %3293 = vst.msk [vmem:[#allocation2 - $0x1] sm:$0xfe] %vm3292_vm2, %v3254_v48 }
 0x85f   : > { %v3258_v2 = vpop.permute.xlu0 %3257 }
 0x860   : > { %3295 = vst.msk [vmem:[#allocation2 + $0xf] sm:$0xff] %vm1504_vm5, %v3258_v2 }
 0x861   : > { %v3217_v43 = vpop.permute.xlu2 %3216 }
 0x862   : > { %3247 = vst.msk [vmem:[#allocation2 + $0x40] sm:$0xff] %vm1438_vm4, %v3217_v43  ;;  %v3308_v57 = vld [vmem:[#allocation2] sm:$0xff] }
 0x863   : > { %3716 = vmatmul.msk.f32.vlgmr.msrb.gmra.mxu1 %vm1524_vm6, %v3308_v57 }
 0x867   : > { %v3309_v44 = vld [vmem:[#allocation2 + $0x8] sm:$0xff] }
 0x869   : > { %v3272_v3 = vpop.permute.xlu2 %3271 }
 0x86b   : > { %3717 = vmatmul.msk.f32.gmra.mxu1 %vm1524_vm6, %v3309_v44 }
 0x871   : > { %v3213_v4 = vpop.permute.xlu0 %3212  ;;  %v3221_v5 = vpop.permute.xlu2 %3220 }
 0x872   : > { %3245 = vst.msk [vmem:[#allocation2 + $0x30] sm:$0xff] %vm1438_vm4, %v3213_v4 }
 0x873   : > { %3249 = vst.msk [vmem:[#allocation2 + $0x50] sm:$0xff] %vm1438_vm4, %v3221_v5 }
 0x875   : > { %v3215_v6 = vpop.permute.xlu1 %3214 }
 0x876   : > { %3246 = vst.msk [vmem:[#allocation2 + $0x38] sm:$0xff] %vm1438_vm4, %v3215_v6 }
 0x879   : > { %v3268_v22 = vpop.permute.xlu0 %3267  ;;  %v3262_v7 = vpop.permute.xlu2 %3261 }
 0x87a   : > { %3300 = vst.msk [vmem:[#allocation2 + $0x37] sm:$0xff] %vm1504_vm5, %v3268_v22 }
 0x87d   : > { %v3260_v8 = vpop.permute.xlu1 %3259 }
 0x881   : > { %v3207_v9 = vpop.permute.xlu0 %3206  ;;  %v3211_v10 = vpop.permute.xlu2 %3210 }
 0x882   : > { %3242 = vst.msk [vmem:[#allocation2 + $0x18] sm:$0xff] %vm1438_vm4, %v3207_v9 }
 0x883   : > { %3296 = vst.msk [vmem:[#allocation2 + $0x17] sm:$0xff] %vm1504_vm5, %v3260_v8 }
 0x884   : > { %3244 = vst.msk [vmem:[#allocation2 + $0x28] sm:$0xff] %vm1438_vm4, %v3211_v10 }
 0x885   : > { %v3270_v11 = vpop.permute.xlu1 %3269 }
 0x886   : > { %3301 = vst.msk [vmem:[#allocation2 + $0x3f] sm:$0xff] %vm1504_vm5, %v3270_v11 }
 0x889   : > { %v3274_v13 = vpop.permute.xlu0 %3273  ;;  %v3278_v33 = vpop.permute.xlu2 %3277 }
 0x88a   : > { %v3310_v14 = vld [vmem:[#allocation2 + $0x10] sm:$0xff] }
 0x88b   : > { %3718 = vmatmul.msk.f32.gmra.mxu1 %vm1524_vm6, %v3310_v14 }
 0x88d   : > { %v3219_v15 = vpop.permute.xlu1 %3218  ;;  %v3315_v16 = vld [vmem:[#allocation2 + $0x38] sm:$0xff] }
 0x88e   : > { %3248 = vst.msk [vmem:[#allocation2 + $0x48] sm:$0xff] %vm1438_vm4, %v3219_v15  ;;  %3723 = vmatmul.msk.f32.vlgmr.msrb.gmra.mxu3 %vm1524_vm6, %v3315_v16 }
 0x88f   : > { %3302 = vst.msk [vmem:[#allocation2 + $0x47] sm:$0xff] %vm1504_vm5, %v3272_v3 }
 0x890   : > { %3303 = vst.msk [vmem:[#allocation2 + $0x4f] sm:$0xff] %vm1504_vm5, %v3274_v13 }
 0x891   : > { %v3223_v54 = vpop.permute.xlu0 %3222 }
 0x892   : > { %3250 = vst.msk [vmem:[#allocation2 + $0x58] sm:$0xff] %vm1438_vm4, %v3223_v54 }
 0x895   : > { %v3209_v17 = vpop.permute.xlu1 %3208 }
 0x896   : > { %3243 = vst.msk [vmem:[#allocation2 + $0x20] sm:$0xff] %vm1438_vm4, %v3209_v17  ;;  %v3316_v20 = vld [vmem:[#allocation2 + $0x40] sm:$0xff]  ;;  %vm3251_vm4 = vcmask 257152  }
 0x897   : > { %3297 = vst.msk [vmem:[#allocation2 + $0x1f] sm:$0xff] %vm1504_vm5, %v3262_v7  ;;  %3724 = vmatmul.msk.f32.gmra.mxu3 %vm1524_vm6, %v3316_v20  ;;  %v3317_v27 = vld [vmem:[#allocation2 + $0x48] sm:$0xff] }
 0x899   : > { %v3264_v23 = vpop.permute.xlu0 %3263 }
 0x89a   : > { %3298 = vst.msk [vmem:[#allocation2 + $0x27] sm:$0xff] %vm1504_vm5, %v3264_v23 }
 0x89d   : > { %v3276_v24 = vpop.permute.xlu1 %3275 }
 0x89e   : > { %3304 = vst.msk [vmem:[#allocation2 + $0x57] sm:$0xff] %vm1504_vm5, %v3276_v24  ;;  %v3311_v25 = vld [vmem:[#allocation2 + $0x18] sm:$0xff] }
 0x89f   : > { %3719 = vmatmul.msk.f32.gmra.mxu1 %vm1524_vm6, %v3311_v25  ;;  %3725 = vmatmul.msk.f32.gmra.mxu3 %vm1524_vm6, %v3317_v27 }
 0x8a1   : > { %v3266_v28 = vpop.permute.xlu0 %3265  ;;  %v3312_v29 = vld [vmem:[#allocation2 + $0x20] sm:$0xff] }
 0x8a2   : > { %3299 = vst.msk [vmem:[#allocation2 + $0x2f] sm:$0xff] %vm1504_vm5, %v3266_v28  ;;  %vm3432_vm5 = vcmask 44032  }
 0x8a5   : > { %v3225_v30 = vpop.permute.xlu1 %3224  ;;  %v3318_v32 = vld [vmem:[#allocation2 + $0x50] sm:$0xff] }
 0x8a6   : > { %3252 = vst.msk [vmem:[#allocation2 + $0x60] sm:$0xf] %vm3251_vm4, %v3225_v30 }
 0x8a7   : > { %3306 = vst.msk [vmem:[#allocation2 + $0x5f] sm:$0xf] %vm3305_vm12, %v3278_v33  ;;  %3720 = vmatmul.msk.f32.gmra.mxu1 %vm1524_vm6, %v3312_v29  ;;  %3726 = vmatmul.msk.f32.gmra.mxu3 %vm1524_vm6, %v3318_v32 }
 0x8a8   : > { %3307 = vst.msk [vmem:[#allocation2 + $0x63] sm:$0x1] %vm1512_vm3, %v3772_v12 }
 0x8a9   : > { %v3313_v35 = vld [vmem:[#allocation2 + $0x28] sm:$0xff]  ;;  %v3314_v36 = vld [vmem:[#allocation2 + $0x30] sm:$0xff] }
 0x8ae   : > { %v3319_v19 = vld [vmem:[#allocation2 + $0x58] sm:$0xff] }
 0x8af   : > { %3721 = vmatmul.msk.f32.gmra.mxu1 %vm1524_vm6, %v3313_v35  ;;  %3727 = vmatmul.msk.f32.gmra.mxu3 %vm1524_vm6, %v3319_v19  ;;  %v3320_v37 = vld [vmem:[#allocation2 + $0x60] sm:$0xf] }
 0x8b7   : > { %3722 = vmatmul.msk.f32.gmra.mxu1 %vm1524_vm6, %v3314_v36  ;;  %3728 = vmatmul.msk.f32.gmra.mxu3 %vm1524_vm6, %v3320_v37 }
 0x8e0   : > { %v3381_v12 = vpop.f32.mrf.mxu1 }
 0x8e1   : > { %v3382_v52 = vadd.f32 %v3761_v38, %v3381_v12 }
 0x8e3   : > { %3420 = vst.msk [vmem:[%s5366_s2] sm:$0xff] %vm728_vm0, %v3382_v52 }
 0x8e8   : > { %v3384_v21 = vpop.f32.mrf.mxu1 }
 0x8e9   : > { %v3385_v40 = vadd.f32 %v3761_v38, %v3384_v21 }
 0x8eb   : > { %3421 = vst.msk [vmem:[%s5366_s2 + $0x8] sm:$0xff] %vm728_vm0, %v3385_v40 }
 0x908   : > { %v3387_v18 = vpop.f32.mrf.mxu1 }
 0x909   : > { %v3388_v26 = vadd.f32 %v3761_v38, %v3387_v18 }
 0x90b   : > { %3422 = vst.msk [vmem:[%s5366_s2 + $0x10] sm:$0xff] %vm728_vm0, %v3388_v26 }
 0x911   : > { %v3402_v41 = vpop.f32.mrf.mxu3 }
 0x912   : > { %v3403_v42 = vadd.f32 %v3761_v38, %v3402_v41 }
 0x914   : > { %3427 = vst.msk [vmem:[%s5366_s2 + $0x38] sm:$0xff] %vm728_vm0, %v3403_v42 }
 0x91a   : > { %v3405_v45 = vpop.f32.mrf.mxu3 }
 0x91b   : > { %v3406_v34 = vadd.f32 %v3761_v38, %v3405_v45 }
 0x91c   : > { %v3390_v46 = vpop.f32.mrf.mxu1 }
 0x91d   : > { %3428 = vst.msk [vmem:[%s5366_s2 + $0x40] sm:$0xff] %vm728_vm0, %v3406_v34  ;;  %v3391_v47 = vadd.f32 %v3761_v38, %v3390_v46 }
 0x91f   : > { %3423 = vst.msk [vmem:[%s5366_s2 + $0x18] sm:$0xff] %vm728_vm0, %v3391_v47 }
 0x922   : > { %v3408_v49 = vpop.f32.mrf.mxu3 }
 0x923   : > { %v3409_v50 = vadd.f32 %v3761_v38, %v3408_v49 }
 0x924   : > { %v3393_v51 = vpop.f32.mrf.mxu1 }
 0x925   : > { %3429 = vst.msk [vmem:[%s5366_s2 + $0x48] sm:$0xff] %vm728_vm0, %v3409_v50  ;;  %v3394_v53 = vadd.f32 %v3761_v38, %v3393_v51 }
 0x927   : > { %3424 = vst.msk [vmem:[%s5366_s2 + $0x20] sm:$0xff] %vm728_vm0, %v3394_v53 }
 0x92a   : > { %v3411_v55 = vpop.f32.mrf.mxu3 }
 0x92b   : > { %v3412_v56 = vadd.f32 %v3761_v38, %v3411_v55 }
 0x92c   : > { %v3396_v58 = vpop.f32.mrf.mxu1 }
 0x92d   : > { %3430 = vst.msk [vmem:[%s5366_s2 + $0x50] sm:$0xff] %vm728_vm0, %v3412_v56  ;;  %v3397_v59 = vadd.f32 %v3761_v38, %v3396_v58 }
 0x92f   : > { %3425 = vst.msk [vmem:[%s5366_s2 + $0x28] sm:$0xff] %vm728_vm0, %v3397_v59 }
 0x932   : > { %v3414_v60 = vpop.f32.mrf.mxu3 }
 0x933   : > { %v3415_v61 = vadd.f32 %v3761_v38, %v3414_v60 }
 0x934   : > { %v3399_v62 = vpop.f32.mrf.mxu1 }
 0x935   : > { %3431 = vst.msk [vmem:[%s5366_s2 + $0x58] sm:$0xff] %vm728_vm0, %v3415_v61  ;;  %v3400_v63 = vadd.f32 %v3761_v38, %v3399_v62 }
 0x937   : > { %3426 = vst.msk [vmem:[%s5366_s2 + $0x30] sm:$0xff] %vm728_vm0, %v3400_v63 }
 0x93a   : > { %v3417_v31 = vpop.f32.mrf.mxu3 }
 0x93b   : > { %v3418_v0 = vadd.f32 %v3761_v38, %v3417_v31 }
 0x93d   : > { %3433 = vst.msk [vmem:[%s5366_s2 + $0x60] sm:$0xf] %vm3432_vm5, %v3418_v0 }
 0x93e PF: > { %s33_s4 = sadd.s32 1, %s3768_s4  }
 0x93f   : > { %p30_p4 = scmp.ge.s32.totalorder %s33_s4, 4  }
 0x941   :  { %32 = sbr.rel (!%p30_p4) target bundleno = 9 (0x9), region = 153 }

</bundles_post_ra>
